<compile_context>
chip_gen: v6e
topology: v6e:2x2x1
jax: 0.10.0
libtpu: 0.0.40
codegen_flags: <defaults>
</compile_context>

<pallas_src>
import functools

import jax
import jax.numpy as jnp
from jax import lax
from jax.experimental import pallas as pl
from jax.experimental.pallas import tpu as pltpu

_VMEM = pl.BlockSpec(memory_space=pltpu.MemorySpace.VMEM)

_CIN_TAP = 32    # stem im2col taps padded 27 -> 32
_CP = 128        # channel padding for the 16/24/32/96-wide layers
_CP3 = 256       # channel padding for the 144-wide hidden dim of block 3
_CHEAD = 1280    # head channels (already a multiple of 128)


def _round_up(x, m):
    return ((x + m - 1) // m) * m


# ---------------------------------------------------------------------------
# The single fused Pallas kernel
# ---------------------------------------------------------------------------
def _mobilenet_kernel(
    xtap_ref, s1_ref, psum_ref,
    w_stem_ref, b_stem_ref,
    w_b1dw_ref, b_b1dw_ref,
    w_fuse_ref, b_fuse_ref,
    w_b2dw_ref, b_b2dw_ref, w_b2pw_ref, b_b2pw_ref,
    w_b3exp_ref, b_b3exp_ref, w_b3dw_ref, b_b3dw_ref, w_b3pw_ref, b_b3pw_ref,
    w_head_ref, b_head_ref, w_fc_ref, b_fc_ref,
    out_ref,
    dw_scr1_ref, dw_scr2_ref,
    *, n, h1, w1, h2, w2, hp1, hp2):
    f32 = jnp.float32
    bf16 = jnp.bfloat16
    hw1, hw2 = h1 * w1, h2 * w2
    L1, L2 = hw1 + 2 * hp1, hw2 + 2 * hp2

    def tree_sum(xs):
        # pairwise add tree (depth ~4 instead of a length-9 serial chain)
        while len(xs) > 1:
            nxt = [xs[i] + xs[i + 1] for i in range(0, len(xs) - 1, 2)]
            if len(xs) % 2:
                nxt.append(xs[-1])
            xs = nxt
        return xs[0]

    def col_edge_masks(hw, ww, c):
        # full-width column-edge masks built ONCE per resolution (no re-broadcasts)
        wcol = lax.broadcasted_iota(jnp.int32, (hw, c), 0) % ww
        return (wcol >= 1).astype(f32), (wcol < ww - 1).astype(f32)

    def depthwise3x3(scr_ref, x2d, w_ref, mask_l, mask_r, hw, ww, hp, L):
        # scr_ref: zero-initialized halo scratch; one (hw + 2*hp)-row slab per image.
        # Interior rows are (over)written here; halo rows stay zero, so dh = +-1 taps
        # read exact zero padding and only the dw = +-1 column-edge taps need a mask.
        for img in range(n):
            scr_ref[img * L + hp: img * L + hp + hw, :] = \
                x2d[img * hw:(img + 1) * hw, :]
        # Fold the column masks into the per-tap channel weights once (hoisted).
        wmul = []
        for kh in range(3):
            for kw in range(3):
                wk = w_ref[kh * 3 + kw]                       # (1, C)
                if kw == 0:
                    wmul.append(mask_l * wk)
                elif kw == 2:
                    wmul.append(mask_r * wk)
                else:
                    wmul.append(wk)
        outs = []
        for img in range(n):
            base = img * L + hp
            taps = []
            for kh in range(3):
                for kw in range(3):
                    d = (kh - 1) * ww + (kw - 1)
                    taps.append(scr_ref[base + d: base + d + hw, :]
                                * wmul[kh * 3 + kw])
            outs.append(tree_sum(taps))
        return jnp.concatenate(outs, axis=0) if n > 1 else outs[0]

    # Zero the halo scratches once; interior writes below never touch the halos.
    dw_scr1_ref[...] = jnp.zeros(dw_scr1_ref.shape, f32)
    dw_scr2_ref[...] = jnp.zeros(dw_scr2_ref.shape, f32)
    mL1, mR1 = col_edge_masks(hw1, w1, dw_scr1_ref.shape[1])   # shared by blocks 1 & 2
    mL2, mR2 = col_edge_masks(hw2, w2, dw_scr2_ref.shape[1])

    # ---- stem: host-side im2col -> single bf16 MXU matmul + bias + ReLU6 ----------
    x1 = jnp.dot(xtap_ref[...], w_stem_ref[...], preferred_element_type=f32)
    x1 = jnp.clip(x1 + b_stem_ref[...], 0.0, 6.0)                       # (m1, 128)

    # ---- block 1 (32->16, s1, t=1): dw + [projection fused into block-2 expand] ---
    a1 = jnp.clip(depthwise3x3(dw_scr1_ref, x1, w_b1dw_ref, mL1, mR1,
                               hw1, w1, hp1, L1) + b_b1dw_ref[...], 0.0, 6.0)
    e2 = jnp.clip(jnp.dot(a1.astype(bf16), w_fuse_ref[...],
                          preferred_element_type=f32) + b_fuse_ref[...], 0.0, 6.0)

    # ---- block 2 (16->24, s2, t=6): dw (stride-1) -> bf16 one-hot stride-2 select --
    # TODO(synk): compute the stride-2 depthwise only at output rows (strided scratch
    #             reads) instead of full resolution + one-hot select.
    d2 = depthwise3x3(dw_scr1_ref, e2, w_b2dw_ref, mL1, mR1, hw1, w1, hp1, L1)
    d2 = jnp.dot(s1_ref[...], d2.astype(bf16), preferred_element_type=f32)
    a2 = jnp.clip(d2 + b_b2dw_ref[...], 0.0, 6.0)
    x3 = jnp.dot(a2.astype(bf16), w_b2pw_ref[...],
                 preferred_element_type=f32) + b_b2pw_ref[...]          # (m2, 128)

    # ---- block 3 (24->24, s1, t=6) with residual -----------------------------------
    e3 = jnp.clip(jnp.dot(x3.astype(bf16), w_b3exp_ref[...],
                          preferred_element_type=f32) + b_b3exp_ref[...], 0.0, 6.0)
    a3 = jnp.clip(depthwise3x3(dw_scr2_ref, e3, w_b3dw_ref, mL2, mR2,
                               hw2, w2, hp2, L2) + b_b3dw_ref[...], 0.0, 6.0)
    x4 = jnp.dot(a3.astype(bf16), w_b3pw_ref[...],
                 preferred_element_type=f32) + b_b3pw_ref[...] + x3

    # ---- head 1x1 conv + BN + ReLU6, adaptive avg-pool, FC --------------------------
    e4 = jnp.clip(jnp.dot(x4.astype(bf16), w_head_ref[...],
                          preferred_element_type=f32) + b_head_ref[...], 0.0, 6.0)
    # Module quirk: the head conv_bn_act has kernel_size=1 but padding=1, so the pooled
    # map is (h2+2)x(w2+2) whose border ring equals relu6(folded BN bias) exactly.
    border = jnp.clip(b_head_ref[...], 0.0, 6.0)                        # (1, 1280)
    n_border = float((h2 + 2) * (w2 + 2) - hw2)
    inv_area = 1.0 / float((h2 + 2) * (w2 + 2))
    pooled = (jnp.dot(psum_ref[...], e4.astype(bf16), preferred_element_type=f32)
              + n_border * border) * inv_area                           # (n, 1280)
    logits = jnp.dot(pooled.astype(bf16), w_fc_ref[...],
                     preferred_element_type=f32) + b_fc_ref[...]
    out_ref[...] = logits.astype(out_ref.dtype)


# ---------------------------------------------------------------------------
# JAX-side helpers (tiny constant matrices, bf16: 0/1 values are exact)
# ---------------------------------------------------------------------------
def _stride2_select(n, h, w):
    # One-hot (n*(h//2)*(w//2), n*h*w) matrix picking the even-(h, w) rows of a
    # row-flattened NHWC activation -> stride 2 as a single bf16 MXU matmul.
    ho, wo = h // 2, w // 2
    mi, mo = n * h * w, n * ho * wo
    i = jnp.arange(mo)
    img = i // (ho * wo)
    rem = i % (ho * wo)
    src = img * (h * w) + (2 * (rem // wo)) * w + 2 * (rem % wo)
    return (jnp.arange(mi)[None, :] == src[:, None]).astype(jnp.bfloat16)


def _image_sum(n, rows_per_image):
    # (n, n*rows_per_image) matrix summing the rows that belong to each image.
    j = jnp.arange(n * rows_per_image)
    return (j[None, :] // rows_per_image == jnp.arange(n)[:, None]).astype(jnp.bfloat16)


# ---------------------------------------------------------------------------
# Parameters: deterministic synthetic init, BN folded into weights, lane padding
# ---------------------------------------------------------------------------
def _bn_fold(key, c, eps=1e-5):
    k1, k2, k3, k4 = jax.random.split(key, 4)
    gamma = 1.0 + 0.1 * jax.random.normal(k1, (c,), dtype=jnp.float32)
    beta = 0.1 * jax.random.normal(k2, (c,), dtype=jnp.float32)
    mean = 0.1 * jax.random.normal(k3, (c,), dtype=jnp.float32)
    var = 1.0 + 0.1 * jax.random.uniform(k4, (c,), dtype=jnp.float32)
    scale = gamma / jnp.sqrt(var + eps)
    bias = beta - mean * scale
    return scale, bias


def init_params(key, num_classes=10):
    keys = iter(jax.random.split(key, 32))

    def conv_w(shape):
        return 0.1 * jax.random.normal(next(keys), shape, dtype=jnp.float32)

    p = {}
    p["stem_w"] = conv_w((3, 3, 3, 32))            # (kh, kw, cin, cout)
    p["stem_bn"] = _bn_fold(next(keys), 32)
    p["b1_dw_w"] = conv_w((9, 1, 32))
    p["b1_dw_bn"] = _bn_fold(next(keys), 32)
    p["b1_pw_w"] = conv_w((32, 16))
    p["b1_pw_bn"] = _bn_fold(next(keys), 16)
    p["b2_exp_w"] = conv_w((16, 96))
    p["b2_exp_bn"] = _bn_fold(next(keys), 96)
    p["b2_dw_w"] = conv_w((9, 1, 96))
    p["b2_dw_bn"] = _bn_fold(next(keys), 96)
    p["b2_pw_w"] = conv_w((96, 24))
    p["b2_pw_bn"] = _bn_fold(next(keys), 24)
    p["b3_exp_w"] = conv_w((24, 144))
    p["b3_exp_bn"] = _bn_fold(next(keys), 144)
    p["b3_dw_w"] = conv_w((9, 1, 144))
    p["b3_dw_bn"] = _bn_fold(next(keys), 144)
    p["b3_pw_w"] = conv_w((144, 24))
    p["b3_pw_bn"] = _bn_fold(next(keys), 24)
    p["head_w"] = conv_w((24, 1280))
    p["head_bn"] = _bn_fold(next(keys), 1280)
    p["fc_w"] = conv_w((1280, num_classes))
    p["fc_b"] = 0.1 * jax.random.normal(next(keys), (num_classes,), dtype=jnp.float32)
    return p


def prepare_params(p, num_classes):
    # Fold BN scale/shift into conv weights, fuse block-1 projection into block-2
    # expansion, zero-pad all channel dims to lane-dense widths, cast MXU operands to
    # bf16 (depthwise weights stay f32 for the VPU path).
    ncls_p = _round_up(num_classes, 128)

    def pad2(w, k_to, n_to):
        return jnp.pad(w, ((0, k_to - w.shape[0]), (0, n_to - w.shape[1])))

    def pad_bias(b, c_to):
        return jnp.pad(b, (0, c_to - b.shape[0])).reshape(1, c_to).astype(jnp.float32)

    def folded(wname, bnname):
        scale, bias = p[bnname]
        return p[wname] * scale[None, :], bias

    def pw(wname, bnname, k_to, n_to):
        w, bias = folded(wname, bnname)
        return pad2(w, k_to, n_to).astype(jnp.bfloat16), pad_bias(bias, n_to)

    def dw(wname, bnname, c_to):
        scale, bias = p[bnname]
        w = p[wname] * scale[None, None, :]
        w = jnp.pad(w, ((0, 0), (0, 0), (0, c_to - w.shape[2]))).astype(jnp.float32)
        return w, pad_bias(bias, c_to)

    q = {}
    # stem: BN fold + reshape to the (kh*3+kw)*3+cin tap order used by the host im2col
    scale, bias = p["stem_bn"]
    w = (p["stem_w"] * scale[None, None, None, :]).reshape(27, 32)
    q["w_stem"] = pad2(w, _CIN_TAP, _CP).astype(jnp.bfloat16)
    q["b_stem"] = pad_bias(bias, _CP)

    q["w_b1dw"], q["b_b1dw"] = dw("b1_dw_w", "b1_dw_bn", _CP)

    # Fuse block-1 1x1 projection (linear bottleneck) into block-2 1x1 expansion.
    w1p, b1p = folded("b1_pw_w", "b1_pw_bn")        # (32, 16), (16,)
    w2e, b2e = folded("b2_exp_w", "b2_exp_bn")      # (16, 96), (96,)
    w_fuse = w1p @ w2e                              # (32, 96) in f32
    b_fuse = b1p @ w2e + b2e                        # (96,)
    q["w_fuse"] = pad2(w_fuse, _CP, _CP).astype(jnp.bfloat16)
    q["b_fuse"] = pad_bias(b_fuse, _CP)

    q["w_b2dw"], q["b_b2dw"] = dw("b2_dw_w", "b2_dw_bn", _CP)
    q["w_b2pw"], q["b_b2pw"] = pw("b2_pw_w", "b2_pw_bn", _CP, _CP)
    q["w_b3exp"], q["b_b3exp"] = pw("b3_exp_w", "b3_exp_bn", _CP, _CP3)
    q["w_b3dw"], q["b_b3dw"] = dw("b3_dw_w", "b3_dw_bn", _CP3)
    q["w_b3pw"], q["b_b3pw"] = pw("b3_pw_w", "b3_pw_bn", _CP3, _CP)
    q["w_head"], q["b_head"] = pw("head_w", "head_bn", _CP, _CHEAD)
    q["w_fc"] = pad2(p["fc_w"], _CHEAD, ncls_p).astype(jnp.bfloat16)
    q["b_fc"] = pad_bias(p["fc_b"], ncls_p)
    return q


# ---------------------------------------------------------------------------
# Forward pass wrapper: one fused pallas_call for the whole network
# ---------------------------------------------------------------------------
def mobilenet_v2_forward(x_nchw, qparams, num_classes):
    n, c, h0, w0 = x_nchw.shape
    assert h0 % 4 == 0 and w0 % 4 == 0, "spatial dims must be divisible by 4"
    h1, w1 = h0 // 2, w0 // 2
    h2, w2 = h1 // 2, w1 // 2
    m1, m2 = n * h1 * w1, n * h2 * w2
    ncls_p = qparams["w_fc"].shape[1]

    # Host-side stem im2col: 3x3 / stride 2 / pad 1 patches of the NHWC input,
    # flattened to (m1, 9*c), zero-padded to 32 lanes, cast to bf16.
    x = jnp.transpose(x_nchw, (0, 2, 3, 1))
    xp = jnp.pad(x, ((0, 0), (1, 1), (1, 1), (0, 0)))
    cols = [xp[:, kh:kh + h0:2, kw:kw + w0:2, :]
            for kh in range(3) for kw in range(3)]
    x_taps = jnp.concatenate(cols, axis=-1).reshape(m1, 9 * c)
    x_taps = jnp.pad(x_taps, ((0, 0), (0, _CIN_TAP - 9 * c))).astype(jnp.bfloat16)

    s1 = _stride2_select(n, h1, w1)          # (m2, m1) bf16: block-2 dw stride-2 pick
    psum = _image_sum(n, h2 * w2)            # (n, m2)  bf16: per-image spatial sum

    # Zero-halo scratch geometry for the depthwise convs (halo >= w+1, 8-row aligned).
    hp1 = _round_up(w1 + 1, 8)
    hp2 = _round_up(w2 + 1, 8)
    L1 = h1 * w1 + 2 * hp1
    L2 = h2 * w2 + 2 * hp2

    q = qparams
    args = (x_taps, s1, psum,
            q["w_stem"], q["b_stem"],
            q["w_b1dw"], q["b_b1dw"],
            q["w_fuse"], q["b_fuse"],
            q["w_b2dw"], q["b_b2dw"], q["w_b2pw"], q["b_b2pw"],
            q["w_b3exp"], q["b_b3exp"], q["w_b3dw"], q["b_b3dw"],
            q["w_b3pw"], q["b_b3pw"],
            q["w_head"], q["b_head"], q["w_fc"], q["b_fc"])

    # TODO(synk): for v7x (2 TensorCores) add a batch-parallel grid; a single block is
    #             best on v5e/v6e at this size and keeps all weights resident once.
    out = pl.pallas_call(
        functools.partial(_mobilenet_kernel, n=n, h1=h1, w1=w1, h2=h2, w2=w2,
                          hp1=hp1, hp2=hp2),
        out_shape=jax.ShapeDtypeStruct((n, ncls_p), jnp.float32),
        in_specs=[_VMEM] * len(args),
        out_specs=_VMEM,
        scratch_shapes=[pltpu.VMEM((n * L1, _CP), jnp.float32),
                        pltpu.VMEM((n * L2, _CP3), jnp.float32)],
        compiler_params=pltpu.CompilerParams(vmem_limit_bytes=32 * 1024 * 1024),
    )(*args)
    return out[:, :num_classes]


if __name__ == "__main__":
    key = jax.random.PRNGKey(0)
    kp, kx = jax.random.split(key)
    num_classes = 10
    raw_params = init_params(kp, num_classes=num_classes)
    params = prepare_params(raw_params, num_classes)

    # small input consistent with the module: MobileNetV2(input_shape=(3, 16, 16))
    x = jax.random.normal(kx, (2, 3, 16, 16), dtype=jnp.float32)

    fwd = jax.jit(functools.partial(mobilenet_v2_forward, num_classes=num_classes))
    out = fwd(x, params)
    jax.block_until_ready(out)

    assert out.shape == (2, num_classes), out.shape
    assert bool(jnp.all(jnp.isfinite(out)))
    print("KERNEL_OK")
</pallas_src>

<mosaic_0001>
module attributes {stable_mosaic.version = 11 : i64} {
  func.func @_mobilenet_kernel(%arg0: memref<128x32xbf16, #tpu.memory_space<vmem>>, %arg1: memref<32x128xbf16, #tpu.memory_space<vmem>>, %arg2: memref<2x32xbf16, #tpu.memory_space<vmem>>, %arg3: memref<32x128xbf16, #tpu.memory_space<vmem>>, %arg4: memref<1x128xf32, #tpu.memory_space<vmem>>, %arg5: memref<9x1x128xf32, #tpu.memory_space<vmem>>, %arg6: memref<1x128xf32, #tpu.memory_space<vmem>>, %arg7: memref<128x128xbf16, #tpu.memory_space<vmem>>, %arg8: memref<1x128xf32, #tpu.memory_space<vmem>>, %arg9: memref<9x1x128xf32, #tpu.memory_space<vmem>>, %arg10: memref<1x128xf32, #tpu.memory_space<vmem>>, %arg11: memref<128x128xbf16, #tpu.memory_space<vmem>>, %arg12: memref<1x128xf32, #tpu.memory_space<vmem>>, %arg13: memref<128x256xbf16, #tpu.memory_space<vmem>>, %arg14: memref<1x256xf32, #tpu.memory_space<vmem>>, %arg15: memref<9x1x256xf32, #tpu.memory_space<vmem>>, %arg16: memref<1x256xf32, #tpu.memory_space<vmem>>, %arg17: memref<256x128xbf16, #tpu.memory_space<vmem>>, %arg18: memref<1x128xf32, #tpu.memory_space<vmem>>, %arg19: memref<128x1280xbf16, #tpu.memory_space<vmem>>, %arg20: memref<1x1280xf32, #tpu.memory_space<vmem>>, %arg21: memref<1280x128xbf16, #tpu.memory_space<vmem>>, %arg22: memref<1x128xf32, #tpu.memory_space<vmem>>, %arg23: memref<2x128xf32, #tpu.memory_space<vmem>>, %arg24: memref<192x128xf32, #tpu.memory_space<vmem>>, %arg25: memref<64x256xf32, #tpu.memory_space<vmem>>) attributes {dimension_semantics = [], scalar_prefetch = 0 : i64, scratch_operands = 2 : i64, tpu.core_type = #tpu.core_type<tc>} {
    %cst = arith.constant 0.000000e+00 : f32
    %0 = vector.broadcast %cst : f32 to vector<192x128xf32>
    %c0 = arith.constant 0 : index
    %c0_0 = arith.constant 0 : index
    %1 = vector.load %arg24[%c0, %c0_0] : memref<192x128xf32, #tpu.memory_space<vmem>>, vector<192x128xf32>
    tpu.vector_store %arg24[%c0, %c0_0], %0 {strides = array<i32>} : memref<192x128xf32, #tpu.memory_space<vmem>>, vector<192x128xf32>,
    %cst_1 = arith.constant 0.000000e+00 : f32
    %2 = vector.broadcast %cst_1 : f32 to vector<64x256xf32>
    %c0_2 = arith.constant 0 : index
    %c0_3 = arith.constant 0 : index
    %3 = vector.load %arg25[%c0_2, %c0_3] : memref<64x256xf32, #tpu.memory_space<vmem>>, vector<64x256xf32>
    tpu.vector_store %arg25[%c0_2, %c0_3], %2 {strides = array<i32>} : memref<64x256xf32, #tpu.memory_space<vmem>>, vector<64x256xf32>,
    %4 = tpu.iota {dimensions = array<i32: 0>} : vector<64x128xi32>
    %c8_i32 = arith.constant 8 : i32
    %c0_i32 = arith.constant 0 : i32
    %5 = arith.cmpi eq, %c8_i32, %c0_i32 : i32
    %c1_i32 = arith.constant 1 : i32
    %6 = arith.select %5, %c1_i32, %c8_i32 : i32
    %7 = vector.broadcast %6 : i32 to vector<64x128xi32>
    %8 = arith.remsi %4, %7 : vector<64x128xi32>
    %c0_i32_4 = arith.constant 0 : i32
    %9 = vector.broadcast %c0_i32_4 : i32 to vector<64x128xi32>
    %10 = arith.cmpi ne, %8, %9 : vector<64x128xi32>
    %c0_i32_5 = arith.constant 0 : i32
    %11 = vector.broadcast %c0_i32_5 : i32 to vector<64x128xi32>
    %12 = arith.cmpi slt, %8, %11 : vector<64x128xi32>
    %c0_i32_6 = arith.constant 0 : i32
    %13 = arith.cmpi slt, %6, %c0_i32_6 : i32
    %14 = vector.broadcast %13 : i1 to vector<64x128xi1>
    %15 = vector.broadcast %14 : vector<64x128xi1> to vector<64x128xi1>
    %16 = arith.xori %12, %15 : vector<64x128xi1>
    %17 = arith.andi %16, %10 : vector<64x128xi1>
    %18 = vector.broadcast %6 : i32 to vector<64x128xi32>
    %19 = arith.addi %8, %18 : vector<64x128xi32>
    %20 = arith.select %17, %19, %8 : vector<64x128xi1>, vector<64x128xi32>
    %c1_i32_7 = arith.constant 1 : i32
    %21 = vector.broadcast %c1_i32_7 : i32 to vector<64x128xi32>
    %22 = arith.cmpi sge, %20, %21 : vector<64x128xi32>
    %23 = arith.extui %22 : vector<64x128xi1> to vector<64x128xi32>
    %24 = arith.sitofp %23 : vector<64x128xi32> to vector<64x128xf32>
    %c7_i32 = arith.constant 7 : i32
    %25 = vector.broadcast %c7_i32 : i32 to vector<64x128xi32>
    %26 = arith.cmpi slt, %20, %25 : vector<64x128xi32>
    %27 = arith.extui %26 : vector<64x128xi1> to vector<64x128xi32>
    %28 = arith.sitofp %27 : vector<64x128xi32> to vector<64x128xf32>
    %29 = tpu.iota {dimensions = array<i32: 0>} : vector<16x256xi32>
    %c4_i32 = arith.constant 4 : i32
    %c0_i32_8 = arith.constant 0 : i32
    %30 = arith.cmpi eq, %c4_i32, %c0_i32_8 : i32
    %c1_i32_9 = arith.constant 1 : i32
    %31 = arith.select %30, %c1_i32_9, %c4_i32 : i32
    %32 = vector.broadcast %31 : i32 to vector<16x256xi32>
    %33 = arith.remsi %29, %32 : vector<16x256xi32>
    %c0_i32_10 = arith.constant 0 : i32
    %34 = vector.broadcast %c0_i32_10 : i32 to vector<16x256xi32>
    %35 = arith.cmpi ne, %33, %34 : vector<16x256xi32>
    %c0_i32_11 = arith.constant 0 : i32
    %36 = vector.broadcast %c0_i32_11 : i32 to vector<16x256xi32>
    %37 = arith.cmpi slt, %33, %36 : vector<16x256xi32>
    %c0_i32_12 = arith.constant 0 : i32
    %38 = arith.cmpi slt, %31, %c0_i32_12 : i32
    %39 = vector.broadcast %38 : i1 to vector<16x256xi1>
    %40 = vector.broadcast %39 : vector<16x256xi1> to vector<16x256xi1>
    %41 = arith.xori %37, %40 : vector<16x256xi1>
    %42 = arith.andi %41, %35 : vector<16x256xi1>
    %43 = vector.broadcast %31 : i32 to vector<16x256xi32>
    %44 = arith.addi %33, %43 : vector<16x256xi32>
    %45 = arith.select %42, %44, %33 : vector<16x256xi1>, vector<16x256xi32>
    %c1_i32_13 = arith.constant 1 : i32
    %46 = vector.broadcast %c1_i32_13 : i32 to vector<16x256xi32>
    %47 = arith.cmpi sge, %45, %46 : vector<16x256xi32>
    %48 = arith.extui %47 : vector<16x256xi1> to vector<16x256xi32>
    %49 = arith.sitofp %48 : vector<16x256xi32> to vector<16x256xf32>
    %c3_i32 = arith.constant 3 : i32
    %50 = vector.broadcast %c3_i32 : i32 to vector<16x256xi32>
    %51 = arith.cmpi slt, %45, %50 : vector<16x256xi32>
    %52 = arith.extui %51 : vector<16x256xi1> to vector<16x256xi32>
    %53 = arith.sitofp %52 : vector<16x256xi32> to vector<16x256xf32>
    %c0_14 = arith.constant 0 : index
    %c0_15 = arith.constant 0 : index
    %54 = vector.load %arg0[%c0_14, %c0_15] : memref<128x32xbf16, #tpu.memory_space<vmem>>, vector<128x32xbf16>
    %c0_16 = arith.constant 0 : index
    %c0_17 = arith.constant 0 : index
    %55 = vector.load %arg3[%c0_16, %c0_17] : memref<32x128xbf16, #tpu.memory_space<vmem>>, vector<32x128xbf16>
    %cst_18 = arith.constant dense<0.000000e+00> : vector<128x128xf32>
    %56 = tpu.matmul %54, %55, %cst_18 {dimension_numbers = #tpu.dot_dimension_numbers<[1], [0], [0], [1], [0, 0, 1, 1], [], []>} : vector<128x32xbf16>, vector<32x128xbf16>, vector<128x128xf32> -> vector<128x128xf32>
    %c0_19 = arith.constant 0 : index
    %c0_20 = arith.constant 0 : index
    %57 = vector.load %arg4[%c0_19, %c0_20] : memref<1x128xf32, #tpu.memory_space<vmem>>, vector<1x128xf32>
    %58 = vector.broadcast %57 : vector<1x128xf32> to vector<128x128xf32>
    %59 = arith.addf %56, %58 : vector<128x128xf32>
    %cst_21 = arith.constant 0.000000e+00 : f32
    %cst_22 = arith.constant 6.000000e+00 : f32
    %60 = vector.broadcast %cst_21 : f32 to vector<128x128xf32>
    %61 = arith.maximumf %60, %59 : vector<128x128xf32>
    %62 = vector.broadcast %cst_22 : f32 to vector<128x128xf32>
    %63 = arith.minimumf %62, %61 : vector<128x128xf32>
    %64 = vector.extract_strided_slice %63 {offsets = [0, 0], sizes = [64, 128], strides = [1, 1]} : vector<128x128xf32> to vector<64x128xf32>
    %c16 = arith.constant 16 : index
    %c0_23 = arith.constant 0 : index
    %65 = vector.load %arg24[%c16, %c0_23] : memref<192x128xf32, #tpu.memory_space<vmem>>, vector<64x128xf32>
    tpu.vector_store %arg24[%c16, %c0_23], %64 {strides = array<i32>} : memref<192x128xf32, #tpu.memory_space<vmem>>, vector<64x128xf32>,
    %66 = vector.extract_strided_slice %63 {offsets = [64, 0], sizes = [64, 128], strides = [1, 1]} : vector<128x128xf32> to vector<64x128xf32>
    %c112 = arith.constant 112 : index
    %c0_24 = arith.constant 0 : index
    %67 = vector.load %arg24[%c112, %c0_24] : memref<192x128xf32, #tpu.memory_space<vmem>>, vector<64x128xf32>
    tpu.vector_store %arg24[%c112, %c0_24], %66 {strides = array<i32>} : memref<192x128xf32, #tpu.memory_space<vmem>>, vector<64x128xf32>,
    %c0_25 = arith.constant 0 : index
    %c0_26 = arith.constant 0 : index
    %c0_27 = arith.constant 0 : index
    %68 = vector.load %arg5[%c0_25, %c0_26, %c0_27] : memref<9x1x128xf32, #tpu.memory_space<vmem>>, vector<1x1x128xf32>
    %69 = vector.shape_cast %68 : vector<1x1x128xf32> to vector<1x128xf32>
    %70 = vector.broadcast %69 : vector<1x128xf32> to vector<64x128xf32>
    %71 = arith.mulf %24, %70 : vector<64x128xf32>
    %c1 = arith.constant 1 : index
    %c0_28 = arith.constant 0 : index
    %c0_29 = arith.constant 0 : index
    %72 = vector.load %arg5[%c1, %c0_28, %c0_29] : memref<9x1x128xf32, #tpu.memory_space<vmem>>, vector<1x1x128xf32>
    %73 = vector.shape_cast %72 : vector<1x1x128xf32> to vector<1x128xf32>
    %c2 = arith.constant 2 : index
    %c0_30 = arith.constant 0 : index
    %c0_31 = arith.constant 0 : index
    %74 = vector.load %arg5[%c2, %c0_30, %c0_31] : memref<9x1x128xf32, #tpu.memory_space<vmem>>, vector<1x1x128xf32>
    %75 = vector.shape_cast %74 : vector<1x1x128xf32> to vector<1x128xf32>
    %76 = vector.broadcast %75 : vector<1x128xf32> to vector<64x128xf32>
    %77 = arith.mulf %28, %76 : vector<64x128xf32>
    %c3 = arith.constant 3 : index
    %c0_32 = arith.constant 0 : index
    %c0_33 = arith.constant 0 : index
    %78 = vector.load %arg5[%c3, %c0_32, %c0_33] : memref<9x1x128xf32, #tpu.memory_space<vmem>>, vector<1x1x128xf32>
    %79 = vector.shape_cast %78 : vector<1x1x128xf32> to vector<1x128xf32>
    %80 = vector.broadcast %79 : vector<1x128xf32> to vector<64x128xf32>
    %81 = arith.mulf %24, %80 : vector<64x128xf32>
    %c4 = arith.constant 4 : index
    %c0_34 = arith.constant 0 : index
    %c0_35 = arith.constant 0 : index
    %82 = vector.load %arg5[%c4, %c0_34, %c0_35] : memref<9x1x128xf32, #tpu.memory_space<vmem>>, vector<1x1x128xf32>
    %83 = vector.shape_cast %82 : vector<1x1x128xf32> to vector<1x128xf32>
    %c5 = arith.constant 5 : index
    %c0_36 = arith.constant 0 : index
    %c0_37 = arith.constant 0 : index
    %84 = vector.load %arg5[%c5, %c0_36, %c0_37] : memref<9x1x128xf32, #tpu.memory_space<vmem>>, vector<1x1x128xf32>
    %85 = vector.shape_cast %84 : vector<1x1x128xf32> to vector<1x128xf32>
    %86 = vector.broadcast %85 : vector<1x128xf32> to vector<64x128xf32>
    %87 = arith.mulf %28, %86 : vector<64x128xf32>
    %c6 = arith.constant 6 : index
    %c0_38 = arith.constant 0 : index
    %c0_39 = arith.constant 0 : index
    %88 = vector.load %arg5[%c6, %c0_38, %c0_39] : memref<9x1x128xf32, #tpu.memory_space<vmem>>, vector<1x1x128xf32>
    %89 = vector.shape_cast %88 : vector<1x1x128xf32> to vector<1x128xf32>
    %90 = vector.broadcast %89 : vector<1x128xf32> to vector<64x128xf32>
    %91 = arith.mulf %24, %90 : vector<64x128xf32>
    %c7 = arith.constant 7 : index
    %c0_40 = arith.constant 0 : index
    %c0_41 = arith.constant 0 : index
    %92 = vector.load %arg5[%c7, %c0_40, %c0_41] : memref<9x1x128xf32, #tpu.memory_space<vmem>>, vector<1x1x128xf32>
    %93 = vector.shape_cast %92 : vector<1x1x128xf32> to vector<1x128xf32>
    %c8 = arith.constant 8 : index
    %c0_42 = arith.constant 0 : index
    %c0_43 = arith.constant 0 : index
    %94 = vector.load %arg5[%c8, %c0_42, %c0_43] : memref<9x1x128xf32, #tpu.memory_space<vmem>>, vector<1x1x128xf32>
    %95 = vector.shape_cast %94 : vector<1x1x128xf32> to vector<1x128xf32>
    %96 = vector.broadcast %95 : vector<1x128xf32> to vector<64x128xf32>
    %97 = arith.mulf %28, %96 : vector<64x128xf32>
    %c7_44 = arith.constant 7 : index
    %c0_45 = arith.constant 0 : index
    %98 = vector.load %arg24[%c7_44, %c0_45] : memref<192x128xf32, #tpu.memory_space<vmem>>, vector<64x128xf32>
    %99 = arith.mulf %98, %71 : vector<64x128xf32>
    %c8_46 = arith.constant 8 : index
    %c0_47 = arith.constant 0 : index
    %100 = vector.load %arg24[%c8_46, %c0_47] : memref<192x128xf32, #tpu.memory_space<vmem>>, vector<64x128xf32>
    %101 = vector.broadcast %73 : vector<1x128xf32> to vector<64x128xf32>
    %102 = arith.mulf %100, %101 : vector<64x128xf32>
    %c9 = arith.constant 9 : index
    %c0_48 = arith.constant 0 : index
    %103 = vector.load %arg24[%c9, %c0_48] : memref<192x128xf32, #tpu.memory_space<vmem>>, vector<64x128xf32>
    %104 = arith.mulf %103, %77 : vector<64x128xf32>
    %c15 = arith.constant 15 : index
    %c0_49 = arith.constant 0 : index
    %105 = vector.load %arg24[%c15, %c0_49] : memref<192x128xf32, #tpu.memory_space<vmem>>, vector<64x128xf32>
    %106 = arith.mulf %105, %81 : vector<64x128xf32>
    %c16_50 = arith.constant 16 : index
    %c0_51 = arith.constant 0 : index
    %107 = vector.load %arg24[%c16_50, %c0_51] : memref<192x128xf32, #tpu.memory_space<vmem>>, vector<64x128xf32>
    %108 = vector.broadcast %83 : vector<1x128xf32> to vector<64x128xf32>
    %109 = arith.mulf %107, %108 : vector<64x128xf32>
    %c17 = arith.constant 17 : index
    %c0_52 = arith.constant 0 : index
    %110 = vector.load %arg24[%c17, %c0_52] : memref<192x128xf32, #tpu.memory_space<vmem>>, vector<64x128xf32>
    %111 = arith.mulf %110, %87 : vector<64x128xf32>
    %c23 = arith.constant 23 : index
    %c0_53 = arith.constant 0 : index
    %112 = vector.load %arg24[%c23, %c0_53] : memref<192x128xf32, #tpu.memory_space<vmem>>, vector<64x128xf32>
    %113 = arith.mulf %112, %91 : vector<64x128xf32>
    %c24 = arith.constant 24 : index
    %c0_54 = arith.constant 0 : index
    %114 = vector.load %arg24[%c24, %c0_54] : memref<192x128xf32, #tpu.memory_space<vmem>>, vector<64x128xf32>
    %115 = vector.broadcast %93 : vector<1x128xf32> to vector<64x128xf32>
    %116 = arith.mulf %114, %115 : vector<64x128xf32>
    %c25 = arith.constant 25 : index
    %c0_55 = arith.constant 0 : index
    %117 = vector.load %arg24[%c25, %c0_55] : memref<192x128xf32, #tpu.memory_space<vmem>>, vector<64x128xf32>
    %118 = arith.mulf %117, %97 : vector<64x128xf32>
    %119 = arith.addf %99, %102 : vector<64x128xf32>
    %120 = arith.addf %104, %106 : vector<64x128xf32>
    %121 = arith.addf %109, %111 : vector<64x128xf32>
    %122 = arith.addf %113, %116 : vector<64x128xf32>
    %123 = arith.addf %119, %120 : vector<64x128xf32>
    %124 = arith.addf %121, %122 : vector<64x128xf32>
    %125 = arith.addf %123, %124 : vector<64x128xf32>
    %126 = arith.addf %125, %118 : vector<64x128xf32>
    %c103 = arith.constant 103 : index
    %c0_56 = arith.constant 0 : index
    %127 = vector.load %arg24[%c103, %c0_56] : memref<192x128xf32, #tpu.memory_space<vmem>>, vector<64x128xf32>
    %128 = arith.mulf %127, %71 : vector<64x128xf32>
    %c104 = arith.constant 104 : index
    %c0_57 = arith.constant 0 : index
    %129 = vector.load %arg24[%c104, %c0_57] : memref<192x128xf32, #tpu.memory_space<vmem>>, vector<64x128xf32>
    %130 = vector.broadcast %73 : vector<1x128xf32> to vector<64x128xf32>
    %131 = arith.mulf %129, %130 : vector<64x128xf32>
    %c105 = arith.constant 105 : index
    %c0_58 = arith.constant 0 : index
    %132 = vector.load %arg24[%c105, %c0_58] : memref<192x128xf32, #tpu.memory_space<vmem>>, vector<64x128xf32>
    %133 = arith.mulf %132, %77 : vector<64x128xf32>
    %c111 = arith.constant 111 : index
    %c0_59 = arith.constant 0 : index
    %134 = vector.load %arg24[%c111, %c0_59] : memref<192x128xf32, #tpu.memory_space<vmem>>, vector<64x128xf32>
    %135 = arith.mulf %134, %81 : vector<64x128xf32>
    %c112_60 = arith.constant 112 : index
    %c0_61 = arith.constant 0 : index
    %136 = vector.load %arg24[%c112_60, %c0_61] : memref<192x128xf32, #tpu.memory_space<vmem>>, vector<64x128xf32>
    %137 = vector.broadcast %83 : vector<1x128xf32> to vector<64x128xf32>
    %138 = arith.mulf %136, %137 : vector<64x128xf32>
    %c113 = arith.constant 113 : index
    %c0_62 = arith.constant 0 : index
    %139 = vector.load %arg24[%c113, %c0_62] : memref<192x128xf32, #tpu.memory_space<vmem>>, vector<64x128xf32>
    %140 = arith.mulf %139, %87 : vector<64x128xf32>
    %c119 = arith.constant 119 : index
    %c0_63 = arith.constant 0 : index
    %141 = vector.load %arg24[%c119, %c0_63] : memref<192x128xf32, #tpu.memory_space<vmem>>, vector<64x128xf32>
    %142 = arith.mulf %141, %91 : vector<64x128xf32>
    %c120 = arith.constant 120 : index
    %c0_64 = arith.constant 0 : index
    %143 = vector.load %arg24[%c120, %c0_64] : memref<192x128xf32, #tpu.memory_space<vmem>>, vector<64x128xf32>
    %144 = vector.broadcast %93 : vector<1x128xf32> to vector<64x128xf32>
    %145 = arith.mulf %143, %144 : vector<64x128xf32>
    %c121 = arith.constant 121 : index
    %c0_65 = arith.constant 0 : index
    %146 = vector.load %arg24[%c121, %c0_65] : memref<192x128xf32, #tpu.memory_space<vmem>>, vector<64x128xf32>
    %147 = arith.mulf %146, %97 : vector<64x128xf32>
    %148 = arith.addf %128, %131 : vector<64x128xf32>
    %149 = arith.addf %133, %135 : vector<64x128xf32>
    %150 = arith.addf %138, %140 : vector<64x128xf32>
    %151 = arith.addf %142, %145 : vector<64x128xf32>
    %152 = arith.addf %148, %149 : vector<64x128xf32>
    %153 = arith.addf %150, %151 : vector<64x128xf32>
    %154 = arith.addf %152, %153 : vector<64x128xf32>
    %155 = arith.addf %154, %147 : vector<64x128xf32>
    %156 = tpu.concatenate %126, %155 in 0 : vector<64x128xf32>, vector<64x128xf32> -> vector<128x128xf32>
    %c0_66 = arith.constant 0 : index
    %c0_67 = arith.constant 0 : index
    %157 = vector.load %arg6[%c0_66, %c0_67] : memref<1x128xf32, #tpu.memory_space<vmem>>, vector<1x128xf32>
    %158 = vector.broadcast %157 : vector<1x128xf32> to vector<128x128xf32>
    %159 = arith.addf %156, %158 : vector<128x128xf32>
    %cst_68 = arith.constant 0.000000e+00 : f32
    %cst_69 = arith.constant 6.000000e+00 : f32
    %160 = vector.broadcast %cst_68 : f32 to vector<128x128xf32>
    %161 = arith.maximumf %160, %159 : vector<128x128xf32>
    %162 = vector.broadcast %cst_69 : f32 to vector<128x128xf32>
    %163 = arith.minimumf %162, %161 : vector<128x128xf32>
    %164 = arith.truncf %163 : vector<128x128xf32> to vector<128x128xbf16>
    %c0_70 = arith.constant 0 : index
    %c0_71 = arith.constant 0 : index
    %165 = vector.load %arg7[%c0_70, %c0_71] : memref<128x128xbf16, #tpu.memory_space<vmem>>, vector<128x128xbf16>
    %cst_72 = arith.constant dense<0.000000e+00> : vector<128x128xf32>
    %166 = tpu.matmul %164, %165, %cst_72 {dimension_numbers = #tpu.dot_dimension_numbers<[1], [0], [0], [1], [0, 0, 1, 1], [], []>} : vector<128x128xbf16>, vector<128x128xbf16>, vector<128x128xf32> -> vector<128x128xf32>
    %c0_73 = arith.constant 0 : index
    %c0_74 = arith.constant 0 : index
    %167 = vector.load %arg8[%c0_73, %c0_74] : memref<1x128xf32, #tpu.memory_space<vmem>>, vector<1x128xf32>
    %168 = vector.broadcast %167 : vector<1x128xf32> to vector<128x128xf32>
    %169 = arith.addf %166, %168 : vector<128x128xf32>
    %cst_75 = arith.constant 0.000000e+00 : f32
    %cst_76 = arith.constant 6.000000e+00 : f32
    %170 = vector.broadcast %cst_75 : f32 to vector<128x128xf32>
    %171 = arith.maximumf %170, %169 : vector<128x128xf32>
    %172 = vector.broadcast %cst_76 : f32 to vector<128x128xf32>
    %173 = arith.minimumf %172, %171 : vector<128x128xf32>
    %174 = vector.extract_strided_slice %173 {offsets = [0, 0], sizes = [64, 128], strides = [1, 1]} : vector<128x128xf32> to vector<64x128xf32>
    %c16_77 = arith.constant 16 : index
    %c0_78 = arith.constant 0 : index
    %175 = vector.load %arg24[%c16_77, %c0_78] : memref<192x128xf32, #tpu.memory_space<vmem>>, vector<64x128xf32>
    tpu.vector_store %arg24[%c16_77, %c0_78], %174 {strides = array<i32>} : memref<192x128xf32, #tpu.memory_space<vmem>>, vector<64x128xf32>,
    %176 = vector.extract_strided_slice %173 {offsets = [64, 0], sizes = [64, 128], strides = [1, 1]} : vector<128x128xf32> to vector<64x128xf32>
    %c112_79 = arith.constant 112 : index
    %c0_80 = arith.constant 0 : index
    %177 = vector.load %arg24[%c112_79, %c0_80] : memref<192x128xf32, #tpu.memory_space<vmem>>, vector<64x128xf32>
    tpu.vector_store %arg24[%c112_79, %c0_80], %176 {strides = array<i32>} : memref<192x128xf32, #tpu.memory_space<vmem>>, vector<64x128xf32>,
    %c0_81 = arith.constant 0 : index
    %c0_82 = arith.constant 0 : index
    %c0_83 = arith.constant 0 : index
    %178 = vector.load %arg9[%c0_81, %c0_82, %c0_83] : memref<9x1x128xf32, #tpu.memory_space<vmem>>, vector<1x1x128xf32>
    %179 = vector.shape_cast %178 : vector<1x1x128xf32> to vector<1x128xf32>
    %180 = vector.broadcast %179 : vector<1x128xf32> to vector<64x128xf32>
    %181 = arith.mulf %24, %180 : vector<64x128xf32>
    %c1_84 = arith.constant 1 : index
    %c0_85 = arith.constant 0 : index
    %c0_86 = arith.constant 0 : index
    %182 = vector.load %arg9[%c1_84, %c0_85, %c0_86] : memref<9x1x128xf32, #tpu.memory_space<vmem>>, vector<1x1x128xf32>
    %183 = vector.shape_cast %182 : vector<1x1x128xf32> to vector<1x128xf32>
    %c2_87 = arith.constant 2 : index
    %c0_88 = arith.constant 0 : index
    %c0_89 = arith.constant 0 : index
    %184 = vector.load %arg9[%c2_87, %c0_88, %c0_89] : memref<9x1x128xf32, #tpu.memory_space<vmem>>, vector<1x1x128xf32>
    %185 = vector.shape_cast %184 : vector<1x1x128xf32> to vector<1x128xf32>
    %186 = vector.broadcast %185 : vector<1x128xf32> to vector<64x128xf32>
    %187 = arith.mulf %28, %186 : vector<64x128xf32>
    %c3_90 = arith.constant 3 : index
    %c0_91 = arith.constant 0 : index
    %c0_92 = arith.constant 0 : index
    %188 = vector.load %arg9[%c3_90, %c0_91, %c0_92] : memref<9x1x128xf32, #tpu.memory_space<vmem>>, vector<1x1x128xf32>
    %189 = vector.shape_cast %188 : vector<1x1x128xf32> to vector<1x128xf32>
    %190 = vector.broadcast %189 : vector<1x128xf32> to vector<64x128xf32>
    %191 = arith.mulf %24, %190 : vector<64x128xf32>
    %c4_93 = arith.constant 4 : index
    %c0_94 = arith.constant 0 : index
    %c0_95 = arith.constant 0 : index
    %192 = vector.load %arg9[%c4_93, %c0_94, %c0_95] : memref<9x1x128xf32, #tpu.memory_space<vmem>>, vector<1x1x128xf32>
    %193 = vector.shape_cast %192 : vector<1x1x128xf32> to vector<1x128xf32>
    %c5_96 = arith.constant 5 : index
    %c0_97 = arith.constant 0 : index
    %c0_98 = arith.constant 0 : index
    %194 = vector.load %arg9[%c5_96, %c0_97, %c0_98] : memref<9x1x128xf32, #tpu.memory_space<vmem>>, vector<1x1x128xf32>
    %195 = vector.shape_cast %194 : vector<1x1x128xf32> to vector<1x128xf32>
    %196 = vector.broadcast %195 : vector<1x128xf32> to vector<64x128xf32>
    %197 = arith.mulf %28, %196 : vector<64x128xf32>
    %c6_99 = arith.constant 6 : index
    %c0_100 = arith.constant 0 : index
    %c0_101 = arith.constant 0 : index
    %198 = vector.load %arg9[%c6_99, %c0_100, %c0_101] : memref<9x1x128xf32, #tpu.memory_space<vmem>>, vector<1x1x128xf32>
    %199 = vector.shape_cast %198 : vector<1x1x128xf32> to vector<1x128xf32>
    %200 = vector.broadcast %199 : vector<1x128xf32> to vector<64x128xf32>
    %201 = arith.mulf %24, %200 : vector<64x128xf32>
    %c7_102 = arith.constant 7 : index
    %c0_103 = arith.constant 0 : index
    %c0_104 = arith.constant 0 : index
    %202 = vector.load %arg9[%c7_102, %c0_103, %c0_104] : memref<9x1x128xf32, #tpu.memory_space<vmem>>, vector<1x1x128xf32>
    %203 = vector.shape_cast %202 : vector<1x1x128xf32> to vector<1x128xf32>
    %c8_105 = arith.constant 8 : index
    %c0_106 = arith.constant 0 : index
    %c0_107 = arith.constant 0 : index
    %204 = vector.load %arg9[%c8_105, %c0_106, %c0_107] : memref<9x1x128xf32, #tpu.memory_space<vmem>>, vector<1x1x128xf32>
    %205 = vector.shape_cast %204 : vector<1x1x128xf32> to vector<1x128xf32>
    %206 = vector.broadcast %205 : vector<1x128xf32> to vector<64x128xf32>
    %207 = arith.mulf %28, %206 : vector<64x128xf32>
    %c7_108 = arith.constant 7 : index
    %c0_109 = arith.constant 0 : index
    %208 = vector.load %arg24[%c7_108, %c0_109] : memref<192x128xf32, #tpu.memory_space<vmem>>, vector<64x128xf32>
    %209 = arith.mulf %208, %181 : vector<64x128xf32>
    %c8_110 = arith.constant 8 : index
    %c0_111 = arith.constant 0 : index
    %210 = vector.load %arg24[%c8_110, %c0_111] : memref<192x128xf32, #tpu.memory_space<vmem>>, vector<64x128xf32>
    %211 = vector.broadcast %183 : vector<1x128xf32> to vector<64x128xf32>
    %212 = arith.mulf %210, %211 : vector<64x128xf32>
    %c9_112 = arith.constant 9 : index
    %c0_113 = arith.constant 0 : index
    %213 = vector.load %arg24[%c9_112, %c0_113] : memref<192x128xf32, #tpu.memory_space<vmem>>, vector<64x128xf32>
    %214 = arith.mulf %213, %187 : vector<64x128xf32>
    %c15_114 = arith.constant 15 : index
    %c0_115 = arith.constant 0 : index
    %215 = vector.load %arg24[%c15_114, %c0_115] : memref<192x128xf32, #tpu.memory_space<vmem>>, vector<64x128xf32>
    %216 = arith.mulf %215, %191 : vector<64x128xf32>
    %c16_116 = arith.constant 16 : index
    %c0_117 = arith.constant 0 : index
    %217 = vector.load %arg24[%c16_116, %c0_117] : memref<192x128xf32, #tpu.memory_space<vmem>>, vector<64x128xf32>
    %218 = vector.broadcast %193 : vector<1x128xf32> to vector<64x128xf32>
    %219 = arith.mulf %217, %218 : vector<64x128xf32>
    %c17_118 = arith.constant 17 : index
    %c0_119 = arith.constant 0 : index
    %220 = vector.load %arg24[%c17_118, %c0_119] : memref<192x128xf32, #tpu.memory_space<vmem>>, vector<64x128xf32>
    %221 = arith.mulf %220, %197 : vector<64x128xf32>
    %c23_120 = arith.constant 23 : index
    %c0_121 = arith.constant 0 : index
    %222 = vector.load %arg24[%c23_120, %c0_121] : memref<192x128xf32, #tpu.memory_space<vmem>>, vector<64x128xf32>
    %223 = arith.mulf %222, %201 : vector<64x128xf32>
    %c24_122 = arith.constant 24 : index
    %c0_123 = arith.constant 0 : index
    %224 = vector.load %arg24[%c24_122, %c0_123] : memref<192x128xf32, #tpu.memory_space<vmem>>, vector<64x128xf32>
    %225 = vector.broadcast %203 : vector<1x128xf32> to vector<64x128xf32>
    %226 = arith.mulf %224, %225 : vector<64x128xf32>
    %c25_124 = arith.constant 25 : index
    %c0_125 = arith.constant 0 : index
    %227 = vector.load %arg24[%c25_124, %c0_125] : memref<192x128xf32, #tpu.memory_space<vmem>>, vector<64x128xf32>
    %228 = arith.mulf %227, %207 : vector<64x128xf32>
    %229 = arith.addf %209, %212 : vector<64x128xf32>
    %230 = arith.addf %214, %216 : vector<64x128xf32>
    %231 = arith.addf %219, %221 : vector<64x128xf32>
    %232 = arith.addf %223, %226 : vector<64x128xf32>
    %233 = arith.addf %229, %230 : vector<64x128xf32>
    %234 = arith.addf %231, %232 : vector<64x128xf32>
    %235 = arith.addf %233, %234 : vector<64x128xf32>
    %236 = arith.addf %235, %228 : vector<64x128xf32>
    %c103_126 = arith.constant 103 : index
    %c0_127 = arith.constant 0 : index
    %237 = vector.load %arg24[%c103_126, %c0_127] : memref<192x128xf32, #tpu.memory_space<vmem>>, vector<64x128xf32>
    %238 = arith.mulf %237, %181 : vector<64x128xf32>
    %c104_128 = arith.constant 104 : index
    %c0_129 = arith.constant 0 : index
    %239 = vector.load %arg24[%c104_128, %c0_129] : memref<192x128xf32, #tpu.memory_space<vmem>>, vector<64x128xf32>
    %240 = vector.broadcast %183 : vector<1x128xf32> to vector<64x128xf32>
    %241 = arith.mulf %239, %240 : vector<64x128xf32>
    %c105_130 = arith.constant 105 : index
    %c0_131 = arith.constant 0 : index
    %242 = vector.load %arg24[%c105_130, %c0_131] : memref<192x128xf32, #tpu.memory_space<vmem>>, vector<64x128xf32>
    %243 = arith.mulf %242, %187 : vector<64x128xf32>
    %c111_132 = arith.constant 111 : index
    %c0_133 = arith.constant 0 : index
    %244 = vector.load %arg24[%c111_132, %c0_133] : memref<192x128xf32, #tpu.memory_space<vmem>>, vector<64x128xf32>
    %245 = arith.mulf %244, %191 : vector<64x128xf32>
    %c112_134 = arith.constant 112 : index
    %c0_135 = arith.constant 0 : index
    %246 = vector.load %arg24[%c112_134, %c0_135] : memref<192x128xf32, #tpu.memory_space<vmem>>, vector<64x128xf32>
    %247 = vector.broadcast %193 : vector<1x128xf32> to vector<64x128xf32>
    %248 = arith.mulf %246, %247 : vector<64x128xf32>
    %c113_136 = arith.constant 113 : index
    %c0_137 = arith.constant 0 : index
    %249 = vector.load %arg24[%c113_136, %c0_137] : memref<192x128xf32, #tpu.memory_space<vmem>>, vector<64x128xf32>
    %250 = arith.mulf %249, %197 : vector<64x128xf32>
    %c119_138 = arith.constant 119 : index
    %c0_139 = arith.constant 0 : index
    %251 = vector.load %arg24[%c119_138, %c0_139] : memref<192x128xf32, #tpu.memory_space<vmem>>, vector<64x128xf32>
    %252 = arith.mulf %251, %201 : vector<64x128xf32>
    %c120_140 = arith.constant 120 : index
    %c0_141 = arith.constant 0 : index
    %253 = vector.load %arg24[%c120_140, %c0_141] : memref<192x128xf32, #tpu.memory_space<vmem>>, vector<64x128xf32>
    %254 = vector.broadcast %203 : vector<1x128xf32> to vector<64x128xf32>
    %255 = arith.mulf %253, %254 : vector<64x128xf32>
    %c121_142 = arith.constant 121 : index
    %c0_143 = arith.constant 0 : index
    %256 = vector.load %arg24[%c121_142, %c0_143] : memref<192x128xf32, #tpu.memory_space<vmem>>, vector<64x128xf32>
    %257 = arith.mulf %256, %207 : vector<64x128xf32>
    %258 = arith.addf %238, %241 : vector<64x128xf32>
    %259 = arith.addf %243, %245 : vector<64x128xf32>
    %260 = arith.addf %248, %250 : vector<64x128xf32>
    %261 = arith.addf %252, %255 : vector<64x128xf32>
    %262 = arith.addf %258, %259 : vector<64x128xf32>
    %263 = arith.addf %260, %261 : vector<64x128xf32>
    %264 = arith.addf %262, %263 : vector<64x128xf32>
    %265 = arith.addf %264, %257 : vector<64x128xf32>
    %266 = tpu.concatenate %236, %265 in 0 : vector<64x128xf32>, vector<64x128xf32> -> vector<128x128xf32>
    %c0_144 = arith.constant 0 : index
    %c0_145 = arith.constant 0 : index
    %267 = vector.load %arg1[%c0_144, %c0_145] : memref<32x128xbf16, #tpu.memory_space<vmem>>, vector<32x128xbf16>
    %268 = arith.truncf %266 : vector<128x128xf32> to vector<128x128xbf16>
    %cst_146 = arith.constant dense<0.000000e+00> : vector<32x128xf32>
    %269 = tpu.matmul %267, %268, %cst_146 {dimension_numbers = #tpu.dot_dimension_numbers<[1], [0], [0], [1], [0, 0, 1, 1], [], []>} : vector<32x128xbf16>, vector<128x128xbf16>, vector<32x128xf32> -> vector<32x128xf32>
    %c0_147 = arith.constant 0 : index
    %c0_148 = arith.constant 0 : index
    %270 = vector.load %arg10[%c0_147, %c0_148] : memref<1x128xf32, #tpu.memory_space<vmem>>, vector<1x128xf32>
    %271 = vector.broadcast %270 : vector<1x128xf32> to vector<32x128xf32>
    %272 = arith.addf %269, %271 : vector<32x128xf32>
    %cst_149 = arith.constant 0.000000e+00 : f32
    %cst_150 = arith.constant 6.000000e+00 : f32
    %273 = vector.broadcast %cst_149 : f32 to vector<32x128xf32>
    %274 = arith.maximumf %273, %272 : vector<32x128xf32>
    %275 = vector.broadcast %cst_150 : f32 to vector<32x128xf32>
    %276 = arith.minimumf %275, %274 : vector<32x128xf32>
    %277 = arith.truncf %276 : vector<32x128xf32> to vector<32x128xbf16>
    %c0_151 = arith.constant 0 : index
    %c0_152 = arith.constant 0 : index
    %278 = vector.load %arg11[%c0_151, %c0_152] : memref<128x128xbf16, #tpu.memory_space<vmem>>, vector<128x128xbf16>
    %cst_153 = arith.constant dense<0.000000e+00> : vector<32x128xf32>
    %279 = tpu.matmul %277, %278, %cst_153 {dimension_numbers = #tpu.dot_dimension_numbers<[1], [0], [0], [1], [0, 0, 1, 1], [], []>} : vector<32x128xbf16>, vector<128x128xbf16>, vector<32x128xf32> -> vector<32x128xf32>
    %c0_154 = arith.constant 0 : index
    %c0_155 = arith.constant 0 : index
    %280 = vector.load %arg12[%c0_154, %c0_155] : memref<1x128xf32, #tpu.memory_space<vmem>>, vector<1x128xf32>
    %281 = vector.broadcast %280 : vector<1x128xf32> to vector<32x128xf32>
    %282 = arith.addf %279, %281 : vector<32x128xf32>
    %283 = arith.truncf %282 : vector<32x128xf32> to vector<32x128xbf16>
    %c0_156 = arith.constant 0 : index
    %c0_157 = arith.constant 0 : index
    %284 = vector.load %arg13[%c0_156, %c0_157] : memref<128x256xbf16, #tpu.memory_space<vmem>>, vector<128x256xbf16>
    %cst_158 = arith.constant dense<0.000000e+00> : vector<32x256xf32>
    %285 = tpu.matmul %283, %284, %cst_158 {dimension_numbers = #tpu.dot_dimension_numbers<[1], [0], [0], [1], [0, 0, 1, 1], [], []>} : vector<32x128xbf16>, vector<128x256xbf16>, vector<32x256xf32> -> vector<32x256xf32>
    %c0_159 = arith.constant 0 : index
    %c0_160 = arith.constant 0 : index
    %286 = vector.load %arg14[%c0_159, %c0_160] : memref<1x256xf32, #tpu.memory_space<vmem>>, vector<1x256xf32>
    %287 = vector.broadcast %286 : vector<1x256xf32> to vector<32x256xf32>
    %288 = arith.addf %285, %287 : vector<32x256xf32>
    %cst_161 = arith.constant 0.000000e+00 : f32
    %cst_162 = arith.constant 6.000000e+00 : f32
    %289 = vector.broadcast %cst_161 : f32 to vector<32x256xf32>
    %290 = arith.maximumf %289, %288 : vector<32x256xf32>
    %291 = vector.broadcast %cst_162 : f32 to vector<32x256xf32>
    %292 = arith.minimumf %291, %290 : vector<32x256xf32>
    %293 = vector.extract_strided_slice %292 {offsets = [0, 0], sizes = [16, 256], strides = [1, 1]} : vector<32x256xf32> to vector<16x256xf32>
    %c8_163 = arith.constant 8 : index
    %c0_164 = arith.constant 0 : index
    %294 = vector.load %arg25[%c8_163, %c0_164] : memref<64x256xf32, #tpu.memory_space<vmem>>, vector<16x256xf32>
    tpu.vector_store %arg25[%c8_163, %c0_164], %293 {strides = array<i32>} : memref<64x256xf32, #tpu.memory_space<vmem>>, vector<16x256xf32>,
    %295 = vector.extract_strided_slice %292 {offsets = [16, 0], sizes = [16, 256], strides = [1, 1]} : vector<32x256xf32> to vector<16x256xf32>
    %c40 = arith.constant 40 : index
    %c0_165 = arith.constant 0 : index
    %296 = vector.load %arg25[%c40, %c0_165] : memref<64x256xf32, #tpu.memory_space<vmem>>, vector<16x256xf32>
    tpu.vector_store %arg25[%c40, %c0_165], %295 {strides = array<i32>} : memref<64x256xf32, #tpu.memory_space<vmem>>, vector<16x256xf32>,
    %c0_166 = arith.constant 0 : index
    %c0_167 = arith.constant 0 : index
    %c0_168 = arith.constant 0 : index
    %297 = vector.load %arg15[%c0_166, %c0_167, %c0_168] : memref<9x1x256xf32, #tpu.memory_space<vmem>>, vector<1x1x256xf32>
    %298 = vector.shape_cast %297 : vector<1x1x256xf32> to vector<1x256xf32>
    %299 = vector.broadcast %298 : vector<1x256xf32> to vector<16x256xf32>
    %300 = arith.mulf %49, %299 : vector<16x256xf32>
    %c1_169 = arith.constant 1 : index
    %c0_170 = arith.constant 0 : index
    %c0_171 = arith.constant 0 : index
    %301 = vector.load %arg15[%c1_169, %c0_170, %c0_171] : memref<9x1x256xf32, #tpu.memory_space<vmem>>, vector<1x1x256xf32>
    %302 = vector.shape_cast %301 : vector<1x1x256xf32> to vector<1x256xf32>
    %c2_172 = arith.constant 2 : index
    %c0_173 = arith.constant 0 : index
    %c0_174 = arith.constant 0 : index
    %303 = vector.load %arg15[%c2_172, %c0_173, %c0_174] : memref<9x1x256xf32, #tpu.memory_space<vmem>>, vector<1x1x256xf32>
    %304 = vector.shape_cast %303 : vector<1x1x256xf32> to vector<1x256xf32>
    %305 = vector.broadcast %304 : vector<1x256xf32> to vector<16x256xf32>
    %306 = arith.mulf %53, %305 : vector<16x256xf32>
    %c3_175 = arith.constant 3 : index
    %c0_176 = arith.constant 0 : index
    %c0_177 = arith.constant 0 : index
    %307 = vector.load %arg15[%c3_175, %c0_176, %c0_177] : memref<9x1x256xf32, #tpu.memory_space<vmem>>, vector<1x1x256xf32>
    %308 = vector.shape_cast %307 : vector<1x1x256xf32> to vector<1x256xf32>
    %309 = vector.broadcast %308 : vector<1x256xf32> to vector<16x256xf32>
    %310 = arith.mulf %49, %309 : vector<16x256xf32>
    %c4_178 = arith.constant 4 : index
    %c0_179 = arith.constant 0 : index
    %c0_180 = arith.constant 0 : index
    %311 = vector.load %arg15[%c4_178, %c0_179, %c0_180] : memref<9x1x256xf32, #tpu.memory_space<vmem>>, vector<1x1x256xf32>
    %312 = vector.shape_cast %311 : vector<1x1x256xf32> to vector<1x256xf32>
    %c5_181 = arith.constant 5 : index
    %c0_182 = arith.constant 0 : index
    %c0_183 = arith.constant 0 : index
    %313 = vector.load %arg15[%c5_181, %c0_182, %c0_183] : memref<9x1x256xf32, #tpu.memory_space<vmem>>, vector<1x1x256xf32>
    %314 = vector.shape_cast %313 : vector<1x1x256xf32> to vector<1x256xf32>
    %315 = vector.broadcast %314 : vector<1x256xf32> to vector<16x256xf32>
    %316 = arith.mulf %53, %315 : vector<16x256xf32>
    %c6_184 = arith.constant 6 : index
    %c0_185 = arith.constant 0 : index
    %c0_186 = arith.constant 0 : index
    %317 = vector.load %arg15[%c6_184, %c0_185, %c0_186] : memref<9x1x256xf32, #tpu.memory_space<vmem>>, vector<1x1x256xf32>
    %318 = vector.shape_cast %317 : vector<1x1x256xf32> to vector<1x256xf32>
    %319 = vector.broadcast %318 : vector<1x256xf32> to vector<16x256xf32>
    %320 = arith.mulf %49, %319 : vector<16x256xf32>
    %c7_187 = arith.constant 7 : index
    %c0_188 = arith.constant 0 : index
    %c0_189 = arith.constant 0 : index
    %321 = vector.load %arg15[%c7_187, %c0_188, %c0_189] : memref<9x1x256xf32, #tpu.memory_space<vmem>>, vector<1x1x256xf32>
    %322 = vector.shape_cast %321 : vector<1x1x256xf32> to vector<1x256xf32>
    %c8_190 = arith.constant 8 : index
    %c0_191 = arith.constant 0 : index
    %c0_192 = arith.constant 0 : index
    %323 = vector.load %arg15[%c8_190, %c0_191, %c0_192] : memref<9x1x256xf32, #tpu.memory_space<vmem>>, vector<1x1x256xf32>
    %324 = vector.shape_cast %323 : vector<1x1x256xf32> to vector<1x256xf32>
    %325 = vector.broadcast %324 : vector<1x256xf32> to vector<16x256xf32>
    %326 = arith.mulf %53, %325 : vector<16x256xf32>
    %c3_193 = arith.constant 3 : index
    %c0_194 = arith.constant 0 : index
    %327 = vector.load %arg25[%c3_193, %c0_194] : memref<64x256xf32, #tpu.memory_space<vmem>>, vector<16x256xf32>
    %328 = arith.mulf %327, %300 : vector<16x256xf32>
    %c4_195 = arith.constant 4 : index
    %c0_196 = arith.constant 0 : index
    %329 = vector.load %arg25[%c4_195, %c0_196] : memref<64x256xf32, #tpu.memory_space<vmem>>, vector<16x256xf32>
    %330 = vector.broadcast %302 : vector<1x256xf32> to vector<16x256xf32>
    %331 = arith.mulf %329, %330 : vector<16x256xf32>
    %c5_197 = arith.constant 5 : index
    %c0_198 = arith.constant 0 : index
    %332 = vector.load %arg25[%c5_197, %c0_198] : memref<64x256xf32, #tpu.memory_space<vmem>>, vector<16x256xf32>
    %333 = arith.mulf %332, %306 : vector<16x256xf32>
    %c7_199 = arith.constant 7 : index
    %c0_200 = arith.constant 0 : index
    %334 = vector.load %arg25[%c7_199, %c0_200] : memref<64x256xf32, #tpu.memory_space<vmem>>, vector<16x256xf32>
    %335 = arith.mulf %334, %310 : vector<16x256xf32>
    %c8_201 = arith.constant 8 : index
    %c0_202 = arith.constant 0 : index
    %336 = vector.load %arg25[%c8_201, %c0_202] : memref<64x256xf32, #tpu.memory_space<vmem>>, vector<16x256xf32>
    %337 = vector.broadcast %312 : vector<1x256xf32> to vector<16x256xf32>
    %338 = arith.mulf %336, %337 : vector<16x256xf32>
    %c9_203 = arith.constant 9 : index
    %c0_204 = arith.constant 0 : index
    %339 = vector.load %arg25[%c9_203, %c0_204] : memref<64x256xf32, #tpu.memory_space<vmem>>, vector<16x256xf32>
    %340 = arith.mulf %339, %316 : vector<16x256xf32>
    %c11 = arith.constant 11 : index
    %c0_205 = arith.constant 0 : index
    %341 = vector.load %arg25[%c11, %c0_205] : memref<64x256xf32, #tpu.memory_space<vmem>>, vector<16x256xf32>
    %342 = arith.mulf %341, %320 : vector<16x256xf32>
    %c12 = arith.constant 12 : index
    %c0_206 = arith.constant 0 : index
    %343 = vector.load %arg25[%c12, %c0_206] : memref<64x256xf32, #tpu.memory_space<vmem>>, vector<16x256xf32>
    %344 = vector.broadcast %322 : vector<1x256xf32> to vector<16x256xf32>
    %345 = arith.mulf %343, %344 : vector<16x256xf32>
    %c13 = arith.constant 13 : index
    %c0_207 = arith.constant 0 : index
    %346 = vector.load %arg25[%c13, %c0_207] : memref<64x256xf32, #tpu.memory_space<vmem>>, vector<16x256xf32>
    %347 = arith.mulf %346, %326 : vector<16x256xf32>
    %348 = arith.addf %328, %331 : vector<16x256xf32>
    %349 = arith.addf %333, %335 : vector<16x256xf32>
    %350 = arith.addf %338, %340 : vector<16x256xf32>
    %351 = arith.addf %342, %345 : vector<16x256xf32>
    %352 = arith.addf %348, %349 : vector<16x256xf32>
    %353 = arith.addf %350, %351 : vector<16x256xf32>
    %354 = arith.addf %352, %353 : vector<16x256xf32>
    %355 = arith.addf %354, %347 : vector<16x256xf32>
    %c35 = arith.constant 35 : index
    %c0_208 = arith.constant 0 : index
    %356 = vector.load %arg25[%c35, %c0_208] : memref<64x256xf32, #tpu.memory_space<vmem>>, vector<16x256xf32>
    %357 = arith.mulf %356, %300 : vector<16x256xf32>
    %c36 = arith.constant 36 : index
    %c0_209 = arith.constant 0 : index
    %358 = vector.load %arg25[%c36, %c0_209] : memref<64x256xf32, #tpu.memory_space<vmem>>, vector<16x256xf32>
    %359 = vector.broadcast %302 : vector<1x256xf32> to vector<16x256xf32>
    %360 = arith.mulf %358, %359 : vector<16x256xf32>
    %c37 = arith.constant 37 : index
    %c0_210 = arith.constant 0 : index
    %361 = vector.load %arg25[%c37, %c0_210] : memref<64x256xf32, #tpu.memory_space<vmem>>, vector<16x256xf32>
    %362 = arith.mulf %361, %306 : vector<16x256xf32>
    %c39 = arith.constant 39 : index
    %c0_211 = arith.constant 0 : index
    %363 = vector.load %arg25[%c39, %c0_211] : memref<64x256xf32, #tpu.memory_space<vmem>>, vector<16x256xf32>
    %364 = arith.mulf %363, %310 : vector<16x256xf32>
    %c40_212 = arith.constant 40 : index
    %c0_213 = arith.constant 0 : index
    %365 = vector.load %arg25[%c40_212, %c0_213] : memref<64x256xf32, #tpu.memory_space<vmem>>, vector<16x256xf32>
    %366 = vector.broadcast %312 : vector<1x256xf32> to vector<16x256xf32>
    %367 = arith.mulf %365, %366 : vector<16x256xf32>
    %c41 = arith.constant 41 : index
    %c0_214 = arith.constant 0 : index
    %368 = vector.load %arg25[%c41, %c0_214] : memref<64x256xf32, #tpu.memory_space<vmem>>, vector<16x256xf32>
    %369 = arith.mulf %368, %316 : vector<16x256xf32>
    %c43 = arith.constant 43 : index
    %c0_215 = arith.constant 0 : index
    %370 = vector.load %arg25[%c43, %c0_215] : memref<64x256xf32, #tpu.memory_space<vmem>>, vector<16x256xf32>
    %371 = arith.mulf %370, %320 : vector<16x256xf32>
    %c44 = arith.constant 44 : index
    %c0_216 = arith.constant 0 : index
    %372 = vector.load %arg25[%c44, %c0_216] : memref<64x256xf32, #tpu.memory_space<vmem>>, vector<16x256xf32>
    %373 = vector.broadcast %322 : vector<1x256xf32> to vector<16x256xf32>
    %374 = arith.mulf %372, %373 : vector<16x256xf32>
    %c45 = arith.constant 45 : index
    %c0_217 = arith.constant 0 : index
    %375 = vector.load %arg25[%c45, %c0_217] : memref<64x256xf32, #tpu.memory_space<vmem>>, vector<16x256xf32>
    %376 = arith.mulf %375, %326 : vector<16x256xf32>
    %377 = arith.addf %357, %360 : vector<16x256xf32>
    %378 = arith.addf %362, %364 : vector<16x256xf32>
    %379 = arith.addf %367, %369 : vector<16x256xf32>
    %380 = arith.addf %371, %374 : vector<16x256xf32>
    %381 = arith.addf %377, %378 : vector<16x256xf32>
    %382 = arith.addf %379, %380 : vector<16x256xf32>
    %383 = arith.addf %381, %382 : vector<16x256xf32>
    %384 = arith.addf %383, %376 : vector<16x256xf32>
    %385 = tpu.concatenate %355, %384 in 0 : vector<16x256xf32>, vector<16x256xf32> -> vector<32x256xf32>
    %c0_218 = arith.constant 0 : index
    %c0_219 = arith.constant 0 : index
    %386 = vector.load %arg16[%c0_218, %c0_219] : memref<1x256xf32, #tpu.memory_space<vmem>>, vector<1x256xf32>
    %387 = vector.broadcast %386 : vector<1x256xf32> to vector<32x256xf32>
    %388 = arith.addf %385, %387 : vector<32x256xf32>
    %cst_220 = arith.constant 0.000000e+00 : f32
    %cst_221 = arith.constant 6.000000e+00 : f32
    %389 = vector.broadcast %cst_220 : f32 to vector<32x256xf32>
    %390 = arith.maximumf %389, %388 : vector<32x256xf32>
    %391 = vector.broadcast %cst_221 : f32 to vector<32x256xf32>
    %392 = arith.minimumf %391, %390 : vector<32x256xf32>
    %393 = arith.truncf %392 : vector<32x256xf32> to vector<32x256xbf16>
    %c0_222 = arith.constant 0 : index
    %c0_223 = arith.constant 0 : index
    %394 = vector.load %arg17[%c0_222, %c0_223] : memref<256x128xbf16, #tpu.memory_space<vmem>>, vector<256x128xbf16>
    %cst_224 = arith.constant dense<0.000000e+00> : vector<32x128xf32>
    %395 = tpu.matmul %393, %394, %cst_224 {dimension_numbers = #tpu.dot_dimension_numbers<[1], [0], [0], [1], [0, 0, 1, 1], [], []>} : vector<32x256xbf16>, vector<256x128xbf16>, vector<32x128xf32> -> vector<32x128xf32>
    %c0_225 = arith.constant 0 : index
    %c0_226 = arith.constant 0 : index
    %396 = vector.load %arg18[%c0_225, %c0_226] : memref<1x128xf32, #tpu.memory_space<vmem>>, vector<1x128xf32>
    %397 = vector.broadcast %396 : vector<1x128xf32> to vector<32x128xf32>
    %398 = arith.addf %395, %397 : vector<32x128xf32>
    %399 = arith.addf %398, %282 : vector<32x128xf32>
    %400 = arith.truncf %399 : vector<32x128xf32> to vector<32x128xbf16>
    %c0_227 = arith.constant 0 : index
    %c0_228 = arith.constant 0 : index
    %401 = vector.load %arg19[%c0_227, %c0_228] : memref<128x1280xbf16, #tpu.memory_space<vmem>>, vector<128x1280xbf16>
    %cst_229 = arith.constant dense<0.000000e+00> : vector<32x1280xf32>
    %402 = tpu.matmul %400, %401, %cst_229 {dimension_numbers = #tpu.dot_dimension_numbers<[1], [0], [0], [1], [0, 0, 1, 1], [], []>} : vector<32x128xbf16>, vector<128x1280xbf16>, vector<32x1280xf32> -> vector<32x1280xf32>
    %c0_230 = arith.constant 0 : index
    %c0_231 = arith.constant 0 : index
    %403 = vector.load %arg20[%c0_230, %c0_231] : memref<1x1280xf32, #tpu.memory_space<vmem>>, vector<1x1280xf32>
    %404 = vector.broadcast %403 : vector<1x1280xf32> to vector<32x1280xf32>
    %405 = arith.addf %402, %404 : vector<32x1280xf32>
    %cst_232 = arith.constant 0.000000e+00 : f32
    %cst_233 = arith.constant 6.000000e+00 : f32
    %406 = vector.broadcast %cst_232 : f32 to vector<32x1280xf32>
    %407 = arith.maximumf %406, %405 : vector<32x1280xf32>
    %408 = vector.broadcast %cst_233 : f32 to vector<32x1280xf32>
    %409 = arith.minimumf %408, %407 : vector<32x1280xf32>
    %c0_234 = arith.constant 0 : index
    %c0_235 = arith.constant 0 : index
    %410 = vector.load %arg20[%c0_234, %c0_235] : memref<1x1280xf32, #tpu.memory_space<vmem>>, vector<1x1280xf32>
    %cst_236 = arith.constant 0.000000e+00 : f32
    %cst_237 = arith.constant 6.000000e+00 : f32
    %411 = vector.broadcast %cst_236 : f32 to vector<1x1280xf32>
    %412 = arith.maximumf %411, %410 : vector<1x1280xf32>
    %413 = vector.broadcast %cst_237 : f32 to vector<1x1280xf32>
    %414 = arith.minimumf %413, %412 : vector<1x1280xf32>
    %c0_238 = arith.constant 0 : index
    %c0_239 = arith.constant 0 : index
    %415 = vector.load %arg2[%c0_238, %c0_239] : memref<2x32xbf16, #tpu.memory_space<vmem>>, vector<2x32xbf16>
    %416 = arith.truncf %409 : vector<32x1280xf32> to vector<32x1280xbf16>
    %cst_240 = arith.constant dense<0.000000e+00> : vector<2x1280xf32>
    %417 = tpu.matmul %415, %416, %cst_240 {dimension_numbers = #tpu.dot_dimension_numbers<[1], [0], [0], [1], [0, 0, 1, 1], [], []>} : vector<2x32xbf16>, vector<32x1280xbf16>, vector<2x1280xf32> -> vector<2x1280xf32>
    %cst_241 = arith.constant 2.000000e+01 : f32
    %418 = vector.broadcast %cst_241 : f32 to vector<1x1280xf32>
    %419 = arith.mulf %418, %414 : vector<1x1280xf32>
    %420 = vector.broadcast %419 : vector<1x1280xf32> to vector<2x1280xf32>
    %421 = arith.addf %417, %420 : vector<2x1280xf32>
    %cst_242 = arith.constant 0.027777778 : f32
    %422 = vector.broadcast %cst_242 : f32 to vector<2x1280xf32>
    %423 = arith.mulf %421, %422 : vector<2x1280xf32>
    %424 = arith.truncf %423 : vector<2x1280xf32> to vector<2x1280xbf16>
    %c0_243 = arith.constant 0 : index
    %c0_244 = arith.constant 0 : index
    %425 = vector.load %arg21[%c0_243, %c0_244] : memref<1280x128xbf16, #tpu.memory_space<vmem>>, vector<1280x128xbf16>
    %cst_245 = arith.constant dense<0.000000e+00> : vector<2x128xf32>
    %426 = tpu.matmul %424, %425, %cst_245 {dimension_numbers = #tpu.dot_dimension_numbers<[1], [0], [0], [1], [0, 0, 1, 1], [], []>} : vector<2x1280xbf16>, vector<1280x128xbf16>, vector<2x128xf32> -> vector<2x128xf32>
    %c0_246 = arith.constant 0 : index
    %c0_247 = arith.constant 0 : index
    %427 = vector.load %arg22[%c0_246, %c0_247] : memref<1x128xf32, #tpu.memory_space<vmem>>, vector<1x128xf32>
    %428 = vector.broadcast %427 : vector<1x128xf32> to vector<2x128xf32>
    %429 = arith.addf %426, %428 : vector<2x128xf32>
    %c0_248 = arith.constant 0 : index
    %c0_249 = arith.constant 0 : index
    %430 = vector.load %arg23[%c0_248, %c0_249] : memref<2x128xf32, #tpu.memory_space<vmem>>, vector<2x128xf32>
    tpu.vector_store %arg23[%c0_248, %c0_249], %429 {strides = array<i32>} : memref<2x128xf32, #tpu.memory_space<vmem>>, vector<2x128xf32>,
    return
  }
}

</mosaic_0001>

<bundles_post_ra>
// kernel: mobilenet_v2_forward.1
= control target key start
LH: loop header
LB: loop body
LE: loop exit
PB: predicated region body
PF: predicated region fallthrough
CT: control target
= control target key end

     0   :  { %s9105_s0 = inlined_call_operand.vmem [shape: bf16[128,32], index: 0, kind: input, shape index: {}]   ;;  %s9106_s1 = inlined_call_operand.vmem [shape: bf16[32,128], index: 1, kind: input, shape index: {}]   ;;  %s9107_s2 = inlined_call_operand.vmem [shape: bf16[2,32], index: 2, kind: input, shape index: {}]   ;;  %s9108_s3 = inlined_call_operand.vmem [shape: bf16[32,128], index: 3, kind: input, shape index: {}]   ;;  %s9109_s4 = inlined_call_operand.vmem [shape: f32[1,128], index: 4, kind: input, shape index: {}]   ;;  %s9110_s5 = inlined_call_operand.vmem [shape: f32[9,1,128], index: 5, kind: input, shape index: {}]   ;;  %s9111_s6 = inlined_call_operand.vmem [shape: f32[1,128], index: 6, kind: input, shape index: {}]   ;;  %s9112_s7 = inlined_call_operand.vmem [shape: bf16[128,128], index: 7, kind: input, shape index: {}]   ;;  %s9113_s8 = inlined_call_operand.vmem [shape: f32[1,128], index: 8, kind: input, shape index: {}]   ;;  %s9114_s9 = inlined_call_operand.vmem [shape: f32[9,1,128], index: 9, kind: input, shape index: {}]   ;;  %s9115_s10 = inlined_call_operand.vmem [shape: f32[1,128], index: 10, kind: input, shape index: {}]   ;;  %s9116_s11 = inlined_call_operand.vmem [shape: bf16[128,128], index: 11, kind: input, shape index: {}]   ;;  %s9117_s12 = inlined_call_operand.vmem [shape: f32[1,128], index: 12, kind: input, shape index: {}]   ;;  %s9118_s13 = inlined_call_operand.vmem [shape: bf16[128,256], index: 13, kind: input, shape index: {}]   ;;  %s9119_s14 = inlined_call_operand.vmem [shape: f32[1,256], index: 14, kind: input, shape index: {}]   ;;  %s9120_s15 = inlined_call_operand.vmem [shape: f32[9,1,256], index: 15, kind: input, shape index: {}]   ;;  %s9121_s16 = inlined_call_operand.vmem [shape: f32[1,256], index: 16, kind: input, shape index: {}]   ;;  %s9122_s17 = inlined_call_operand.vmem [shape: bf16[256,128], index: 17, kind: input, shape index: {}]   ;;  %s9123_s18 = inlined_call_operand.vmem [shape: f32[1,128], index: 18, kind: input, shape index: {}]   ;;  %s9124_s19 = inlined_call_operand.vmem [shape: bf16[128,1280], index: 19, kind: input, shape index: {}]   ;;  %s9125_s20 = inlined_call_operand.vmem [shape: f32[1,1280], index: 20, kind: input, shape index: {}]   ;;  %s9126_s21 = inlined_call_operand.vmem [shape: bf16[1280,128], index: 21, kind: input, shape index: {}]   ;;  %s9127_s22 = inlined_call_operand.vmem [shape: f32[1,128], index: 22, kind: input, shape index: {}]   ;;  %s9128_s23 = inlined_call_operand.hbm [shape: f32[2,128], index: 23, kind: output, shape index: {}]  }
   0x1   :  { %9335 = sst [smem:[#allocation73_spill]] %s9105_s0 }
   0x2   :  { %9336 = sst [smem:[#allocation74_spill]] %s9106_s1 }
   0x3   :  { %9337 = sst [smem:[#allocation75_spill]] %s9107_s2 }
   0x4   :  { %9338 = sst [smem:[#allocation76_spill]] %s9108_s3 }
   0x5   :  { %9339 = sst [smem:[#allocation77_spill]] %s9109_s4 }
   0x6   :  { %9340 = sst [smem:[#allocation78_spill]] %s9110_s5 }
   0x7   :  { %9341 = sst [smem:[#allocation79_spill]] %s9111_s6 }
   0x8   :  { %9342 = sst [smem:[#allocation80_spill]] %s9112_s7 }
   0x9   :  { %s9343_s24 = sld [smem:[#allocation76_spill]]  ;;  %vm384_vm0 = vcmask 261120   ;;  %v6164_v3 = vmov 0.0  }
   0xa   :  { %s9344_s2 = sld [smem:[#allocation73_spill]]  ;;  %76 = vst [vmem:[#allocation2] sm:$0xff] %v6164_v3  ;;  %77 = vst [vmem:[#allocation2 + $0x8] sm:$0xff] %v6164_v3 }
   0xb   :  { %86 = vst [vmem:[#allocation2 + $0x50] sm:$0xff] %v6164_v3  ;;  %87 = vst [vmem:[#allocation2 + $0x58] sm:$0xff] %v6164_v3  ;;  %s9345_s7 = sld [smem:[#allocation80_spill]] }
   0xc   :  { %88 = vst [vmem:[#allocation2 + $0x60] sm:$0xff] %v6164_v3  ;;  %89 = vst [vmem:[#allocation2 + $0x68] sm:$0xff] %v6164_v3 }
   0xd   :  { %98 = vst [vmem:[#allocation2 + $0xb0] sm:$0xff] %v6164_v3  ;;  %99 = vst [vmem:[#allocation2 + $0xb8] sm:$0xff] %v6164_v3 }
   0xe   :  { %100 = vst [vmem:[#allocation3 + $0x30] sm:$0xff] %v6164_v3  ;;  %101 = vst [vmem:[#allocation3] sm:$0xff] %v6164_v3 }
   0xf   :  { %v5870_v0 = vld [vmem:[%s9343_s24 + $0x8] sm:$0xff]   ;;  %v5871_v1 = vld [vmem:[%s9343_s24] sm:$0xff]   ;;  %106 = vst [vmem:[#allocation3 + $0x8] sm:$0xff] %v6164_v3  ;;  %107 = vst [vmem:[#allocation3 + $0x48] sm:$0xff] %v6164_v3 }
  0x10   :  { %5775 = vmatprep.subr.bf16.mxu1 %v5870_v0  ;;  %v5872_v2 = vld [vmem:[%s9344_s2] sm:$0xff]   ;;  %108 = vst [vmem:[#allocation3 + $0x40] sm:$0xff] %v6164_v3  ;;  %109 = vst [vmem:[#allocation3 + $0x20] sm:$0xff] %v6164_v3  ;;  %v5873_v4 = vld [vmem:[%s9344_s2 + $0x8] sm:$0xff]  }
  0x11   :  { %114 = vst [vmem:[#allocation3 + $0x78] sm:$0xff] %v6164_v3  ;;  %115 = vst [vmem:[#allocation3 + $0x28] sm:$0xff] %v6164_v3  ;;  %5776 = vmatpush3.bf16.msra.mxu1 %v5870_v0  ;;  %5779 = vmatprep.mubr.msk.bf16.mxu1 %vm384_vm0, %v5872_v2  ;;  %v5874_v5 = vld [vmem:[%s9344_s2 + $0x10] sm:$0xff]   ;;  %v5875_v6 = vld [vmem:[%s9344_s2 + $0x18] sm:$0xff]  }
  0x12   :  { %5777 = vmatprep.subr.bf16.mxu1 %v5871_v1  ;;  %v5876_v7 = vld [vmem:[%s9344_s2 + $0x20] sm:$0xff]   ;;  %v5877_v8 = vld [vmem:[%s9344_s2 + $0x28] sm:$0xff]   ;;  %v5878_v9 = vld [vmem:[%s9344_s2 + $0x30] sm:$0xff]  }
  0x13   :  { %v5879_v10 = vld [vmem:[%s9344_s2 + $0x38] sm:$0xff]   ;;  %v5881_v12 = vld [vmem:[%s9345_s7 + $0x30] sm:$0xff]   ;;  %v5882_v13 = vld [vmem:[%s9345_s7 + $0x28] sm:$0xff]  }
  0x14   :  { %v5880_v11 = vld [vmem:[%s9345_s7 + $0x38] sm:$0xff]   ;;  %v5883_v14 = vld [vmem:[%s9345_s7 + $0x20] sm:$0xff]   ;;  %v5885_v16 = vld [vmem:[%s9345_s7 + $0x10] sm:$0xff]  }
  0x15   :  { %5778 = vmatpush3.bf16.msra.mxu1 %v5871_v1  ;;  %v5884_v15 = vld [vmem:[%s9345_s7 + $0x18] sm:$0xff]   ;;  %v5886_v17 = vld [vmem:[%s9345_s7 + $0x8] sm:$0xff]   ;;  %v5887_v18 = vld [vmem:[%s9345_s7] sm:$0xff]  }
  0x16   :  { %5795 = vmatprep.subr.bf16.mxu1 %v5880_v11 }
  0x18   :  { %5780 = vmatmul.mubr.msk.bf16.vlgmr.msra.gmra.mxu1 %vm384_vm0, %v5873_v4 }
  0x19   :  { %5783 = vmatprep.mubr.msk.bf16.mxu1 %vm384_vm0, %v5874_v5  ;;  %5796 = vmatpush3.bf16.msra.mxu1 %v5880_v11 }
  0x1a   :  { %5797 = vmatprep.subr.bf16.mxu1 %v5881_v12 }
  0x1d   :  { %5798 = vmatpush3.bf16.msra.mxu1 %v5881_v12 }
  0x1e   :  { %5799 = vmatprep.subr.bf16.mxu1 %v5882_v13 }
  0x20   :  { %5784 = vmatmul.mubr.msk.bf16.gmra.mxu1 %vm384_vm0, %v5875_v6 }
  0x21   :  { %5787 = vmatprep.mubr.msk.bf16.mxu1 %vm384_vm0, %v5876_v7  ;;  %5800 = vmatpush3.bf16.msra.mxu1 %v5882_v13 }
  0x22   :  { %5801 = vmatprep.subr.bf16.mxu1 %v5883_v14 }
  0x25   :  { %5802 = vmatpush3.bf16.msra.mxu1 %v5883_v14 }
  0x26   :  { %5803 = vmatprep.subr.bf16.mxu1 %v5884_v15 }
  0x28   :  { %5788 = vmatmul.mubr.msk.bf16.gmra.mxu1 %vm384_vm0, %v5877_v8 }
  0x29   :  { %5791 = vmatprep.mubr.msk.bf16.mxu1 %vm384_vm0, %v5878_v9  ;;  %5804 = vmatpush3.bf16.msra.mxu1 %v5884_v15 }
  0x2a   :  { %5805 = vmatprep.subr.bf16.mxu1 %v5885_v16 }
  0x2d   :  { %5806 = vmatpush3.bf16.msra.mxu1 %v5885_v16 }
  0x2e   :  { %5807 = vmatprep.subr.bf16.mxu1 %v5886_v17 }
  0x30   :  { %5792 = vmatmul.mubr.msk.bf16.gmra.mxu1 %vm384_vm0, %v5879_v10 }
  0x31   :  { %5808 = vmatpush3.bf16.msra.mxu1 %v5886_v17 }
  0x32   :  { %5809 = vmatprep.subr.bf16.mxu1 %v5887_v18 }
  0x35   :  { %5810 = vmatpush3.bf16.msra.mxu1 %v5887_v18 }
  0x36   :  { %28 = vsyncpa [#allocation5], 0  ;;  %v116_v19 = vlaneseq  ;;  %s9349_s29 = sld [smem:[#allocation78_spill]]  ;;  %v655_v40 = vld [vmem:[#allocation2 + $0x7] sm:$0xff] }
  0x37   :  { %s9371_s3 = sld [smem:[#allocation77_spill]] }
  0x38   :  { %v6365_v20 = vshrl.u32 %v116_v19, 7  ;;  %s9412_s25 = sld [smem:[#allocation79_spill]] }
  0x39   :  { %s9476_s26 = sld [smem:[#allocation74_spill]] }
  0x3a   :  { %9346 = vst [vmem:[#allocation7_spill] sm:$0xff] %v6365_v20  ;;  %v6368_v21 = vadd.s32 8, %v6365_v20  ;;  %v119_v22 = vadd.s32 16, %v6365_v20  ;;  %v120_v23 = vadd.s32 24, %v6365_v20  ;;  %v129_v24 = vand.u32 7, %v6365_v20  ;;  %s9773_s28 = sld [smem:[#allocation75_spill]] }
  0x3b   :  { %v121_v34 = vadd.s32 32, %v6365_v20  ;;  %v122_v39 = vadd.s32 40, %v6365_v20  ;;  %v123_v55 = vadd.s32 48, %v6365_v20  ;;  %v124_v60 = vadd.s32 56, %v6365_v20 }
  0x3c   :  { %9347 = vst [vmem:[#allocation8_spill] sm:$0xff] %v6368_v21  ;;  %v136_v25 = vand.u32 7, %v6368_v21  ;;  %v143_v26 = vand.u32 7, %v119_v22  ;;  %v150_v27 = vand.u32 7, %v120_v23  ;;  %vm221_vm1 = vcmp.ge.s32.totalorder %v129_v24, 1 }
  0x3d   :  { %vm245_vm3 = vcmp.lt.s32.totalorder %v129_v24, 7  ;;  %v6375_v28 = vsel %vm221_vm1, 1.0, %v6164_v3  ;;  %v6380_v29 = vld [vmem:[%s9349_s29] ss:$0 sm:$0xff]  ;;  %v6394_v33 = vld [vmem:[%s9349_s29 + $0x2] ss:$0 sm:$0xff] }
  0x3e   :  { %vm222_vm2 = vcmp.ge.s32.totalorder %v136_v25, 1  ;;  %vm247_vm4 = vcmp.lt.s32.totalorder %v143_v26, 7  ;;  %9348 = vst [vmem:[#allocation9_spill] sm:$0xff] %v6375_v28  ;;  %vm248_vm5 = vcmp.lt.s32.totalorder %v150_v27, 7  ;;  %vm246_vm6 = vcmp.lt.s32.totalorder %v136_v25, 7 }
  0x3f   :  { %v6383_v30 = vsel %vm222_vm2, 1.0, %v6164_v3  ;;  %v6386_v31 = vsel %vm245_vm3, 1.0, %v6164_v3  ;;  %v6389_v32 = vsel %vm247_vm4, 1.0, %v6164_v3  ;;  %v6398_v35 = vsel %vm248_vm5, 1.0, %v6164_v3  ;;  %v6407_v37 = vld [vmem:[%s9349_s29 + $0x3] ss:$0 sm:$0xff] }
  0x40   :  { %9350 = vst [vmem:[#allocation10_spill] sm:$0xff] %v6383_v30  ;;  %9351 = vst [vmem:[#allocation11_spill] sm:$0xff] %v6386_v31  ;;  %v6402_v36 = vmul.f32 %v6380_v29, %v6375_v28  ;;  %v6412_v38 = vld [vmem:[%s9349_s29 + $0x5] ss:$0 sm:$0xff]  ;;  %v6416_v41 = vsel %vm246_vm6, 1.0, %v6164_v3  ;;  %v6420_v42 = vmul.f32 %v6380_v29, %v6383_v30  ;;  %v6424_v43 = vmul.f32 %v6394_v33, %v6386_v31 }
  0x41   :  { %9352 = vst [vmem:[#allocation12_spill] sm:$0xff] %v6389_v32  ;;  %9353 = vst [vmem:[#allocation13_spill] sm:$0xff] %v6398_v35  ;;  %v6428_v44 = vmul.f32 %v6394_v33, %v6398_v35  ;;  %v6432_v45 = vmul.f32 %v6407_v37, %v6375_v28  ;;  %v6436_v46 = vmul.f32 %v6412_v38, %v6389_v32  ;;  %v157_v47 = vand.u32 7, %v121_v34  ;;  %v6441_v48 = vld [vmem:[%s9349_s29 + $0x1] ss:$0 sm:$0xff] }
  0x42   :  { %9354 = vst [vmem:[#allocation14_spill] sm:$0xff] %v6416_v41  ;;  %9355 = vst [vmem:[#allocation15_spill] sm:$0xff] %v6420_v42  ;;  %v663_v49 = vmul.f32 %v655_v40, %v6402_v36  ;;  %vm223_vm7 = vcmp.ge.s32.totalorder %v143_v26, 1  ;;  %vm224_vm8 = vcmp.ge.s32.totalorder %v150_v27, 1  ;;  %v164_v50 = vand.u32 7, %v122_v39 }
  0x43   :  { %9356 = vst [vmem:[#allocation16_spill] sm:$0xff] %v6424_v43  ;;  %9357 = vst [vmem:[#allocation17_spill] sm:$0xff] %v6428_v44  ;;  %v6446_v51 = vmul.f32 %v6394_v33, %v6416_v41  ;;  %v6450_v52 = vmul.f32 %v6394_v33, %v6389_v32  ;;  %v6455_v53 = vld [vmem:[%s9349_s29 + $0x8] ss:$0 sm:$0xff]  ;;  %v6458_v54 = vmul.f32 0.0, %v6441_v48  ;;  %v6463_v56 = vmul.f32 %v6407_v37, %v6383_v30 }
  0x44   :  { %9358 = vst [vmem:[#allocation18_spill] sm:$0xff] %v6432_v45  ;;  %9359 = vst [vmem:[#allocation19_spill] sm:$0xff] %v6436_v46  ;;  %v6467_v57 = vmul.f32 %v6412_v38, %v6386_v31  ;;  %v6471_v58 = vmul.f32 %v6412_v38, %v6416_v41  ;;  %v6476_v59 = vld [vmem:[%s9349_s29 + $0x6] ss:$0 sm:$0xff]  ;;  %v6484_v62 = vsel %vm223_vm7, 1.0, %v6164_v3  ;;  %v6487_v63 = vsel %vm224_vm8, 1.0, %v6164_v3 }
  0x45   :  { %9360 = vst [vmem:[#allocation20_spill] sm:$0xff] %v6441_v48  ;;  %9361 = vst [vmem:[#allocation21_spill] sm:$0xff] %v6446_v51  ;;  %v6481_v61 = vmul.f32 %v6476_v59, %v6375_v28  ;;  %vm225_vm9 = vcmp.ge.s32.totalorder %v157_v47, 1  ;;  %v6491_v0 = vmul.f32 %v6476_v59, %v6383_v30  ;;  %v6495_v1 = vmul.f32 %v6455_v53, %v6386_v31  ;;  %v6533_v14 = vld [vmem:[%s9371_s3] ss:$0 sm:$0xff]  ;;  %v839_v31 = vld [vmem:[#allocation2 + $0x67] sm:$0xff] }
  0x46   :  { %9362 = vst [vmem:[#allocation22_spill] sm:$0xff] %v6450_v52  ;;  %9363 = vst [vmem:[#allocation23_spill] sm:$0xff] %v6463_v56  ;;  %v6499_v2 = vmul.f32 %v6455_v53, %v6416_v41  ;;  %vm226_vm10 = vcmp.ge.s32.totalorder %v164_v50, 1  ;;  %v6502_v4 = vadd.f32 %v6458_v54, %v663_v49  ;;  %vm249_vm11 = vcmp.lt.s32.totalorder %v157_v47, 7 }
  0x47   :  { %9364 = vst [vmem:[#allocation24_spill] sm:$0xff] %v6471_v58  ;;  %9365 = vst [vmem:[#allocation25_spill] sm:$0xff] %v6481_v61  ;;  %vm250_vm12 = vcmp.lt.s32.totalorder %v164_v50, 7  ;;  %v171_v5 = vand.u32 7, %v123_v55  ;;  %v6506_v6 = vmul.f32 %v6407_v37, %v6487_v63  ;;  %v6510_v7 = vmul.f32 %v6476_v59, %v6484_v62 }
  0x48   :  { %9366 = vst [vmem:[#allocation26_spill] sm:$0xff] %v6484_v62  ;;  %9367 = vst [vmem:[#allocation27_spill] sm:$0xff] %v6487_v63  ;;  %v6513_v8 = vsel %vm225_vm9, 1.0, %v6164_v3  ;;  %v178_v9 = vand.u32 7, %v124_v60  ;;  %v6517_v10 = vmul.f32 %v6380_v29, %v6484_v62  ;;  %v6521_v11 = vmul.f32 %v6380_v29, %v6487_v63 }
  0x49   :  { %9368 = vst [vmem:[#allocation28_spill] sm:$0xff] %v6499_v2  ;;  %9369 = vst [vmem:[#allocation29_spill] sm:$0xff] %v6513_v8  ;;  %v6525_v12 = vmul.f32 %v6407_v37, %v6484_v62  ;;  %v6528_v13 = vsel %vm226_vm10, 1.0, %v6164_v3  ;;  %v6537_v15 = vmul.f32 %v6412_v38, %v6398_v35  ;;  %v6541_v16 = vmul.f32 %v6476_v59, %v6487_v63 }
  0x4a   :  { %9370 = vst [vmem:[#allocation30_spill] sm:$0xff] %v6528_v13  ;;  %v6544_v17 = vsel %vm249_vm11, 1.0, %v6164_v3  ;;  %v6547_v18 = vsel %vm250_vm12, 1.0, %v6164_v3  ;;  %v6551_v19 = vmul.f32 %v6455_v53, %v6389_v32  ;;  %v6555_v22 = vmul.f32 %v6380_v29, %v6513_v8 }
  0x4b   :  { %9372 = vst [vmem:[#allocation31_spill] sm:$0xff] %v6544_v17  ;;  %9373 = vst [vmem:[#allocation32_spill] sm:$0xff] %v6547_v18  ;;  %vm227_vm13 = vcmp.ge.s32.totalorder %v171_v5, 1  ;;  %vm251_vm14 = vcmp.lt.s32.totalorder %v171_v5, 7  ;;  %v6559_v24 = vmul.f32 %v6455_v53, %v6398_v35  ;;  %v6563_v25 = vmul.f32 %v6380_v29, %v6528_v13 }
  0x4c   :  { %vm228_vm15 = vcmp.ge.s32.totalorder %v178_v9, 1  ;;  %vm252_vm1 = vcmp.lt.s32.totalorder %v178_v9, 7  ;;  %v6568_v27 = vmul.f32 %v6394_v33, %v6544_v17  ;;  %v6572_v34 = vmul.f32 %v6407_v37, %v6513_v8 }
  0x4d   :  { %v6576_v39 = vmul.f32 %v6455_v53, %v6547_v18  ;;  %v6580_v47 = vmul.f32 %v6394_v33, %v6547_v18  ;;  %v6584_v49 = vmul.f32 %v6407_v37, %v6528_v13  ;;  %v6587_v50 = vsel %vm227_vm13, 1.0, %v6164_v3 }
  0x4e   :  { %9374 = vst [vmem:[#allocation33_spill] sm:$0xff] %v6572_v34  ;;  %9377 = vst [vmem:[#allocation36_spill] sm:$0xff] %v6587_v50  ;;  %v6590_v55 = vsel %vm251_vm14, 1.0, %v6164_v3  ;;  %v6594_v9 = vsel %vm228_vm15, 1.0, %v6164_v3  ;;  %v6601_v21 = vmul.f32 %v6412_v38, %v6544_v17  ;;  %v6605_v41 = vmul.f32 %v6412_v38, %v6547_v18 }
  0x4f   :  { %9375 = vst [vmem:[#allocation34_spill] sm:$0xff] %v6576_v39  ;;  %9376 = vst [vmem:[#allocation35_spill] sm:$0xff] %v6584_v49  ;;  %v6618_v63 = vmul.f32 %v6455_v53, %v6544_v17  ;;  %vm2249_vm6 = vcmask 1042432   ;;  %vm2297_vm7 = vcmask 1044480   ;;  %vm2324_vm8 = vcmask 1046528  }
  0x50   :  { %9378 = vst [vmem:[#allocation37_spill] sm:$0xff] %v6590_v55  ;;  %9379 = vst [vmem:[#allocation38_spill] sm:$0xff] %v6594_v9  ;;  %vm2368_vm9 = vcmask 1040384   ;;  %vm2494_vm10 = vcmask 1045504  }
  0x51   :  { %9381 = vst [vmem:[#allocation40_spill] sm:$0xff] %v6601_v21  ;;  %9382 = vst [vmem:[#allocation41_spill] sm:$0xff] %v6605_v41 }
  0x52   :  { %9385 = vst [vmem:[#allocation44_spill] sm:$0xff] %v6618_v63 }
  0xd8   :  { %v5781_v23 = vpop.f32.mrf.mxu1 }
  0xd9   :  { %v452_v26 = vadd.f32 %v5781_v23, %v6533_v14  ;;  %v6597_v23 = vsel %vm252_vm1, 1.0, %v6164_v3 }
  0xda   :  { %v443_v40 = vpop.f32.mrf.mxu1  ;;  %9380 = vst [vmem:[#allocation39_spill] sm:$0xff] %v6597_v23  ;;  %v6622_v18 = vmul.f32 %v6394_v33, %v6597_v23  ;;  %v6639_v30 = vmul.f32 %v6455_v53, %v6597_v23 }
  0xdb   :  { %v508_v60 = vmax.f32 %v452_v26, 0.0  ;;  %v444_v5 = vadd.f32 %v6533_v14, %v443_v40  ;;  %v6609_v26 = vmul.f32 %v6476_v59, %v6513_v8  ;;  %v6613_v40 = vmul.f32 %v6476_v59, %v6528_v13 }
  0xdc   :  { %v5782_v20 = vpop.f32.mrf.mxu1  ;;  %9386 = vst [vmem:[#allocation45_spill] sm:$0xff] %v6622_v18  ;;  %v6626_v8 = vmul.f32 %v6407_v37, %v6594_v9  ;;  %9390 = vst [vmem:[#allocation49_spill] sm:$0xff] %v6639_v30 }
  0xdd   :  { %9383 = vst [vmem:[#allocation42_spill] sm:$0xff] %v6609_v26  ;;  %9384 = vst [vmem:[#allocation43_spill] sm:$0xff] %v6613_v40  ;;  %v524_v62 = vmin.f32 %v508_v60, 6.0  ;;  %v506_v3 = vmax.f32 %v444_v5, 0.0  ;;  %v455_v32 = vadd.f32 %v5782_v20, %v6533_v14  ;;  %v6630_v60 = vmul.f32 %v6412_v38, %v6590_v55 }
  0xde   :  { %v446_v35 = vpop.f32.mrf.mxu1  ;;  %9387 = vst [vmem:[#allocation46_spill] sm:$0xff] %v6626_v8  ;;  %v6634_v20 = vmul.f32 %v6476_v59, %v6587_v50  ;;  %v6643_v8 = vmul.f32 %v6380_v29, %v6587_v50 }
  0xdf   :  { %9388 = vst [vmem:[#allocation47_spill] sm:$0xff] %v6630_v60  ;;  %540 = vst [vmem:[#allocation2 + $0x20] sm:$0xff] %v524_v62  ;;  %v522_v5 = vmin.f32 %v506_v3, 6.0  ;;  %v509_v17 = vmax.f32 %v455_v32, 0.0  ;;  %v447_v13 = vadd.f32 %v6533_v14, %v446_v35  ;;  %v6647_v60 = vmul.f32 %v6412_v38, %v6597_v23  ;;  %v766_v32 = vld [vmem:[#allocation2 + $0x51] sm:$0xff] }
  0xe0   :  { %9389 = vst [vmem:[#allocation48_spill] sm:$0xff] %v6634_v20  ;;  %v5785_v28 = vpop.f32.mrf.mxu1  ;;  %9391 = vst [vmem:[#allocation50_spill] sm:$0xff] %v6643_v8  ;;  %v6651_v20 = vmul.f32 %v6476_v59, %v6594_v9  ;;  %v847_v35 = vmul.f32 %v839_v31, %v6402_v36  ;;  %v6658_v8 = vld [vmem:[%s9349_s29 + $0x4] ss:$0 sm:$0xff]  ;;  %v6663_v38 = vld [vmem:[%s9349_s29 + $0x7] ss:$0 sm:$0xff]  ;;  %v6667_v59 = vmul.f32 %v6380_v29, %v6594_v9 }
  0xe1   :  { %9392 = vst [vmem:[#allocation51_spill] sm:$0xff] %v6647_v60  ;;  %538 = vst [vmem:[#allocation2 + $0x10] sm:$0xff] %v522_v5  ;;  %v525_v3 = vmin.f32 %v509_v17, 6.0  ;;  %v507_v18 = vmax.f32 %v447_v13, 0.0  ;;  %v468_v39 = vadd.f32 %v5785_v28, %v6533_v14  ;;  %v6671_v36 = vmul.f32 %v6394_v33, %v6590_v55  ;;  %v6681_v17 = vld [vmem:[#allocation2] sm:$0xff] }
  0xe2   :  { %9393 = vst [vmem:[#allocation52_spill] sm:$0xff] %v6651_v20  ;;  %9394 = vst [vmem:[#allocation53_spill] sm:$0xff] %v6663_v38  ;;  %v459_v31 = vpop.f32.mrf.mxu1  ;;  %v6675_v28 = vmul.f32 %v6407_v37, %v6587_v50  ;;  %v6679_v13 = vmul.f32 %v6455_v53, %v6590_v55  ;;  %v6685_v23 = vmul.f32 %v6681_v17, %v6663_v38 }
  0xe3   :  { %9395 = vst [vmem:[#allocation54_spill] sm:$0xff] %v6667_v59  ;;  %9396 = vst [vmem:[#allocation55_spill] sm:$0xff] %v6671_v36  ;;  %v523_v29 = vmin.f32 %v507_v18, 6.0  ;;  %v512_v9 = vmax.f32 %v468_v39, 0.0  ;;  %v460_v33 = vadd.f32 %v6533_v14, %v459_v31  ;;  %v6689_v20 = vmul.f32 %v766_v32, %v6639_v30 }
  0xe4   :  { %9397 = vst [vmem:[#allocation56_spill] sm:$0xff] %v6675_v28  ;;  %9398 = vst [vmem:[#allocation57_spill] sm:$0xff] %v6679_v13  ;;  %v5786_v37 = vpop.f32.mrf.mxu1  ;;  %v6692_v50 = vmul.f32 %v6663_v38, %v524_v62  ;;  %v6695_v53 = vmul.f32 %v6441_v48, %v524_v62  ;;  %v6698_v55 = vmul.f32 %v6658_v8, %v524_v62 }
  0xe5   :  { %9399 = vst [vmem:[#allocation58_spill] sm:$0xff] %v6681_v17  ;;  %9400 = vst [vmem:[#allocation59_spill] sm:$0xff] %v6685_v23  ;;  %v6701_v17 = vadd.f32 %v847_v35, %v6458_v54  ;;  %v528_v18 = vmin.f32 %v512_v9, 6.0  ;;  %v510_v39 = vmax.f32 %v460_v33, 0.0  ;;  %v471_v31 = vadd.f32 %v5786_v37, %v6533_v14 }
  0xe6   :  { %541 = vst [vmem:[#allocation2 + $0x28] sm:$0xff] %v525_v3  ;;  %9401 = vst [vmem:[#allocation60_spill] sm:$0xff] %v6689_v20  ;;  %v686_v32 = vmul.f32 %v6441_v48, %v522_v5  ;;  %v462_v30 = vpop.f32.mrf.mxu1  ;;  %v725_v20 = vmul.f32 %v6658_v8, %v522_v5  ;;  %v6707_v13 = vmul.f32 %v6658_v8, %v525_v3 }
  0xe7   :  { %9402 = vst [vmem:[#allocation61_spill] sm:$0xff] %v6701_v17  ;;  %539 = vst [vmem:[#allocation2 + $0x18] sm:$0xff] %v523_v29  ;;  %v6710_v23 = vmul.f32 %v6663_v38, %v525_v3  ;;  %v6713_v62 = vmul.f32 %v6441_v48, %v525_v3  ;;  %v6715_v54 = vmin.f32 %v510_v39, 6.0  ;;  %v513_v9 = vmax.f32 %v471_v31, 0.0 }
  0xe8   :  { %544 = vst [vmem:[#allocation2 + $0x40] sm:$0xff] %v528_v18  ;;  %v463_v35 = vadd.f32 %v6533_v14, %v462_v30  ;;  %v726_v33 = vmul.f32 %v6658_v8, %v523_v29  ;;  %v5789_v37 = vpop.f32.mrf.mxu1  ;;  %v656_v17 = vld [vmem:[#allocation2 + $0xf] sm:$0xff]  ;;  %v758_v60 = vmul.f32 %v6663_v38, %v523_v29  ;;  %v6721_v28 = vmul.f32 %v6441_v48, %v523_v29 }
  0xe9   :  { %9403 = vst [vmem:[#allocation62_spill] sm:$0xff] %v6713_v62  ;;  %v693_v5 = vld [vmem:[#allocation2 + $0x9] sm:$0xff]  ;;  %v6724_v36 = vmul.f32 %v6663_v38, %v528_v18  ;;  %v6727_v3 = vmul.f32 %v6441_v48, %v528_v18  ;;  %542 = vst [vmem:[#allocation2 + $0x30] sm:$0xff] %v6715_v54  ;;  %v6730_v39 = vmin.f32 %v513_v9, 6.0  ;;  %v484_v31 = vadd.f32 %v5789_v37, %v6533_v14 }
  0xea   :  { %v511_v30 = vmax.f32 %v463_v35, 0.0  ;;  %v664_v59 = vmul.f32 %v656_v17, %v6420_v42  ;;  %v475_v62 = vpop.f32.mrf.mxu1  ;;  %v701_v29 = vmul.f32 %v693_v5, %v6424_v43  ;;  %v710_v40 = vmul.f32 %v656_v17, %v6432_v45 }
  0xeb   :  { %9404 = vst [vmem:[#allocation63_spill] sm:$0xff] %v6724_v36  ;;  %9405 = vst [vmem:[#allocation64_spill] sm:$0xff] %v6727_v3  ;;  %v6738_v36 = vmul.f32 %v6663_v38, %v6715_v54  ;;  %v6741_v3 = vmul.f32 %v6658_v8, %v528_v18  ;;  %v516_v35 = vmax.f32 %v484_v31, 0.0  ;;  %v476_v37 = vadd.f32 %v6533_v14, %v475_v62 }
  0xec   :  { %9406 = vst [vmem:[#allocation65_spill] sm:$0xff] %v6730_v39  ;;  %545 = vst [vmem:[#allocation2 + $0x48] sm:$0xff] %v6730_v39  ;;  %v6744_v9 = vmin.f32 %v511_v30, 6.0  ;;  %v6749_v42 = vmul.f32 %v6441_v48, %v6715_v54  ;;  %v5790_v5 = vpop.f32.mrf.mxu1  ;;  %v776_v30 = vadd.f32 %v686_v32, %v664_v59 }
  0xed   :  { %v696_v63 = vld [vmem:[#allocation2 + $0x21] sm:$0xff]  ;;  %9407 = vst [vmem:[#allocation66_spill] sm:$0xff] %v6741_v3  ;;  %v6761_v62 = vmin.f32 %v516_v35, 6.0  ;;  %v514_v31 = vmax.f32 %v476_v37, 0.0  ;;  %v487_v39 = vadd.f32 %v5790_v5, %v6533_v14 }
  0xee   :  { %9408 = vst [vmem:[#allocation67_spill] sm:$0xff] %v6744_v9  ;;  %9409 = vst [vmem:[#allocation68_spill] sm:$0xff] %v6749_v42  ;;  %v657_v17 = vld [vmem:[#allocation2 + $0x17] sm:$0xff]  ;;  %v6752_v43 = vmul.f32 %v696_v63, %v6428_v44  ;;  %v6755_v18 = vmul.f32 %v696_v63, %v6436_v46  ;;  %v6758_v3 = vmul.f32 %v696_v63, %v6499_v2  ;;  %v658_v48 = vld [vmem:[#allocation2 + $0x1f] sm:$0xff]  ;;  %v478_v44 = vpop.f32.mrf.mxu1 }
  0xef   :  { %v694_v45 = vld [vmem:[#allocation2 + $0x11] sm:$0xff]  ;;  %543 = vst [vmem:[#allocation2 + $0x38] sm:$0xff] %v6744_v9  ;;  %9410 = vst [vmem:[#allocation69_spill] sm:$0xff] %v6761_v62  ;;  %v695_v42 = vld [vmem:[#allocation2 + $0x19] sm:$0xff]  ;;  %v711_v26 = vmul.f32 %v657_v17, %v6463_v56  ;;  %v783_v2 = vadd.f32 %v710_v40, %v701_v29  ;;  %v6769_v59 = vmin.f32 %v514_v31, 6.0  ;;  %v517_v32 = vmax.f32 %v487_v39, 0.0 }
  0xf0   :  { %v702_v38 = vmul.f32 %v694_v45, %v6446_v51  ;;  %v734_v46 = vmul.f32 %v694_v45, %v6467_v57  ;;  %v735_v63 = vmul.f32 %v695_v42, %v6471_v58  ;;  %548 = vst [vmem:[#allocation2 + $0x80] sm:$0xff] %v6761_v62  ;;  %v479_v35 = vadd.f32 %v6533_v14, %v478_v44  ;;  %v5793_v5 = vpop.f32.mrf.mxu1 }
  0xf1   :  { %v743_v37 = vmul.f32 %v657_v17, %v6481_v61  ;;  %v703_v51 = vmul.f32 %v695_v42, %v6450_v52  ;;  %v744_v9 = vmul.f32 %v658_v48, %v6491_v0  ;;  %546 = vst [vmem:[#allocation2 + $0x70] sm:$0xff] %v6769_v59  ;;  %v6776_v45 = vmin.f32 %v517_v32, 6.0  ;;  %v697_v32 = vld [vmem:[#allocation2 + $0x29] sm:$0xff] }
  0xf2   :  { %v784_v56 = vadd.f32 %v711_v26, %v702_v38  ;;  %v791_v41 = vadd.f32 %v734_v46, %v725_v20  ;;  %v515_v40 = vmax.f32 %v479_v35, 0.0  ;;  %v500_v29 = vadd.f32 %v5793_v5, %v6533_v14  ;;  %v491_v39 = vpop.f32.mrf.mxu1  ;;  %v659_v38 = vld [vmem:[#allocation2 + $0x27] sm:$0xff] }
  0xf3   :  { %v792_v31 = vadd.f32 %v735_v63, %v726_v33  ;;  %v767_v44 = vmul.f32 %v695_v42, %v6495_v1  ;;  %v799_v62 = vadd.f32 %v758_v60, %v743_v37  ;;  %v800_v61 = vadd.f32 %v6692_v50, %v744_v9  ;;  %549 = vst [vmem:[#allocation2 + $0x88] sm:$0xff] %v6776_v45 }
  0xf4   :  { %v808_v58 = vadd.f32 %v784_v56, %v776_v30  ;;  %v6782_v52 = vmin.f32 %v515_v40, 6.0  ;;  %v520_v46 = vmax.f32 %v500_v29, 0.0  ;;  %v492_v26 = vadd.f32 %v6533_v14, %v491_v39  ;;  %v5794_v35 = vpop.f32.mrf.mxu1  ;;  %v660_v30 = vld [vmem:[#allocation2 + $0x2f] sm:$0xff]  ;;  %v6802_v29 = vld [vmem:[%s9412_s25] ss:$0 sm:$0xff] }
  0xf5   :  { %v807_v20 = vadd.f32 %v783_v2, %v6502_v4  ;;  %v815_v33 = vadd.f32 %v799_v62, %v791_v41  ;;  %v816_v63 = vadd.f32 %v800_v61, %v792_v31  ;;  %v665_v42 = vmul.f32 %v657_v17, %v6517_v10 }
  0xf6   :  { %v666_v60 = vmul.f32 %v658_v48, %v6521_v11  ;;  %547 = vst [vmem:[#allocation2 + $0x78] sm:$0xff] %v6782_v52  ;;  %v6789_v56 = vmin.f32 %v520_v46, 6.0  ;;  %v518_v50 = vmax.f32 %v492_v26, 0.0  ;;  %v503_v9 = vadd.f32 %v5794_v35, %v6533_v14  ;;  %v494_v2 = vpop.f32.mrf.mxu1 }
  0xf7   :  { %v712_v37 = vmul.f32 %v658_v48, %v6525_v12  ;;  %v823_v4 = vadd.f32 %v815_v33, %v807_v20  ;;  %v824_v5 = vadd.f32 %v816_v63, %v808_v58  ;;  %v713_v41 = vmul.f32 %v659_v38, %v6506_v6 }
  0xf8   :  { %9411 = vst [vmem:[#allocation70_spill] sm:$0xff] %v6789_v56  ;;  %v737_v61 = vmul.f32 %v697_v32, %v6537_v15  ;;  %552 = vst [vmem:[#allocation2 + $0xa0] sm:$0xff] %v6789_v56  ;;  %v6796_v17 = vmin.f32 %v518_v50, 6.0  ;;  %v521_v62 = vmax.f32 %v503_v9, 0.0  ;;  %v495_v40 = vadd.f32 %v6533_v14, %v494_v2 }
  0xf9   :  { %v745_v48 = vmul.f32 %v659_v38, %v6510_v7  ;;  %v831_v31 = vadd.f32 %v823_v4, %v767_v44  ;;  %v832_v58 = vadd.f32 %v824_v5, %v6758_v3  ;;  %v746_v39 = vmul.f32 %v660_v30, %v6541_v16  ;;  %v698_v44 = vld [vmem:[#allocation2 + $0x31] sm:$0xff] }
  0xfa   :  { %v769_v46 = vmul.f32 %v697_v32, %v6551_v19  ;;  %550 = vst [vmem:[#allocation2 + $0x90] sm:$0xff] %v6796_v17  ;;  %v6809_v26 = vmin.f32 %v521_v62, 6.0  ;;  %v519_v20 = vmax.f32 %v495_v40, 0.0  ;;  %v777_v14 = vadd.f32 %v6721_v28, %v665_v42 }
  0xfb   :  { %v778_v35 = vadd.f32 %v6695_v53, %v666_v60  ;;  %v1012_v33 = vadd.f32 %v6802_v29, %v831_v31  ;;  %v1013_v63 = vadd.f32 %v6802_v29, %v832_v58  ;;  %v785_v50 = vadd.f32 %v712_v37, %v703_v51 }
  0xfc   :  { %9413 = vst [vmem:[#allocation71_spill] sm:$0xff] %v6809_v26  ;;  %v786_v3 = vadd.f32 %v713_v41, %v6752_v43  ;;  %553 = vst [vmem:[#allocation2 + $0xa8] sm:$0xff] %v6809_v26  ;;  %v6817_v9 = vmin.f32 %v519_v20, 6.0  ;;  %v793_v2 = vadd.f32 %v6755_v18, %v6698_v55  ;;  %v794_v4 = vadd.f32 %v737_v61, %v6707_v13  ;;  %v661_v41 = vld [vmem:[#allocation2 + $0x37] sm:$0xff] }
  0xfd   :  { %v801_v28 = vadd.f32 %v6710_v23, %v745_v48  ;;  %v1028_v53 = vmax.f32 %v1012_v33, 0.0  ;;  %v1029_v42 = vmax.f32 %v1013_v63, 0.0  ;;  %v802_v60 = vadd.f32 %v6738_v36, %v746_v39  ;;  %v699_v23 = vld [vmem:[#allocation2 + $0x39] sm:$0xff] }
  0xfe   :  { %9414 = vst [vmem:[#allocation72_spill] sm:$0xff] %v6817_v9  ;;  %v809_v5 = vadd.f32 %v785_v50, %v777_v14  ;;  %551 = vst [vmem:[#allocation2 + $0x98] sm:$0xff] %v6817_v9  ;;  %v770_v43 = vmul.f32 %v698_v44, %v6559_v24  ;;  %v810_v51 = vadd.f32 %v786_v3, %v778_v35  ;;  %v662_v48 = vld [vmem:[#allocation2 + $0x3f] sm:$0xff]  ;;  %v9415_v63 = vld [vmem:[#allocation41_spill] sm:$0xff] }
  0xff   :  { %v817_v37 = vadd.f32 %v801_v28, %v793_v2  ;;  %v667_v62 = vmul.f32 %v659_v38, %v6555_v22  ;;  %v1044_v40 = vmin.f32 %v1028_v53, 6.0  ;;  %v1045_v55 = vmin.f32 %v1029_v42, 6.0  ;;  %v9416_v3 = vld [vmem:[#allocation42_spill] sm:$0xff]  ;;  %v9419_v42 = vld [vmem:[#allocation53_spill] sm:$0xff] }
 0x100   :  { %v818_v18 = vadd.f32 %v802_v60, %v794_v4  ;;  %v668_v13 = vmul.f32 %v660_v30, %v6563_v25  ;;  %v705_v36 = vmul.f32 %v697_v32, %v6568_v27  ;;  %v706_v31 = vmul.f32 %v698_v44, %v6580_v47  ;;  %v9417_v4 = vld [vmem:[#allocation67_spill] sm:$0xff] }
 0x101   :  { %v825_v61 = vadd.f32 %v817_v37, %v809_v5  ;;  %v714_v58 = vmul.f32 %v660_v30, %v6572_v34  ;;  %v1060_v39 = vpack.c.bf16 %v1045_v55, %v1044_v40  ;;  %v715_v14 = vmul.f32 %v661_v41, %v6584_v49  ;;  %v9418_v30 = vld [vmem:[#allocation43_spill] sm:$0xff]  ;;  %v9422_v40 = vld [vmem:[#allocation68_spill] sm:$0xff] }
 0x102   :  { %v826_v20 = vadd.f32 %v818_v18, %v810_v51  ;;  %v729_v38 = vmul.f32 %v6658_v8, %v6715_v54  ;;  %v738_v33 = vmul.f32 %v698_v44, %v6601_v21  ;;  %v739_v50 = vmul.f32 %v699_v23, %v9415_v63  ;;  %v700_v54 = vld [vmem:[#allocation2 + $0x41] sm:$0xff] }
 0x103   :  { %v833_v35 = vadd.f32 %v825_v61, %v769_v46  ;;  %v747_v2 = vmul.f32 %v661_v41, %v9416_v3  ;;  %5811 = vmatprep.mubr.bf16.mxu1 %v1060_v39  ;;  %v730_v28 = vmul.f32 %v6658_v8, %v9417_v4  ;;  %v748_v53 = vmul.f32 %v662_v48, %v9418_v30  ;;  %v9420_v46 = vld [vmem:[#allocation44_spill] sm:$0xff]  ;;  %v9421_v44 = vld [vmem:[#allocation62_spill] sm:$0xff]  ;;  %v9423_v30 = vld [vmem:[#allocation63_spill] sm:$0xff] }
 0x104   :  { %v834_v32 = vadd.f32 %v826_v20, %v770_v43  ;;  %v762_v60 = vmul.f32 %v9419_v42, %v9417_v4  ;;  %v771_v51 = vmul.f32 %v699_v23, %v9420_v46  ;;  %v779_v37 = vadd.f32 %v9421_v44, %v667_v62  ;;  %v9424_v63 = vld [vmem:[#allocation34_spill] sm:$0xff]  ;;  %v709_v46 = vld [vmem:[#allocation2 + $0x47] sm:$0xff] }
 0x105   :  { %v1014_v5 = vadd.f32 %v6802_v29, %v833_v35  ;;  %v780_v55 = vadd.f32 %v9422_v40, %v668_v13  ;;  %v787_v43 = vadd.f32 %v714_v58, %v705_v36  ;;  %v788_v61 = vadd.f32 %v715_v14, %v706_v31  ;;  %v9425_v13 = vld [vmem:[#allocation50_spill] sm:$0xff]  ;;  %v9427_v14 = vld [vmem:[#allocation55_spill] sm:$0xff] }
 0x106   :  { %v1015_v18 = vadd.f32 %v6802_v29, %v834_v32  ;;  %v795_v39 = vadd.f32 %v738_v33, %v729_v38  ;;  %v796_v26 = vadd.f32 %v739_v50, %v730_v28  ;;  %v803_v56 = vadd.f32 %v762_v60, %v747_v2  ;;  %v733_v32 = vld [vmem:[#allocation2 + $0x49] sm:$0xff]  ;;  %v9426_v31 = vld [vmem:[#allocation54_spill] sm:$0xff]  ;;  %v9428_v33 = vld [vmem:[#allocation45_spill] sm:$0xff] }
 0x107   :  { %v1030_v20 = vmax.f32 %v1014_v5, 0.0  ;;  %v804_v9 = vadd.f32 %v9423_v30, %v748_v53  ;;  %v772_v35 = vmul.f32 %v700_v54, %v9424_v63  ;;  %v811_v21 = vadd.f32 %v787_v43, %v779_v37  ;;  %v742_v2 = vld [vmem:[#allocation2 + $0x4f] sm:$0xff]  ;;  %v9430_v5 = vld [vmem:[#allocation46_spill] sm:$0xff] }
 0x108   :  { %v1031_v3 = vmax.f32 %v1015_v18, 0.0  ;;  %v812_v49 = vadd.f32 %v788_v61, %v780_v55  ;;  %v819_v62 = vadd.f32 %v803_v56, %v795_v39  ;;  %v669_v40 = vmul.f32 %v661_v41, %v9425_v13  ;;  %v9429_v53 = vld [vmem:[#allocation56_spill] sm:$0xff] }
 0x109   :  { %v1046_v34 = vmin.f32 %v1030_v20, 6.0  ;;  %v820_v44 = vadd.f32 %v804_v9, %v796_v26  ;;  %v670_v58 = vmul.f32 %v662_v48, %v9426_v31  ;;  %v707_v38 = vmul.f32 %v699_v23, %v9427_v14  ;;  %v9431_v56 = vld [vmem:[#allocation20_spill] sm:$0xff]  ;;  %v9432_v9 = vld [vmem:[#allocation47_spill] sm:$0xff] }
 0x10a   :  { %v1047_v36 = vmin.f32 %v1031_v3, 6.0  ;;  %v708_v50 = vmul.f32 %v700_v54, %v9428_v33  ;;  %v827_v28 = vadd.f32 %v819_v62, %v811_v21  ;;  %v716_v60 = vmul.f32 %v662_v48, %v9429_v53  ;;  %v9433_v3 = vld [vmem:[#allocation51_spill] sm:$0xff]  ;;  %v9434_v23 = vld [vmem:[#allocation48_spill] sm:$0xff]  ;;  %v9436_v21 = vld [vmem:[#allocation65_spill] sm:$0xff] }
 0x10b   :  { %v828_v30 = vadd.f32 %v820_v44, %v812_v49  ;;  %v717_v37 = vmul.f32 %v709_v46, %v9430_v5  ;;  %v691_v26 = vmul.f32 %v9431_v56, %v9417_v4  ;;  %v740_v41 = vmul.f32 %v700_v54, %v9432_v9  ;;  %v9435_v20 = vld [vmem:[#allocation52_spill] sm:$0xff] }
 0x10c   :  { %v1061_v55 = vpack.c.bf16 %v1047_v36, %v1046_v34  ;;  %v741_v18 = vmul.f32 %v733_v32, %v9433_v3  ;;  %v835_v43 = vadd.f32 %v827_v28, %v771_v51  ;;  %v749_v39 = vmul.f32 %v709_v46, %v9434_v23  ;;  %v9437_v62 = vld [vmem:[#allocation64_spill] sm:$0xff]  ;;  %v9438_v46 = vld [vmem:[#allocation66_spill] sm:$0xff] }
 0x10d   :  { %v836_v61 = vadd.f32 %v828_v30, %v772_v35  ;;  %v750_v33 = vmul.f32 %v742_v2, %v9435_v20  ;;  %v732_v49 = vmul.f32 %v6658_v8, %v9436_v21  ;;  %v764_v34 = vmul.f32 %v9419_v42, %v9436_v21  ;;  %v840_v36 = vld [vmem:[#allocation2 + $0x6f] sm:$0xff] }
 0x10e   :  { %5812 = vmatmul.mubr.bf16.vlgmr.msra.gmra.mxu1 %v1061_v55  ;;  %v781_v48 = vadd.f32 %v691_v26, %v669_v40  ;;  %v782_v4 = vadd.f32 %v9437_v62, %v670_v58  ;;  %v1016_v54 = vadd.f32 %v6802_v29, %v835_v43  ;;  %v789_v51 = vadd.f32 %v716_v60, %v707_v38  ;;  %v9439_v55 = vld [vmem:[#allocation59_spill] sm:$0xff]  ;;  %v872_v26 = vld [vmem:[#allocation2 + $0x71] sm:$0xff] }
 0x10f   :  { %v1017_v44 = vadd.f32 %v6802_v29, %v836_v61  ;;  %v790_v35 = vadd.f32 %v717_v37, %v708_v50  ;;  %v797_v28 = vadd.f32 %v740_v41, %v9438_v46  ;;  %v798_v2 = vadd.f32 %v741_v18, %v732_v49  ;;  %v871_v23 = vld [vmem:[#allocation2 + $0x69] sm:$0xff]  ;;  %v9440_v58 = vld [vmem:[#allocation57_spill] sm:$0xff] }
 0x110   :  { %v805_v30 = vadd.f32 %v764_v34, %v749_v39  ;;  %v806_v20 = vadd.f32 %v9439_v55, %v750_v33  ;;  %v1032_v3 = vmax.f32 %v1016_v54, 0.0  ;;  %v813_v21 = vadd.f32 %v789_v51, %v781_v48  ;;  %v841_v61 = vld [vmem:[#allocation2 + $0x77] sm:$0xff]  ;;  %v9441_v38 = vld [vmem:[#allocation15_spill] sm:$0xff]  ;;  %v9442_v33 = vld [vmem:[#allocation16_spill] sm:$0xff] }
 0x111   :  { %v1033_v9 = vmax.f32 %v1017_v44, 0.0  ;;  %v814_v40 = vadd.f32 %v790_v35, %v782_v4  ;;  %v773_v62 = vmul.f32 %v733_v32, %v9440_v58  ;;  %v848_v50 = vmul.f32 %v840_v36, %v9441_v38  ;;  %v873_v18 = vld [vmem:[#allocation2 + $0x79] sm:$0xff] }
 0x112   :  { %v821_v43 = vadd.f32 %v805_v30, %v797_v28  ;;  %v822_v5 = vadd.f32 %v806_v20, %v798_v2  ;;  %v1048_v60 = vmin.f32 %v1032_v3, 6.0  ;;  %v864_v41 = vmul.f32 %v9431_v56, %v6769_v59  ;;  %v842_v48 = vld [vmem:[#allocation2 + $0x7f] sm:$0xff]  ;;  %v9443_v4 = vld [vmem:[#allocation21_spill] sm:$0xff]  ;;  %v9446_v28 = vld [vmem:[#allocation60_spill] sm:$0xff] }
 0x113   :  { %v1049_v37 = vmin.f32 %v1033_v9, 6.0  ;;  %v879_v39 = vmul.f32 %v871_v23, %v9442_v33  ;;  %v880_v54 = vmul.f32 %v872_v26, %v9443_v4  ;;  %v9444_v44 = vld [vmem:[#allocation18_spill] sm:$0xff]  ;;  %v9445_v20 = vld [vmem:[#allocation23_spill] sm:$0xff]  ;;  %v897_v3 = vmul.f32 %v6658_v8, %v6769_v59  ;;  %v9447_v30 = vld [vmem:[#allocation24_spill] sm:$0xff] }
 0x114   :  { %v829_v49 = vadd.f32 %v821_v43, %v813_v21  ;;  %v830_v34 = vadd.f32 %v822_v5, %v814_v40  ;;  %v888_v32 = vmul.f32 %v840_v36, %v9444_v44  ;;  %v889_v35 = vmul.f32 %v841_v61, %v9445_v20  ;;  %v9448_v21 = vld [vmem:[#allocation25_spill] sm:$0xff] }
 0x115   :  { %v1062_v51 = vpack.c.bf16 %v1049_v37, %v1048_v60  ;;  %v906_v9 = vmul.f32 %v872_v26, %v6467_v57  ;;  %v907_v23 = vmul.f32 %v873_v18, %v9447_v30  ;;  %v915_v5 = vmul.f32 %v841_v61, %v9448_v21  ;;  %v9449_v38 = vld [vmem:[#allocation69_spill] sm:$0xff] }
 0x116   :  { %v837_v46 = vadd.f32 %v829_v49, %v773_v62  ;;  %v838_v2 = vadd.f32 %v830_v34, %v9446_v28  ;;  %v898_v40 = vmul.f32 %v6658_v8, %v6782_v52  ;;  %v916_v36 = vmul.f32 %v842_v48, %v6491_v0  ;;  %v874_v62 = vld [vmem:[#allocation2 + $0x81] sm:$0xff]  ;;  %v9450_v28 = vld [vmem:[#allocation28_spill] sm:$0xff]  ;;  %v9451_v21 = vld [vmem:[#allocation61_spill] sm:$0xff] }
 0x117   :  { %5815 = vmatprep.mubr.bf16.mxu1 %v1062_v51  ;;  %v924_v43 = vmul.f32 %v9419_v42, %v6782_v52  ;;  %v925_v59 = vmul.f32 %v9419_v42, %v9449_v38  ;;  %v933_v60 = vmul.f32 %v873_v18, %v6495_v1  ;;  %v942_v37 = vadd.f32 %v864_v41, %v848_v50  ;;  %v843_v50 = vld [vmem:[#allocation2 + $0x87] sm:$0xff] }
 0x118   :  { %v1018_v57 = vadd.f32 %v6802_v29, %v837_v46  ;;  %v1019_v26 = vadd.f32 %v6802_v29, %v838_v2  ;;  %v949_v33 = vadd.f32 %v888_v32, %v879_v39  ;;  %v950_v49 = vadd.f32 %v889_v35, %v880_v54  ;;  %v875_v32 = vld [vmem:[#allocation2 + $0x89] sm:$0xff]  ;;  %v9452_v35 = vld [vmem:[#allocation22_spill] sm:$0xff] }
 0x119   :  { %v957_v34 = vadd.f32 %v906_v9, %v897_v3  ;;  %v958_v4 = vadd.f32 %v907_v23, %v898_v40  ;;  %v965_v51 = vadd.f32 %v924_v43, %v915_v5  ;;  %v966_v20 = vadd.f32 %v925_v59, %v916_v36 }
 0x11a   :  { %v1034_v44 = vmax.f32 %v1018_v57, 0.0  ;;  %v1035_v0 = vmax.f32 %v1019_v26, 0.0  ;;  %v934_v30 = vmul.f32 %v874_v62, %v9450_v28  ;;  %v973_v58 = vadd.f32 %v949_v33, %v9451_v21 }
 0x11b   :  { %v974_v55 = vadd.f32 %v950_v49, %v942_v37  ;;  %v849_v46 = vmul.f32 %v841_v61, %v6517_v10  ;;  %v981_v14 = vadd.f32 %v965_v51, %v957_v34  ;;  %v982_v1 = vadd.f32 %v966_v20, %v958_v4  ;;  %v844_v10 = vld [vmem:[#allocation2 + $0x8f] sm:$0xff] }
 0x11c   :  { %v1050_v2 = vmin.f32 %v1034_v44, 6.0  ;;  %v1051_v53 = vmin.f32 %v1035_v0, 6.0  ;;  %v850_v41 = vmul.f32 %v842_v48, %v6521_v11  ;;  %v865_v39 = vmul.f32 %v9431_v56, %v6782_v52  ;;  %v9453_v61 = vld [vmem:[#allocation17_spill] sm:$0xff]  ;;  %v9454_v52 = vld [vmem:[#allocation19_spill] sm:$0xff] }
 0x11d   :  { %v866_v54 = vmul.f32 %v9431_v56, %v9449_v38  ;;  %v881_v3 = vmul.f32 %v873_v18, %v9452_v35  ;;  %v989_v23 = vadd.f32 %v981_v14, %v973_v58  ;;  %v990_v5 = vadd.f32 %v982_v1, %v974_v55 }
 0x11e   :  { %v1063_v9 = vpack.c.bf16 %v1051_v53, %v1050_v2  ;;  %v882_v40 = vmul.f32 %v874_v62, %v9453_v61  ;;  %v890_v36 = vmul.f32 %v842_v48, %v6525_v12  ;;  %v891_v43 = vmul.f32 %v843_v50, %v6506_v6  ;;  %v845_v2 = vld [vmem:[#allocation2 + $0x97] sm:$0xff] }
 0x11f   :  { %v899_v11 = vmul.f32 %v6658_v8, %v9449_v38  ;;  %v908_v59 = vmul.f32 %v874_v62, %v9454_v52  ;;  %v997_v57 = vadd.f32 %v989_v23, %v933_v60  ;;  %v998_v26 = vadd.f32 %v990_v5, %v934_v30  ;;  %v876_v38 = vld [vmem:[#allocation2 + $0x91] sm:$0xff] }
 0x120   :  { %5816 = vmatmul.mubr.bf16.gmra.mxu1 %v1063_v9  ;;  %v909_v18 = vmul.f32 %v875_v32, %v6537_v15  ;;  %v917_v14 = vmul.f32 %v843_v50, %v6510_v7  ;;  %v900_v53 = vmul.f32 %v6658_v8, %v6776_v45  ;;  %v918_v55 = vmul.f32 %v844_v10, %v6541_v16  ;;  %v9455_v61 = vld [vmem:[#allocation33_spill] sm:$0xff] }
 0x121   :  { %v926_v6 = vmul.f32 %v9419_v42, %v6776_v45  ;;  %v927_v12 = vmul.f32 %v9419_v42, %v6796_v17  ;;  %v1020_v58 = vadd.f32 %v6802_v29, %v997_v57  ;;  %v1021_v48 = vadd.f32 %v6802_v29, %v998_v26 }
 0x122   :  { %v935_v15 = vmul.f32 %v875_v32, %v6551_v19  ;;  %v943_v62 = vadd.f32 %v865_v39, %v849_v46  ;;  %v944_v7 = vadd.f32 %v866_v54, %v850_v41  ;;  %v951_v60 = vadd.f32 %v890_v36, %v881_v3  ;;  %v877_v54 = vld [vmem:[#allocation2 + $0x99] sm:$0xff]  ;;  %v9457_v36 = vld [vmem:[#allocation40_spill] sm:$0xff] }
 0x123   :  { %v952_v37 = vadd.f32 %v891_v43, %v882_v40  ;;  %v959_v33 = vadd.f32 %v908_v59, %v899_v11  ;;  %v1036_v49 = vmax.f32 %v1020_v58, 0.0  ;;  %v1037_v16 = vmax.f32 %v1021_v48, 0.0  ;;  %v846_v3 = vld [vmem:[#allocation2 + $0x9f] sm:$0xff]  ;;  %v9458_v11 = vld [vmem:[#allocation41_spill] sm:$0xff] }
 0x124   :  { %v960_v34 = vadd.f32 %v909_v18, %v900_v53  ;;  %v967_v4 = vadd.f32 %v926_v6, %v917_v14  ;;  %v936_v44 = vmul.f32 %v876_v38, %v6559_v24  ;;  %v968_v0 = vadd.f32 %v927_v12, %v918_v55  ;;  %v9459_v59 = vld [vmem:[#allocation42_spill] sm:$0xff]  ;;  %v9463_v6 = vld [vmem:[#allocation44_spill] sm:$0xff] }
 0x125   :  { %v975_v51 = vadd.f32 %v951_v60, %v943_v62  ;;  %v976_v20 = vadd.f32 %v952_v37, %v944_v7  ;;  %v1052_v28 = vmin.f32 %v1036_v49, 6.0  ;;  %v1053_v30 = vmin.f32 %v1037_v16, 6.0  ;;  %v9462_v53 = vld [vmem:[#allocation70_spill] sm:$0xff] }
 0x126   :  { %v983_v21 = vadd.f32 %v967_v4, %v959_v33  ;;  %v851_v19 = vmul.f32 %v843_v50, %v6555_v22  ;;  %v984_v46 = vadd.f32 %v968_v0, %v960_v34  ;;  %v852_v1 = vmul.f32 %v844_v10, %v6563_v25  ;;  %v9456_v50 = vld [vmem:[#allocation35_spill] sm:$0xff] }
 0x127   :  { %v867_v41 = vmul.f32 %v9431_v56, %v6776_v45  ;;  %v868_v39 = vmul.f32 %v9431_v56, %v6796_v17  ;;  %v1064_v24 = vpack.c.bf16 %v1053_v30, %v1052_v28  ;;  %v883_v9 = vmul.f32 %v875_v32, %v6568_v27  ;;  %v9460_v27 = vld [vmem:[#allocation72_spill] sm:$0xff]  ;;  %v9461_v32 = vld [vmem:[#allocation43_spill] sm:$0xff] }
 0x128   :  { %v991_v35 = vadd.f32 %v983_v21, %v975_v51  ;;  %v884_v23 = vmul.f32 %v876_v38, %v6580_v47  ;;  %v992_v5 = vadd.f32 %v984_v46, %v976_v20  ;;  %v892_v22 = vmul.f32 %v844_v10, %v9455_v61  ;;  %v887_v28 = vld [vmem:[#allocation2 + $0xa7] sm:$0xff] }
 0x129   :  { %v893_v40 = vmul.f32 %v845_v2, %v9456_v50  ;;  %v901_v25 = vmul.f32 %v6658_v8, %v6796_v17  ;;  %5819 = vmatprep.mubr.bf16.mxu1 %v1064_v24  ;;  %v910_v43 = vmul.f32 %v876_v38, %v9457_v36  ;;  %v911_v52 = vmul.f32 %v877_v54, %v9458_v11  ;;  %v878_v17 = vld [vmem:[#allocation2 + $0xa1] sm:$0xff] }
 0x12a   :  { %v999_v45 = vadd.f32 %v991_v35, %v935_v15  ;;  %v919_v57 = vmul.f32 %v845_v2, %v9459_v59  ;;  %v1000_v26 = vadd.f32 %v992_v5, %v936_v44  ;;  %v902_v47 = vmul.f32 %v6658_v8, %v9460_v27  ;;  %v9465_v35 = vld [vmem:[#allocation45_spill] sm:$0xff]  ;;  %v9469_v36 = vld [vmem:[#allocation51_spill] sm:$0xff] }
 0x12b   :  { %v920_v18 = vmul.f32 %v846_v3, %v9461_v32  ;;  %v928_v10 = vmul.f32 %v9419_v42, %v9460_v27  ;;  %v929_v55 = vmul.f32 %v9419_v42, %v9462_v53  ;;  %v937_v12 = vmul.f32 %v877_v54, %v9463_v6 }
 0x12c   :  { %v1022_v14 = vadd.f32 %v6802_v29, %v999_v45  ;;  %v945_v58 = vadd.f32 %v867_v41, %v851_v19  ;;  %v1023_v48 = vadd.f32 %v6802_v29, %v1000_v26  ;;  %v946_v38 = vadd.f32 %v868_v39, %v852_v1  ;;  %v905_v1 = vld [vmem:[#allocation2 + $0xa9] sm:$0xff] }
 0x12d   :  { %v953_v15 = vadd.f32 %v892_v22, %v883_v9  ;;  %v954_v62 = vadd.f32 %v893_v40, %v884_v23  ;;  %v961_v60 = vadd.f32 %v910_v43, %v901_v25  ;;  %v962_v37 = vadd.f32 %v911_v52, %v902_v47  ;;  %v9464_v39 = vld [vmem:[#allocation55_spill] sm:$0xff]  ;;  %v914_v23 = vld [vmem:[#allocation2 + $0xaf] sm:$0xff]  ;;  %v9467_v22 = vld [vmem:[#allocation46_spill] sm:$0xff] }
 0x12e   :  { %v1038_v7 = vmax.f32 %v1022_v14, 0.0  ;;  %v969_v33 = vadd.f32 %v928_v10, %v919_v57  ;;  %v1039_v49 = vmax.f32 %v1023_v48, 0.0  ;;  %v938_v16 = vmul.f32 %v878_v17, %v9424_v63  ;;  %v9468_v25 = vld [vmem:[#allocation47_spill] sm:$0xff]  ;;  %v9471_v52 = vld [vmem:[#allocation48_spill] sm:$0xff] }
 0x12f   :  { %v970_v34 = vadd.f32 %v929_v55, %v920_v18  ;;  %v978_v4 = vadd.f32 %v954_v62, %v946_v38  ;;  %v977_v0 = vadd.f32 %v953_v15, %v945_v58  ;;  %v853_v20 = vmul.f32 %v845_v2, %v9425_v13  ;;  %v9466_v2 = vld [vmem:[#allocation56_spill] sm:$0xff] }
 0x130   :  { %v1054_v44 = vmin.f32 %v1038_v7, 6.0  ;;  %v985_v51 = vadd.f32 %v969_v33, %v961_v60  ;;  %v1055_v30 = vmin.f32 %v1039_v49, 6.0  ;;  %v854_v19 = vmul.f32 %v846_v3, %v9426_v31  ;;  %v9472_v57 = vld [vmem:[#allocation52_spill] sm:$0xff]  ;;  %v9474_v7 = vld [vmem:[#allocation49_spill] sm:$0xff] }
 0x131   :  { %v986_v21 = vadd.f32 %v970_v34, %v962_v37  ;;  %v869_v46 = vmul.f32 %v9431_v56, %v9460_v27  ;;  %v870_v63 = vmul.f32 %v9431_v56, %v9462_v53  ;;  %v885_v24 = vmul.f32 %v877_v54, %v9464_v39  ;;  %v9470_v54 = vld [vmem:[#allocation71_spill] sm:$0xff]  ;;  %v6970_v10 = vld [vmem:[#allocation2 + $0xb1] sm:$0xff] }
 0x132   :  { %v993_v41 = vadd.f32 %v985_v51, %v977_v0  ;;  %v886_v9 = vmul.f32 %v878_v17, %v9465_v35  ;;  %v1065_v5 = vpack.c.bf16 %v1055_v30, %v1054_v44  ;;  %v894_v61 = vmul.f32 %v846_v3, %v9466_v2  ;;  %v9475_v49 = vld [vmem:[#allocation57_spill] sm:$0xff]  ;;  %v6995_v35 = vld [vmem:[%s9114_s9] ss:$0 sm:$0xff] }
 0x133   :  { %v994_v13 = vadd.f32 %v986_v21, %v978_v4  ;;  %v895_v50 = vmul.f32 %v887_v28, %v9467_v22  ;;  %v903_v40 = vmul.f32 %v6658_v8, %v9462_v53  ;;  %v912_v45 = vmul.f32 %v878_v17, %v9468_v25  ;;  %v5891_v39 = vld [vmem:[%s9116_s11 + $0x30] sm:$0xff]  }
 0x134   :  { %v1001_v31 = vadd.f32 %v993_v41, %v937_v12  ;;  %v913_v43 = vmul.f32 %v905_v1, %v9469_v36  ;;  %5820 = vmatmul.mubr.bf16.gmra.mxu1 %v1065_v5  ;;  %v904_v11 = vmul.f32 %v6658_v8, %v9470_v54  ;;  %v921_v59 = vmul.f32 %v887_v28, %v9471_v52  ;;  %v9473_v12 = vld [vmem:[#allocation59_spill] sm:$0xff]  ;;  %v9477_v25 = vld [vmem:[#allocation9_spill] sm:$0xff]  ;;  %v9478_v36 = vld [vmem:[#allocation10_spill] sm:$0xff] }
 0x135   :  { %v1002_v56 = vadd.f32 %v994_v13, %v938_v16  ;;  %v922_v26 = vmul.f32 %v914_v23, %v9472_v57  ;;  %v930_v27 = vmul.f32 %v9419_v42, %v9470_v54  ;;  %v947_v47 = vadd.f32 %v869_v46, %v853_v20  ;;  %v7004_v5 = vld [vmem:[%s9114_s9 + $0x2] ss:$0 sm:$0xff]  ;;  %v7009_v13 = vld [vmem:[%s9114_s9 + $0x3] ss:$0 sm:$0xff]  ;;  %v9479_v54 = vld [vmem:[#allocation29_spill] sm:$0xff] }
 0x136   :  { %v1024_v3 = vadd.f32 %v6802_v29, %v1001_v31  ;;  %v948_v32 = vadd.f32 %v870_v63, %v854_v19  ;;  %v955_v14 = vadd.f32 %v894_v61, %v885_v24  ;;  %v956_v17 = vadd.f32 %v895_v50, %v886_v9  ;;  %v5890_v63 = vld [vmem:[%s9116_s11 + $0x38] sm:$0xff]   ;;  %v5892_v9 = vld [vmem:[%s9116_s11 + $0x28] sm:$0xff]   ;;  %v7014_v61 = vld [vmem:[%s9114_s9 + $0x5] ss:$0 sm:$0xff] }
 0x137   :  { %v1025_v18 = vadd.f32 %v6802_v29, %v1002_v56  ;;  %v963_v53 = vadd.f32 %v912_v45, %v903_v40  ;;  %v964_v8 = vadd.f32 %v913_v43, %v904_v11  ;;  %v971_v6 = vadd.f32 %v930_v27, %v921_v59  ;;  %5847 = vmatprep.subr.bf16.mxu1 %v5890_v63  ;;  %v7020_v31 = vld [vmem:[%s9114_s9 + $0x6] ss:$0 sm:$0xff]  ;;  %v7025_v40 = vld [vmem:[%s9114_s9 + $0x8] ss:$0 sm:$0xff]  ;;  %v9481_v52 = vld [vmem:[#allocation13_spill] sm:$0xff] }
 0x138   :  { %v1040_v55 = vmax.f32 %v1024_v3, 0.0  ;;  %v972_v58 = vadd.f32 %v922_v26, %v9473_v12  ;;  %v979_v38 = vadd.f32 %v955_v14, %v947_v47  ;;  %v980_v15 = vadd.f32 %v956_v17, %v948_v32  ;;  %5848 = vmatpush3.bf16.msra.mxu1 %v5890_v63  ;;  %v9483_v57 = vld [vmem:[#allocation11_spill] sm:$0xff]  ;;  %v7060_v14 = vld [vmem:[%s9114_s9 + $0x1] ss:$0 sm:$0xff] }
 0x139   :  { %v1041_v48 = vmax.f32 %v1025_v18, 0.0  ;;  %v940_v42 = vmul.f32 %v6970_v10, %v9474_v7  ;;  %v987_v60 = vadd.f32 %v971_v6, %v963_v53  ;;  %v939_v16 = vmul.f32 %v905_v1, %v9475_v49  ;;  %v5888_v1 = vld [vmem:[%s9476_s26] sm:$0xff]   ;;  %5849 = vmatprep.subr.bf16.mxu1 %v5891_v39 }
 0x13a   :  { %v1056_v62 = vmin.f32 %v1040_v55, 6.0  ;;  %v988_v37 = vadd.f32 %v972_v58, %v964_v8  ;;  %5843 = vmatprep.mubr.bf16.mxu0 %v5888_v1  ;;  %v7029_v45 = vmul.f32 %v6995_v35, %v9477_v25  ;;  %v7033_v43 = vmul.f32 %v6995_v35, %v9478_v36  ;;  %v5893_v27 = vld [vmem:[%s9116_s11 + $0x20] sm:$0xff]   ;;  %v9486_v8 = vld [vmem:[#allocation12_spill] sm:$0xff] }
 0x13b   :  { %v1057_v33 = vmin.f32 %v1041_v48, 6.0  ;;  %v995_v34 = vadd.f32 %v987_v60, %v979_v38  ;;  %v7037_v11 = vmul.f32 %v6995_v35, %v9479_v54  ;;  %v7041_v59 = vmul.f32 %v7004_v5, %v9481_v52  ;;  %v9484_v17 = vld [vmem:[#allocation27_spill] sm:$0xff]  ;;  %v9488_v12 = vld [vmem:[#allocation26_spill] sm:$0xff] }
 0x13c   :  { %v996_v4 = vadd.f32 %v988_v37, %v980_v15  ;;  %5850 = vmatpush3.bf16.msra.mxu1 %v5891_v39  ;;  %v7045_v26 = vmul.f32 %v7004_v5, %v9483_v57  ;;  %v7049_v3 = vmul.f32 %v7009_v13, %v9477_v25  ;;  %v7064_v53 = vmul.f32 %v7009_v13, %v9484_v17  ;;  %v9490_v48 = vld [vmem:[#allocation14_spill] sm:$0xff]  ;;  %v9508_v39 = vld [vmem:[#allocation37_spill] sm:$0xff] }
 0x13d   :  { %v1066_v44 = vpack.c.bf16 %v1057_v33, %v1056_v62  ;;  %v1003_v0 = vadd.f32 %v995_v34, %v939_v16  ;;  %9480 = vst [vmem:[#allocation67_spill] sm:$0xff] %v7037_v11  ;;  %9482 = vst [vmem:[#allocation53_spill] sm:$0xff] %v7041_v59  ;;  %5851 = vmatprep.subr.bf16.mxu1 %v5892_v9  ;;  %v7068_v6 = vmul.f32 %v7014_v61, %v9486_v8  ;;  %v9492_v15 = vld [vmem:[#allocation58_spill] sm:$0xff] }
 0x13e   :  { %v1004_v51 = vadd.f32 %v996_v4, %v940_v42  ;;  %9485 = vst [vmem:[#allocation62_spill] sm:$0xff] %v7064_v53  ;;  %v7072_v58 = vmul.f32 %v7020_v31, %v9488_v12  ;;  %v7076_v38 = vmul.f32 %v7025_v40, %v9490_v48  ;;  %v7080_v62 = vmul.f32 %v9492_v15, %v7060_v14  ;;  %v9506_v1 = vld [vmem:[#allocation38_spill] sm:$0xff] }
 0x13f   :  { %5823 = vmatprep.mubr.bf16.mxu1 %v1066_v44  ;;  %v1026_v20 = vadd.f32 %v6802_v29, %v1003_v0  ;;  %9487 = vst [vmem:[#allocation68_spill] sm:$0xff] %v7068_v6  ;;  %v7088_v37 = vmul.f32 %v6995_v35, %v9488_v12  ;;  %v7092_v33 = vmul.f32 %v6995_v35, %v9484_v17 }
 0x140   :  { %v1027_v28 = vadd.f32 %v6802_v29, %v1004_v51  ;;  %v6990_v29 = vld [vmem:[%s9113_s8] ss:$0 sm:$0xff]  ;;  %9489 = vst [vmem:[#allocation63_spill] sm:$0xff] %v7072_v58  ;;  %9491 = vst [vmem:[#allocation34_spill] sm:$0xff] %v7076_v38  ;;  %5852 = vmatpush3.bf16.msra.mxu1 %v5892_v9  ;;  %v7096_v49 = vmul.f32 %v7004_v5, %v9486_v8  ;;  %v7100_v16 = vmul.f32 %v7009_v13, %v9488_v12  ;;  %v1385_v9 = vld [vmem:[#allocation2 + $0x7] sm:$0xff] }
 0x141   :  { %v1042_v30 = vmax.f32 %v1026_v20, 0.0  ;;  %9493 = vst [vmem:[#allocation50_spill] sm:$0xff] %v7088_v37  ;;  %9494 = vst [vmem:[#allocation54_spill] sm:$0xff] %v7092_v33  ;;  %v7104_v34 = vmul.f32 %v7004_v5, %v9490_v48  ;;  %5853 = vmatprep.subr.bf16.mxu1 %v5893_v27  ;;  %v7111_v0 = vmul.f32 %v7009_v13, %v9478_v36  ;;  %v9521_v12 = vld [vmem:[#allocation31_spill] sm:$0xff] }
 0x142   :  { %v1043_v21 = vmax.f32 %v1027_v28, 0.0  ;;  %9495 = vst [vmem:[#allocation20_spill] sm:$0xff] %v7096_v49  ;;  %9496 = vst [vmem:[#allocation65_spill] sm:$0xff] %v7100_v16  ;;  %v7115_v51 = vmul.f32 %v7014_v61, %v9483_v57  ;;  %v7119_v20 = vmul.f32 %v7014_v61, %v9490_v48  ;;  %v7123_v28 = vmul.f32 %v7020_v31, %v9477_v25 }
 0x143   :  { %v1058_v19 = vmin.f32 %v1042_v30, 6.0  ;;  %9497 = vst [vmem:[#allocation64_spill] sm:$0xff] %v7104_v34  ;;  %9498 = vst [vmem:[#allocation66_spill] sm:$0xff] %v7111_v0  ;;  %v7127_v30 = vmul.f32 %v7020_v31, %v9478_v36  ;;  %v7142_v63 = vmul.f32 %v6995_v35, %v9506_v1  ;;  %v7162_v25 = vmul.f32 %v7014_v61, %v9508_v39 }
 0x144   :  { %v1059_v46 = vmin.f32 %v1043_v21, 6.0  ;;  %9499 = vst [vmem:[#allocation15_spill] sm:$0xff] %v7115_v51  ;;  %9500 = vst [vmem:[#allocation16_spill] sm:$0xff] %v7119_v20  ;;  %v7131_v21 = vmul.f32 %v7025_v40, %v9483_v57  ;;  %5854 = vmatpush3.bf16.msra.mxu1 %v5893_v27  ;;  %v7175_v57 = vmul.f32 %v7020_v31, %v9506_v1 }
 0x145   :  { %9501 = vst [vmem:[#allocation21_spill] sm:$0xff] %v7123_v28  ;;  %9502 = vst [vmem:[#allocation18_spill] sm:$0xff] %v7127_v30  ;;  %v7179_v27 = vmul.f32 %v7025_v40, %v9508_v39  ;;  %v7189_v48 = vmul.f32 %v7004_v5, %v9521_v12  ;;  %v1393_v15 = vmul.f32 %v1385_v9, %v7029_v45  ;;  %v6140_v9 = vld [vmem:[#allocation2] sm:$0xff] }
 0x146   :  { %v1067_v41 = vpack.c.bf16 %v1059_v46, %v1058_v19  ;;  %9503 = vst [vmem:[#allocation23_spill] sm:$0xff] %v7131_v21  ;;  %v9504_v46 = vld [vmem:[#allocation36_spill] sm:$0xff]  ;;  %9507 = vst [vmem:[#allocation24_spill] sm:$0xff] %v7142_v63 }
 0x147   :  { %9514 = vst [vmem:[#allocation22_spill] sm:$0xff] %v7162_v25  ;;  %9517 = vst [vmem:[#allocation33_spill] sm:$0xff] %v7175_v57 }
 0x148   :  { %5824 = vmatmul.mubr.bf16.gmra.mxu1 %v1067_v41  ;;  %v7138_v41 = vmul.f32 %v6995_v35, %v9504_v46  ;;  %9518 = vst [vmem:[#allocation35_spill] sm:$0xff] %v7179_v27  ;;  %9522 = vst [vmem:[#allocation41_spill] sm:$0xff] %v7189_v48 }
 0x14a   :  { %9505 = vst [vmem:[#allocation60_spill] sm:$0xff] %v7138_v41 }
 0x1ce   :  { %v5813_v24 = vpop.f32.mrf.mxu1 }
 0x1cf   :  { %v1182_v23 = vadd.f32 %v5813_v24, %v6990_v29  ;;  %v7146_v24 = vmul.f32 %v7004_v5, %v9508_v39 }
 0x1d0   :  { %v1173_v2 = vpop.f32.mrf.mxu1 }
 0x1d1   :  { %v1238_v22 = vmax.f32 %v1182_v23, 0.0  ;;  %v1174_v50 = vadd.f32 %v6990_v29, %v1173_v2  ;;  %9509 = vst [vmem:[#allocation25_spill] sm:$0xff] %v7146_v24  ;;  %v9510_v23 = vld [vmem:[#allocation39_spill] sm:$0xff] }
 0x1d2   :  { %v5814_v56 = vpop.f32.mrf.mxu1  ;;  %v7150_v2 = vmul.f32 %v7004_v5, %v9510_v23  ;;  %v7167_v36 = vmul.f32 %v7014_v61, %v9510_v23 }
 0x1d3   :  { %v7054_v47 = vmin.f32 %v1238_v22, 6.0  ;;  %v1236_v32 = vmax.f32 %v1174_v50, 0.0  ;;  %v1185_v18 = vadd.f32 %v5814_v56, %v6990_v29  ;;  %v7154_v22 = vmul.f32 %v7009_v13, %v9504_v46 }
 0x1d4   :  { %v1176_v55 = vpop.f32.mrf.mxu1  ;;  %9511 = vst [vmem:[#allocation69_spill] sm:$0xff] %v7150_v2  ;;  %v7158_v50 = vmul.f32 %v7009_v13, %v9506_v1  ;;  %9515 = vst [vmem:[#allocation17_spill] sm:$0xff] %v7167_v36  ;;  %v7171_v56 = vmul.f32 %v7020_v31, %v9504_v46  ;;  %v6139_v1 = vld [vmem:[#allocation2 + $0x67] sm:$0xff] }
 0x1d5   :  { %1270 = vst [vmem:[#allocation2 + $0x20] sm:$0xff] %v7054_v47  ;;  %v7083_v7 = vmin.f32 %v1236_v32, 6.0  ;;  %v1239_v42 = vmax.f32 %v1185_v18, 0.0  ;;  %v1177_v60 = vadd.f32 %v6990_v29, %v1176_v55  ;;  %9512 = vst [vmem:[#allocation28_spill] sm:$0xff] %v7154_v22  ;;  %v1384_v32 = vmul.f32 %v7025_v40, %v9510_v23  ;;  %v9519_v18 = vld [vmem:[#allocation30_spill] sm:$0xff] }
 0x1d6   :  { %9513 = vst [vmem:[#allocation61_spill] sm:$0xff] %v7158_v50  ;;  %9516 = vst [vmem:[#allocation19_spill] sm:$0xff] %v7171_v56  ;;  %v7185_v55 = vmul.f32 %v6995_v35, %v9519_v18  ;;  %v7207_v35 = vmul.f32 %v7014_v61, %v9481_v52  ;;  %v1577_v39 = vmul.f32 %v6139_v1, %v7029_v45  ;;  %v7228_v45 = vld [vmem:[%s9114_s9 + $0x4] ss:$0 sm:$0xff] }
 0x1d7   :  { %1268 = vst [vmem:[#allocation2 + $0x10] sm:$0xff] %v7083_v7  ;;  %v7107_v4 = vmin.f32 %v1239_v42, 6.0  ;;  %v1237_v44 = vmax.f32 %v1177_v60, 0.0  ;;  %v7195_v42 = vld [vmem:[%s9114_s9 + $0x7] ss:$0 sm:$0xff]  ;;  %v7199_v60 = vmul.f32 %v7009_v13, %v9479_v54  ;;  %v7232_v1 = vmul.f32 %v7009_v13, %v9519_v18 }
 0x1d8   :  { %9520 = vst [vmem:[#allocation40_spill] sm:$0xff] %v7185_v55  ;;  %9526 = vst [vmem:[#allocation43_spill] sm:$0xff] %v7207_v35  ;;  %v7211_v23 = vmul.f32 %v6140_v9, %v7195_v42  ;;  %v1496_v35 = vld [vmem:[#allocation2 + $0x51] sm:$0xff]  ;;  %v7252_v13 = vmul.f32 %v7025_v40, %v9521_v12 }
 0x1d9   :  { %1271 = vst [vmem:[#allocation2 + $0x28] sm:$0xff] %v7107_v4  ;;  %v7134_v19 = vmin.f32 %v1237_v44, 6.0  ;;  %9523 = vst [vmem:[#allocation42_spill] sm:$0xff] %v7199_v60  ;;  %v9524_v44 = vld [vmem:[#allocation32_spill] sm:$0xff]  ;;  %v7219_v60 = vmul.f32 %v7020_v31, %v9484_v17 }
 0x1da   :  { %v7203_v46 = vmul.f32 %v7025_v40, %v9524_v44  ;;  %v7215_v21 = vmul.f32 %v7004_v5, %v9524_v44  ;;  %9530 = vst [vmem:[#allocation45_spill] sm:$0xff] %v7232_v1  ;;  %v7236_v5 = vmul.f32 %v7014_v61, %v9521_v12  ;;  %v7240_v17 = vmul.f32 %v7014_v61, %v9524_v44 }
 0x1db   :  { %1269 = vst [vmem:[#allocation2 + $0x18] sm:$0xff] %v7134_v19  ;;  %9528 = vst [vmem:[#allocation44_spill] sm:$0xff] %v7219_v60  ;;  %v7256_v60 = vmul.f32 %v7025_v40, %v9481_v52  ;;  %v7261_v44 = vadd.f32 %v7080_v62, %v1393_v15  ;;  %v1418_v52 = vmul.f32 %v7060_v14, %v7054_v47 }
 0x1dc   :  { %9525 = vst [vmem:[#allocation72_spill] sm:$0xff] %v7203_v46  ;;  %9527 = vst [vmem:[#allocation70_spill] sm:$0xff] %v7215_v21  ;;  %v7223_v46 = vmul.f32 %v7025_v40, %v9486_v8  ;;  %v7244_v8 = vmul.f32 %v7020_v31, %v9479_v54  ;;  %v1457_v15 = vmul.f32 %v7228_v45, %v7054_v47 }
 0x1dd   :  { %9531 = vst [vmem:[#allocation56_spill] sm:$0xff] %v7236_v5  ;;  %9532 = vst [vmem:[#allocation46_spill] sm:$0xff] %v7240_v17 }
 0x1de   :  { %9529 = vst [vmem:[#allocation55_spill] sm:$0xff] %v7223_v46  ;;  %9533 = vst [vmem:[#allocation47_spill] sm:$0xff] %v7244_v8  ;;  %v7248_v46 = vmul.f32 %v7020_v31, %v9519_v18  ;;  %v7265_v8 = vmul.f32 %v1384_v32, %v6970_v10  ;;  %v7268_v31 = vadd.f32 %v7080_v62, %v1577_v39  ;;  %v1386_v27 = vld [vmem:[#allocation2 + $0xf] sm:$0xff] }
 0x1df   :  { %9535 = vst [vmem:[#allocation71_spill] sm:$0xff] %v7252_v13  ;;  %9536 = vst [vmem:[#allocation48_spill] sm:$0xff] %v7256_v60  ;;  %v7270_v18 = vmul.f32 %v1496_v35, %v1384_v32 }
 0x1e0   :  { %v5817_v9 = vpop.f32.mrf.mxu1  ;;  %9534 = vst [vmem:[#allocation51_spill] sm:$0xff] %v7248_v46  ;;  %v1389_v5 = vld [vmem:[#allocation2 + $0x27] sm:$0xff]  ;;  %9537 = vst [vmem:[#allocation52_spill] sm:$0xff] %v7261_v44 }
 0x1e1   :  { %v7258_v61 = vld [vmem:[#allocation2 + $0x21] sm:$0xff]  ;;  %v1198_v54 = vadd.f32 %v5817_v9, %v6990_v29  ;;  %9538 = vst [vmem:[#allocation59_spill] sm:$0xff] %v7265_v8  ;;  %9539 = vst [vmem:[#allocation49_spill] sm:$0xff] %v7268_v31  ;;  %v1475_v62 = vmul.f32 %v1389_v5, %v7072_v58  ;;  %v1417_v9 = vmul.f32 %v7060_v14, %v7134_v19 }
 0x1e2   :  { %9540 = vst [vmem:[#allocation57_spill] sm:$0xff] %v7270_v18  ;;  %v1189_v12 = vpop.f32.mrf.mxu1  ;;  %v7272_v13 = vld [vmem:[#allocation2 + $0x17] sm:$0xff]  ;;  %v1388_v40 = vld [vmem:[#allocation2 + $0x1f] sm:$0xff]  ;;  %v1466_v10 = vmul.f32 %v7258_v61, %v7068_v6  ;;  %v1490_v6 = vmul.f32 %v7195_v42, %v7107_v4 }
 0x1e3   :  { %v7276_v60 = vld [vmem:[#allocation2 + $0x19] sm:$0xff]  ;;  %v1242_v39 = vmax.f32 %v1198_v54, 0.0  ;;  %v1190_v32 = vadd.f32 %v6990_v29, %v1189_v12  ;;  %v1395_v35 = vmul.f32 %v7272_v13, %v7088_v37  ;;  %v1442_v44 = vmul.f32 %v1388_v40, %v7100_v16 }
 0x1e4   :  { %v5818_v31 = vpop.f32.mrf.mxu1  ;;  %v1433_v8 = vmul.f32 %v7276_v60, %v7096_v49  ;;  %v1489_v54 = vmul.f32 %v7195_v42, %v7054_v47  ;;  %v1523_v1 = vadd.f32 %v1466_v10, %v1457_v15  ;;  %v1531_v21 = vadd.f32 %v1490_v6, %v1475_v62  ;;  %v1424_v6 = vld [vmem:[#allocation2 + $0x11] sm:$0xff] }
 0x1e5   :  { %v1258_v58 = vmin.f32 %v1242_v39, 6.0  ;;  %v1240_v12 = vmax.f32 %v1190_v32, 0.0  ;;  %v1201_v46 = vadd.f32 %v5818_v31, %v6990_v29  ;;  %v1507_v37 = vadd.f32 %v1417_v9, %v1395_v35 }
 0x1e6   :  { %v1192_v18 = vpop.f32.mrf.mxu1  ;;  %v1515_v17 = vadd.f32 %v1442_v44, %v1433_v8  ;;  %v1416_v49 = vmul.f32 %v7060_v14, %v7083_v7  ;;  %v1396_v47 = vmul.f32 %v1388_v40, %v7092_v33  ;;  %v1419_v39 = vmul.f32 %v7060_v14, %v7107_v4 }
 0x1e7   :  { %1274 = vst [vmem:[#allocation2 + $0x40] sm:$0xff] %v1258_v58  ;;  %v1256_v16 = vmin.f32 %v1240_v12, 6.0  ;;  %v1243_v48 = vmax.f32 %v1201_v46, 0.0  ;;  %v1193_v55 = vadd.f32 %v6990_v29, %v1192_v18  ;;  %v7304_v31 = vmul.f32 %v7228_v45, %v7107_v4 }
 0x1e8   :  { %v1539_v8 = vadd.f32 %v1515_v17, %v1507_v37  ;;  %v1455_v44 = vmul.f32 %v7228_v45, %v7083_v7  ;;  %v1394_v46 = vmul.f32 %v1386_v27, %v7033_v43  ;;  %v1456_v18 = vmul.f32 %v7228_v45, %v7134_v19  ;;  %v1423_v17 = vld [vmem:[#allocation2 + $0x9] sm:$0xff] }
 0x1e9   :  { %1272 = vst [vmem:[#allocation2 + $0x30] sm:$0xff] %v1256_v16  ;;  %v1259_v15 = vmin.f32 %v1243_v48, 6.0  ;;  %v1241_v10 = vmax.f32 %v1193_v55, 0.0  ;;  %v1397_v62 = vmul.f32 %v1389_v5, %v7037_v11  ;;  %v1434_v32 = vmul.f32 %v7258_v61, %v7041_v59 }
 0x1ea   :  { %v1443_v4 = vmul.f32 %v1389_v5, %v7064_v53  ;;  %v1547_v37 = vadd.f32 %v1531_v21, %v1523_v1  ;;  %v1508_v7 = vadd.f32 %v1418_v52, %v1396_v47  ;;  %v1464_v48 = vmul.f32 %v1424_v6, %v7115_v51 }
 0x1eb   :  { %1275 = vst [vmem:[#allocation2 + $0x48] sm:$0xff] %v1259_v15  ;;  %v1257_v35 = vmin.f32 %v1241_v10, 6.0  ;;  %v1488_v55 = vmul.f32 %v7195_v42, %v7134_v19  ;;  %v1465_v12 = vmul.f32 %v7276_v60, %v7119_v20  ;;  %v1473_v59 = vmul.f32 %v7272_v13, %v7123_v28 }
 0x1ec   :  { %v7318_v9 = vadd.f32 %v1547_v37, %v1539_v8  ;;  %v1474_v5 = vmul.f32 %v1388_v40, %v7127_v30  ;;  %v7326_v21 = vmul.f32 %v1423_v17, %v7045_v26  ;;  %v7329_v1 = vmul.f32 %v1386_v27, %v7049_v3 }
 0x1ed   :  { %1273 = vst [vmem:[#allocation2 + $0x38] sm:$0xff] %v1257_v35  ;;  %v7333_v19 = vmul.f32 %v7258_v61, %v7076_v38  ;;  %v7335_v52 = vadd.f32 %v1416_v49, %v1394_v46  ;;  %v7337_v47 = vadd.f32 %v1419_v39, %v1397_v62  ;;  %v1516_v8 = vadd.f32 %v1443_v4, %v1434_v32 }
 0x1ee   :  { %v1521_v10 = vadd.f32 %v1464_v48, %v1455_v44  ;;  %v1522_v37 = vadd.f32 %v1465_v12, %v1456_v18  ;;  %v1422_v40 = vmul.f32 %v7060_v14, %v1258_v58  ;;  %v1461_v30 = vmul.f32 %v7228_v45, %v1258_v58 }
 0x1ef   :  { %9541 = vst [vmem:[#allocation9_spill] sm:$0xff] %v7333_v19  ;;  %v1529_v17 = vadd.f32 %v1488_v55, %v1473_v59  ;;  %v1530_v20 = vadd.f32 %v1489_v54, %v1474_v5  ;;  %v7342_v27 = vmul.f32 %v7060_v14, %v1256_v16  ;;  %v7345_v28 = vmul.f32 %v7228_v45, %v1256_v16 }
 0x1f0   :  { %v7348_v49 = vmul.f32 %v7195_v42, %v1258_v58  ;;  %v7350_v61 = vadd.f32 %v1516_v8, %v1508_v7  ;;  %v1462_v39 = vmul.f32 %v7228_v45, %v1259_v15  ;;  %v7354_v44 = vmul.f32 %v7195_v42, %v1256_v16  ;;  %v1427_v19 = vld [vmem:[#allocation2 + $0x29] sm:$0xff] }
 0x1f1   :  { %v1432_v46 = vmul.f32 %v1424_v6, %v7104_v34  ;;  %v1441_v59 = vmul.f32 %v7272_v13, %v7111_v0  ;;  %v1421_v54 = vmul.f32 %v7060_v14, %v1257_v35  ;;  %v1494_v58 = vmul.f32 %v7195_v42, %v1259_v15 }
 0x1f2   :  { %9542 = vst [vmem:[#allocation10_spill] sm:$0xff] %v7350_v61  ;;  %v7360_v18 = vld [vmem:[#allocation2 + $0x41] sm:$0xff]  ;;  %v1463_v32 = vld [vmem:[#allocation2 + $0x49] sm:$0xff]  ;;  %v7363_v4 = vadd.f32 %v1529_v17, %v1521_v10  ;;  %v7365_v7 = vadd.f32 %v1530_v20, %v1522_v37  ;;  %v7378_v10 = vmul.f32 %v7228_v45, %v1257_v35  ;;  %v7381_v37 = vmul.f32 %v7195_v42, %v1257_v35 }
 0x1f3   :  { %v1439_v62 = vld [vmem:[#allocation2 + $0x47] sm:$0xff]  ;;  %v1438_v16 = vmul.f32 %v7360_v18, %v7150_v2  ;;  %v1470_v13 = vmul.f32 %v7360_v18, %v7162_v25  ;;  %v1471_v48 = vmul.f32 %v1463_v32, %v7167_v36  ;;  %v1472_v55 = vld [vmem:[#allocation2 + $0x4f] sm:$0xff] }
 0x1f4   :  { %v1447_v6 = vmul.f32 %v1439_v62, %v7158_v50  ;;  %v1391_v12 = vld [vmem:[#allocation2 + $0x37] sm:$0xff]  ;;  %v1392_v5 = vld [vmem:[#allocation2 + $0x3f] sm:$0xff]  ;;  %v1479_v15 = vmul.f32 %v1439_v62, %v7171_v56  ;;  %v1480_v20 = vmul.f32 %v1472_v55, %v7175_v57  ;;  %v5821_v17 = vpop.f32.mrf.mxu1  ;;  %v1390_v2 = vld [vmem:[#allocation2 + $0x2f] sm:$0xff] }
 0x1f5   :  { %v7373_v8 = vld [vmem:[#allocation2 + $0x39] sm:$0xff]  ;;  %v1399_v38 = vmul.f32 %v1391_v12, %v7138_v41  ;;  %v1400_v36 = vmul.f32 %v1392_v5, %v7142_v63  ;;  %v1446_v50 = vmul.f32 %v1392_v5, %v7154_v22  ;;  %v1214_v62 = vadd.f32 %v5821_v17, %v6990_v29 }
 0x1f6   :  { %v1437_v25 = vmul.f32 %v7373_v8, %v7146_v24  ;;  %v1520_v56 = vadd.f32 %v1447_v6, %v1438_v16  ;;  %v1527_v55 = vadd.f32 %v1470_v13, %v1461_v30  ;;  %v1528_v57 = vadd.f32 %v1471_v48, %v1462_v39  ;;  %v1205_v61 = vpop.f32.mrf.mxu1  ;;  %v9543_v16 = vld [vmem:[#allocation40_spill] sm:$0xff] }
 0x1f7   :  { %v1511_v51 = vadd.f32 %v1421_v54, %v1399_v38  ;;  %v1512_v35 = vadd.f32 %v1422_v40, %v1400_v36  ;;  %v1535_v34 = vadd.f32 %v1494_v58, %v1479_v15  ;;  %v1246_v41 = vmax.f32 %v1214_v62, 0.0  ;;  %v7392_v39 = vld [vmem:[#allocation2 + $0x31] sm:$0xff]  ;;  %v9545_v54 = vld [vmem:[#allocation35_spill] sm:$0xff] }
 0x1f8   :  { %v1519_v0 = vadd.f32 %v1446_v50, %v1437_v25  ;;  %v1206_v63 = vadd.f32 %v6990_v29, %v1205_v61  ;;  %v1536_v53 = vadd.f32 %v7211_v23, %v1480_v20  ;;  %v1514_v24 = vadd.f32 %v1441_v59, %v1432_v46  ;;  %v5822_v33 = vpop.f32.mrf.mxu1  ;;  %v9544_v25 = vld [vmem:[#allocation41_spill] sm:$0xff]  ;;  %v9546_v46 = vld [vmem:[#allocation42_spill] sm:$0xff]  ;;  %v9549_v20 = vld [vmem:[#allocation56_spill] sm:$0xff] }
 0x1f9   :  { %v1544_v11 = vadd.f32 %v1520_v56, %v1512_v35  ;;  %v1551_v17 = vadd.f32 %v1535_v34, %v1527_v55  ;;  %v1398_v30 = vmul.f32 %v1390_v2, %v9543_v16  ;;  %v1262_v6 = vmin.f32 %v1246_v41, 6.0  ;;  %v9547_v56 = vld [vmem:[#allocation70_spill] sm:$0xff]  ;;  %v9551_v35 = vld [vmem:[#allocation57_spill] sm:$0xff] }
 0x1fa   :  { %v1543_v22 = vadd.f32 %v1519_v0, %v1511_v51  ;;  %v1244_v38 = vmax.f32 %v1206_v63, 0.0  ;;  %v1217_v50 = vadd.f32 %v5822_v33, %v6990_v29  ;;  %v1435_v36 = vmul.f32 %v1427_v19, %v9544_v25  ;;  %v1208_v40 = vpop.f32.mrf.mxu1  ;;  %v9548_v33 = vld [vmem:[#allocation45_spill] sm:$0xff] }
 0x1fb   :  { %v1503_v61 = vmul.f32 %v1463_v32, %v9545_v54  ;;  %v1552_v58 = vadd.f32 %v1536_v53, %v1528_v57  ;;  %v1444_v59 = vmul.f32 %v1390_v2, %v9546_v46  ;;  %1278 = vst [vmem:[#allocation2 + $0x80] sm:$0xff] %v1262_v6  ;;  %v1209_v51 = vadd.f32 %v6990_v29, %v1208_v40  ;;  %v9550_v57 = vld [vmem:[#allocation46_spill] sm:$0xff]  ;;  %v9555_v54 = vld [vmem:[#allocation44_spill] sm:$0xff] }
 0x1fc   :  { %v1559_v13 = vadd.f32 %v1551_v17, %v1543_v22  ;;  %v1260_v0 = vmin.f32 %v1244_v38, 6.0  ;;  %v1247_v34 = vmax.f32 %v1217_v50, 0.0  ;;  %v1436_v41 = vmul.f32 %v7392_v39, %v9547_v56  ;;  %v9552_v38 = vld [vmem:[#allocation47_spill] sm:$0xff]  ;;  %v9578_v56 = vld [vmem:[#allocation64_spill] sm:$0xff] }
 0x1fd   :  { %v1560_v63 = vadd.f32 %v1552_v58, %v1544_v11  ;;  %v1445_v15 = vmul.f32 %v1391_v12, %v9548_v33  ;;  %v1468_v62 = vmul.f32 %v7392_v39, %v9549_v20  ;;  %v1245_v22 = vmax.f32 %v1209_v51, 0.0  ;;  %v9553_v11 = vld [vmem:[#allocation51_spill] sm:$0xff] }
 0x1fe   :  { %v1567_v48 = vadd.f32 %v1559_v13, %v1503_v61  ;;  %1276 = vst [vmem:[#allocation2 + $0x70] sm:$0xff] %v1260_v0  ;;  %v1263_v53 = vmin.f32 %v1247_v34, 6.0  ;;  %v1469_v32 = vmul.f32 %v7373_v8, %v9550_v57  ;;  %v1513_v55 = vadd.f32 %v7329_v1, %v7326_v21  ;;  %v9554_v34 = vld [vmem:[#allocation43_spill] sm:$0xff] }
 0x1ff   :  { %v1568_v17 = vadd.f32 %v1560_v63, %v9551_v35  ;;  %v1477_v50 = vmul.f32 %v1391_v12, %v9552_v38  ;;  %v1478_v40 = vmul.f32 %v1392_v5, %v9553_v11  ;;  %v1538_v61 = vadd.f32 %v1514_v24, %v7335_v52  ;;  %v9557_v5 = vld [vmem:[#allocation55_spill] sm:$0xff] }
 0x200   :  { %1279 = vst [vmem:[#allocation2 + $0x88] sm:$0xff] %v1263_v53  ;;  %v1261_v58 = vmin.f32 %v1245_v22, 6.0  ;;  %v1510_v13 = vadd.f32 %v7342_v27, %v1398_v30  ;;  %v1467_v51 = vmul.f32 %v1427_v19, %v9554_v34  ;;  %v1476_v20 = vmul.f32 %v1390_v2, %v9555_v54  ;;  %v9558_v24 = vld [vmem:[#allocation23_spill] sm:$0xff]  ;;  %v9559_v22 = vld [vmem:[#allocation52_spill] sm:$0xff] }
 0x201   :  { %v7415_v57 = vpack.c.bf16 %v1568_v17, %v1567_v48  ;;  %v1517_v33 = vadd.f32 %v1444_v59, %v1435_v36  ;;  %v1518_v21 = vadd.f32 %v1445_v15, %v1436_v41  ;;  %v1525_v1 = vadd.f32 %v1468_v62, %v7345_v28  ;;  %v9560_v30 = vld [vmem:[#allocation72_spill] sm:$0xff] }
 0x202   :  { %1277 = vst [vmem:[#allocation2 + $0x78] sm:$0xff] %v1261_v58  ;;  %v1526_v12 = vadd.f32 %v1469_v32, %v7378_v10  ;;  %v1499_v63 = vmul.f32 %v1427_v19, %v9557_v5  ;;  %v1497_v52 = vmul.f32 %v7276_v60, %v9558_v24  ;;  %v1537_v27 = vadd.f32 %v1513_v55, %v9559_v22  ;;  %v9572_v5 = vld [vmem:[#allocation65_spill] sm:$0xff] }
 0x203   :  { %9556 = vst [vmem:[#allocation29_spill] sm:$0xff] %v7415_v57  ;;  %v7425_v35 = vmul.f32 %v7360_v18, %v9560_v30  ;;  %v1533_v2 = vadd.f32 %v7381_v37, %v1477_v50  ;;  %v1534_v36 = vadd.f32 %v7348_v49, %v1478_v40  ;;  %v1542_v59 = vadd.f32 %v1518_v21, %v1510_v13  ;;  %v9570_v57 = vld [vmem:[#allocation50_spill] sm:$0xff] }
 0x204   :  { %v7430_v28 = vmul.f32 %v7060_v14, %v1262_v6  ;;  %v1629_v10 = vmul.f32 %v7228_v45, %v1262_v6  ;;  %v1524_v19 = vadd.f32 %v1467_v51, %v7304_v31  ;;  %v1532_v60 = vadd.f32 %v7354_v44, %v1476_v20 }
 0x205   :  { %v1541_v41 = vadd.f32 %v1517_v33, %v7337_v47  ;;  %v1549_v48 = vadd.f32 %v1533_v2, %v1525_v1  ;;  %v1550_v15 = vadd.f32 %v1534_v36, %v1526_v12  ;;  %v1554_v18 = vadd.f32 %v7365_v7, %v1538_v61  ;;  %v1570_v44 = vld [vmem:[#allocation2 + $0x6f] sm:$0xff]  ;;  %v9562_v33 = vld [vmem:[#allocation71_spill] sm:$0xff] }
 0x206   :  { %v1594_v37 = vmul.f32 %v7060_v14, %v1260_v0  ;;  %v7439_v49 = vmul.f32 %v7228_v45, %v1260_v0  ;;  %v7442_v62 = vmul.f32 %v7195_v42, %v1262_v6  ;;  %v7444_v32 = vadd.f32 %v1532_v60, %v1524_v19  ;;  %v1601_v47 = vld [vmem:[#allocation2 + $0x69] sm:$0xff] }
 0x207   :  { %v1597_v31 = vmul.f32 %v7060_v14, %v1263_v53  ;;  %v7447_v55 = vld [vmem:[#allocation2 + $0x81] sm:$0xff]  ;;  %v7451_v20 = vmul.f32 %v7373_v8, %v9562_v33  ;;  %v7453_v7 = vadd.f32 %v1549_v48, %v1541_v41  ;;  %v7455_v17 = vadd.f32 %v1550_v15, %v1542_v59  ;;  %v9565_v2 = vld [vmem:[#allocation48_spill] sm:$0xff]  ;;  %v9575_v33 = vld [vmem:[#allocation53_spill] sm:$0xff] }
 0x208   :  { %9561 = vst [vmem:[#allocation13_spill] sm:$0xff] %v7447_v55  ;;  %v5825_v0 = vpop.f32.mrf.mxu1  ;;  %v1573_v50 = vld [vmem:[#allocation2 + $0x87] sm:$0xff]  ;;  %v1595_v6 = vmul.f32 %v7060_v14, %v1261_v58  ;;  %v7459_v40 = vmul.f32 %v7228_v45, %v1263_v53  ;;  %v1656_v61 = vmul.f32 %v7195_v42, %v1263_v53  ;;  %v1553_v13 = vadd.f32 %v7363_v4, %v1537_v27 }
 0x209   :  { %v1230_v51 = vadd.f32 %v5825_v0, %v6990_v29  ;;  %v1571_v21 = vld [vmem:[#allocation2 + $0x77] sm:$0xff]  ;;  %v1572_v8 = vld [vmem:[#allocation2 + $0x7f] sm:$0xff]  ;;  %v7467_v12 = vmul.f32 %v7228_v45, %v1261_v58  ;;  %v1654_v22 = vmul.f32 %v7195_v42, %v1261_v58  ;;  %v7472_v36 = vmul.f32 %v7392_v39, %v9565_v2  ;;  %v9567_v19 = vld [vmem:[#allocation68_spill] sm:$0xff] }
 0x20a   :  { %9563 = vst [vmem:[#allocation11_spill] sm:$0xff] %v7459_v40  ;;  %v7464_v1 = vld [vmem:[#allocation2 + $0x79] sm:$0xff]  ;;  %v1221_v59 = vpop.f32.mrf.mxu1  ;;  %v1638_v53 = vmul.f32 %v7447_v55, %v9567_v19  ;;  %v1578_v4 = vmul.f32 %v1570_v44, %v7033_v43  ;;  %v1609_v27 = vmul.f32 %v1601_v47, %v7045_v26  ;;  %v7479_v60 = vadd.f32 %v7318_v9, %v1499_v63  ;;  %v9569_v15 = vld [vmem:[#allocation63_spill] sm:$0xff]  ;;  %v9571_v2 = vld [vmem:[#allocation20_spill] sm:$0xff] }
 0x20b   :  { %9564 = vst [vmem:[#allocation27_spill] sm:$0xff] %v7464_v1  ;;  %9566 = vst [vmem:[#allocation12_spill] sm:$0xff] %v7472_v36  ;;  %v1250_v41 = vmax.f32 %v1230_v51, 0.0  ;;  %v1222_v48 = vadd.f32 %v6990_v29, %v1221_v59  ;;  %v1647_v58 = vmul.f32 %v1573_v50, %v9569_v15  ;;  %v1618_v0 = vmul.f32 %v1570_v44, %v7049_v3  ;;  %v9573_v63 = vld [vmem:[#allocation67_spill] sm:$0xff]  ;;  %v9576_v44 = vld [vmem:[#allocation62_spill] sm:$0xff] }
 0x20c   :  { %9568 = vst [vmem:[#allocation26_spill] sm:$0xff] %v7479_v60  ;;  %v5826_v39 = vpop.f32.mrf.mxu1  ;;  %v1579_v24 = vmul.f32 %v1571_v21, %v9570_v57  ;;  %v1611_v19 = vmul.f32 %v7464_v1, %v9571_v2  ;;  %v1620_v43 = vmul.f32 %v1572_v8, %v9572_v5  ;;  %v1561_v36 = vadd.f32 %v1553_v13, %v1497_v52  ;;  %v9574_v60 = vld [vmem:[#allocation54_spill] sm:$0xff]  ;;  %v1602_v40 = vld [vmem:[#allocation2 + $0x71] sm:$0xff] }
 0x20d   :  { %v1266_v26 = vmin.f32 %v1250_v41, 6.0  ;;  %v1248_v47 = vmax.f32 %v1222_v48, 0.0  ;;  %v1233_v9 = vadd.f32 %v5826_v39, %v6990_v29  ;;  %v1581_v51 = vmul.f32 %v1573_v50, %v9573_v63  ;;  %v9577_v63 = vld [vmem:[#allocation9_spill] sm:$0xff] }
 0x20e   :  { %v1224_v59 = vpop.f32.mrf.mxu1  ;;  %v1580_v15 = vmul.f32 %v1572_v8, %v9574_v60  ;;  %v1612_v3 = vmul.f32 %v7447_v55, %v9575_v33  ;;  %v1621_v57 = vmul.f32 %v1573_v50, %v9576_v44  ;;  %v1689_v30 = vadd.f32 %v1638_v53, %v1629_v10  ;;  %v9579_v55 = vld [vmem:[#allocation66_spill] sm:$0xff] }
 0x20f   :  { %1282 = vst [vmem:[#allocation2 + $0xa0] sm:$0xff] %v1266_v26  ;;  %v1264_v2 = vmin.f32 %v1248_v47, 6.0  ;;  %v1251_v5 = vmax.f32 %v1233_v9, 0.0  ;;  %v1225_v52 = vadd.f32 %v6990_v29, %v1224_v59  ;;  %v1697_v13 = vadd.f32 %v1656_v61, %v1647_v58  ;;  %v9580_v47 = vld [vmem:[#allocation15_spill] sm:$0xff]  ;;  %v9581_v29 = vld [vmem:[#allocation21_spill] sm:$0xff] }
 0x210   :  { %v1673_v41 = vadd.f32 %v1595_v6, %v1579_v24  ;;  %v1681_v48 = vadd.f32 %v1620_v43, %v1611_v19  ;;  %v1672_v39 = vadd.f32 %v1594_v37, %v1578_v4  ;;  %v1562_v11 = vadd.f32 %v1554_v18, %v9577_v63  ;;  %v9582_v4 = vld [vmem:[#allocation16_spill] sm:$0xff] }
 0x211   :  { %1280 = vst [vmem:[#allocation2 + $0x90] sm:$0xff] %v1264_v2  ;;  %v1267_v60 = vmin.f32 %v1251_v5, 6.0  ;;  %v1249_v38 = vmax.f32 %v1225_v52, 0.0  ;;  %v1610_v33 = vmul.f32 %v1602_v40, %v9578_v56  ;;  %v1619_v50 = vmul.f32 %v1571_v21, %v9579_v55 }
 0x212   :  { %v7498_v10 = vadd.f32 %v1597_v31, %v1581_v51  ;;  %v7500_v53 = vadd.f32 %v1621_v57, %v1612_v3  ;;  %v1636_v9 = vmul.f32 %v1602_v40, %v9580_v47  ;;  %v1645_v61 = vmul.f32 %v1571_v21, %v9581_v29  ;;  %v9584_v3 = vld [vmem:[#allocation10_spill] sm:$0xff]  ;;  %v9593_v29 = vld [vmem:[#allocation33_spill] sm:$0xff] }
 0x213   :  { %1283 = vst [vmem:[#allocation2 + $0xa8] sm:$0xff] %v1267_v60  ;;  %v1265_v24 = vmin.f32 %v1249_v38, 6.0  ;;  %v1600_v37 = vmul.f32 %v7060_v14, %v1266_v26  ;;  %v7506_v18 = vadd.f32 %v7430_v28, %v1580_v15  ;;  %v7508_v6 = vadd.f32 %v1697_v13, %v1689_v30  ;;  %v9583_v28 = vld [vmem:[#allocation18_spill] sm:$0xff] }
 0x214   :  { %v1633_v56 = vmul.f32 %v7228_v45, %v1266_v26  ;;  %v7512_v31 = vmul.f32 %v7195_v42, %v1266_v26  ;;  %v7514_v55 = vadd.f32 %v1681_v48, %v1673_v41  ;;  %v1637_v40 = vmul.f32 %v7464_v1, %v9582_v4  ;;  %v9588_v41 = vld [vmem:[#allocation69_spill] sm:$0xff] }
 0x215   :  { %1281 = vst [vmem:[#allocation2 + $0x98] sm:$0xff] %v1265_v24  ;;  %v7519_v38 = vmul.f32 %v7060_v14, %v1264_v2  ;;  %v7522_v21 = vmul.f32 %v7228_v45, %v1264_v2  ;;  %v1646_v30 = vmul.f32 %v1572_v8, %v9583_v28  ;;  %v1680_v58 = vadd.f32 %v1619_v50, %v1610_v33 }
 0x216   :  { %v1634_v19 = vmul.f32 %v7228_v45, %v1267_v60  ;;  %v7527_v43 = vmul.f32 %v7195_v42, %v1264_v2  ;;  %v1687_v26 = vadd.f32 %v1636_v9, %v7439_v49  ;;  %v1695_v51 = vadd.f32 %v1654_v22, %v1645_v61 }
 0x217   :  { %v1660_v59 = vmul.f32 %v7195_v42, %v1267_v60  ;;  %v7531_v15 = vadd.f32 %v1618_v0, %v1609_v27  ;;  %v7535_v44 = vadd.f32 %v7444_v32, %v9584_v3  ;;  %v7537_v57 = vpack.c.bf16 %v1562_v11, %v1561_v36 }
 0x218   :  { %v1599_v8 = vmul.f32 %v7060_v14, %v1265_v24  ;;  %v1574_v5 = vld [vmem:[#allocation2 + $0x8f] sm:$0xff]  ;;  %v1632_v2 = vmul.f32 %v7228_v45, %v1265_v24  ;;  %v1658_v49 = vmul.f32 %v7195_v42, %v1265_v24  ;;  %v1688_v22 = vadd.f32 %v1637_v40, %v7467_v12 }
 0x219   :  { %9585 = vst [vmem:[#allocation14_spill] sm:$0xff] %v7537_v57  ;;  %v7540_v52 = vld [vmem:[#allocation2 + $0x89] sm:$0xff]  ;;  %v1696_v27 = vadd.f32 %v7442_v62, %v1646_v30  ;;  %v7546_v0 = vadd.f32 %v1680_v58, %v1672_v39  ;;  %v7550_v32 = vadd.f32 %v7453_v7, %v7451_v20  ;;  %v7554_v14 = vadd.f32 %v7455_v17, %v7425_v35  ;;  %v9589_v20 = vld [vmem:[#allocation61_spill] sm:$0xff]  ;;  %v9590_v39 = vld [vmem:[#allocation22_spill] sm:$0xff] }
 0x21a   :  { %9586 = vst [vmem:[#allocation58_spill] sm:$0xff] %v7540_v52  ;;  %v1608_v11 = vld [vmem:[#allocation2 + $0xa1] sm:$0xff]  ;;  %v1635_v13 = vld [vmem:[#allocation2 + $0xa9] sm:$0xff]  ;;  %v1582_v45 = vmul.f32 %v1574_v5, %v9543_v16  ;;  %v1613_v42 = vmul.f32 %v7540_v52, %v9544_v25  ;;  %v1622_v62 = vmul.f32 %v1574_v5, %v9546_v46  ;;  %v7560_v12 = vadd.f32 %v1695_v51, %v1687_v26  ;;  %v9591_v35 = vld [vmem:[#allocation17_spill] sm:$0xff] }
 0x21b   :  { %9587 = vst [vmem:[#allocation36_spill] sm:$0xff] %v7546_v0  ;;  %v1617_v36 = vld [vmem:[#allocation2 + $0xa7] sm:$0xff]  ;;  %v1616_v48 = vmul.f32 %v1608_v11, %v9588_v41  ;;  %v1642_v63 = vmul.f32 %v1608_v11, %v9590_v39  ;;  %v1643_v17 = vmul.f32 %v1635_v13, %v9591_v35  ;;  %v1644_v60 = vld [vmem:[#allocation2 + $0xaf] sm:$0xff]  ;;  %v1639_v46 = vmul.f32 %v7540_v52, %v9554_v34  ;;  %v9601_v0 = vld [vmem:[#allocation46_spill] sm:$0xff] }
 0x21c   :  { %v1625_v7 = vmul.f32 %v1617_v36, %v9589_v20  ;;  %v1575_v33 = vld [vmem:[#allocation2 + $0x97] sm:$0xff]  ;;  %v1576_v50 = vld [vmem:[#allocation2 + $0x9f] sm:$0xff]  ;;  %v1652_v25 = vmul.f32 %v1644_v60, %v9593_v29  ;;  %v1648_v61 = vmul.f32 %v1574_v5, %v9555_v54  ;;  %v9594_v24 = vld [vmem:[#allocation60_spill] sm:$0xff] }
 0x21d   :  { %v1607_v47 = vld [vmem:[#allocation2 + $0x99] sm:$0xff]  ;;  %v9592_v16 = vld [vmem:[#allocation19_spill] sm:$0xff]  ;;  %v1583_v4 = vmul.f32 %v1575_v33, %v9594_v24  ;;  %v9595_v40 = vld [vmem:[#allocation24_spill] sm:$0xff]  ;;  %v1693_v20 = vadd.f32 %v1642_v63, %v1633_v56  ;;  %v1694_v39 = vadd.f32 %v1643_v17, %v1634_v19 }
 0x21e   :  { %v1651_v9 = vmul.f32 %v1617_v36, %v9592_v16  ;;  %v1584_v28 = vmul.f32 %v1576_v50, %v9595_v40  ;;  %v9596_v30 = vld [vmem:[#allocation25_spill] sm:$0xff]  ;;  %v9597_v26 = vld [vmem:[#allocation28_spill] sm:$0xff]  ;;  %v1686_v41 = vadd.f32 %v1625_v7, %v1616_v48  ;;  %v1702_v34 = vadd.f32 %v7211_v23, %v1652_v25  ;;  %v9598_v54 = vld [vmem:[#allocation70_spill] sm:$0xff] }
 0x21f   :  { %v1615_v58 = vmul.f32 %v1607_v47, %v9596_v30  ;;  %v1624_v51 = vmul.f32 %v1576_v50, %v9597_v26  ;;  %v1606_v3 = vld [vmem:[#allocation2 + $0x91] sm:$0xff]  ;;  %v1677_v35 = vadd.f32 %v1599_v8, %v1583_v4  ;;  %v1641_v48 = vmul.f32 %v1607_v47, %v9601_v0  ;;  %v9602_v56 = vld [vmem:[#allocation35_spill] sm:$0xff] }
 0x220   :  { %v1701_v36 = vadd.f32 %v1660_v59, %v1651_v9  ;;  %v1678_v60 = vadd.f32 %v1600_v37, %v1584_v28  ;;  %v1614_v5 = vmul.f32 %v1606_v3, %v9598_v54  ;;  %v9599_v24 = vld [vmem:[#allocation45_spill] sm:$0xff]  ;;  %v9600_v40 = vld [vmem:[#allocation56_spill] sm:$0xff]  ;;  %v1718_v26 = vadd.f32 %v1702_v34, %v1694_v39  ;;  %v9603_v59 = vld [vmem:[#allocation47_spill] sm:$0xff] }
 0x221   :  { %v1685_v16 = vadd.f32 %v1624_v51, %v1615_v58  ;;  %v1623_v57 = vmul.f32 %v1575_v33, %v9599_v24  ;;  %v1640_v1 = vmul.f32 %v1606_v3, %v9600_v40  ;;  %v1669_v19 = vmul.f32 %v1635_v13, %v9602_v56  ;;  %v9604_v37 = vld [vmem:[#allocation51_spill] sm:$0xff] }
 0x222   :  { %v1717_v29 = vadd.f32 %v1701_v36, %v1693_v20  ;;  %v1710_v52 = vadd.f32 %v1686_v41, %v1678_v60  ;;  %v1649_v8 = vmul.f32 %v1575_v33, %v9603_v59  ;;  %v1650_v7 = vmul.f32 %v1576_v50, %v9604_v37  ;;  %v9605_v0 = vld [vmem:[#allocation59_spill] sm:$0xff]  ;;  %v9611_v60 = vld [vmem:[#allocation36_spill] sm:$0xff]  ;;  %v9621_v37 = vld [vmem:[#allocation14_spill] sm:$0xff] }
 0x223   :  { %v1709_v30 = vadd.f32 %v1685_v16, %v1677_v35  ;;  %v1676_v23 = vadd.f32 %v7519_v38, %v1582_v45  ;;  %v1683_v9 = vadd.f32 %v1622_v62, %v1613_v42  ;;  %v1684_v25 = vadd.f32 %v1623_v57, %v1614_v5  ;;  %v9606_v38 = vld [vmem:[#allocation11_spill] sm:$0xff]  ;;  %v9607_v42 = vld [vmem:[#allocation72_spill] sm:$0xff] }
 0x224   :  { %v1726_v17 = vadd.f32 %v1718_v26, %v1710_v52  ;;  %v1691_v4 = vadd.f32 %v1640_v1, %v7522_v21  ;;  %v1692_v28 = vadd.f32 %v1641_v48, %v1632_v2  ;;  %v1699_v58 = vadd.f32 %v1658_v49, %v1649_v8  ;;  %v9608_v21 = vld [vmem:[#allocation49_spill] sm:$0xff]  ;;  %v9612_v34 = vld [vmem:[#allocation55_spill] sm:$0xff] }
 0x225   :  { %v1725_v63 = vadd.f32 %v1717_v29, %v1709_v30  ;;  %v1700_v51 = vadd.f32 %v7512_v31, %v1650_v7  ;;  %v1708_v13 = vadd.f32 %v1684_v25, %v1676_v23  ;;  %v1712_v39 = vadd.f32 %v1696_v27, %v1688_v22  ;;  %v9609_v31 = vld [vmem:[#allocation71_spill] sm:$0xff]  ;;  %v9614_v29 = vld [vmem:[#allocation48_spill] sm:$0xff]  ;;  %v9619_v30 = vld [vmem:[#allocation13_spill] sm:$0xff] }
 0x226   :  { %v1734_v20 = vadd.f32 %v1726_v17, %v9605_v0  ;;  %v1707_v33 = vadd.f32 %v1683_v9, %v7498_v10  ;;  %v1715_v50 = vadd.f32 %v1699_v58, %v1691_v4  ;;  %v1690_v45 = vadd.f32 %v1639_v46, %v9606_v38  ;;  %v9610_v46 = vld [vmem:[#allocation12_spill] sm:$0xff]  ;;  %v5894_v23 = vld [vmem:[%s9116_s11 + $0x18] sm:$0xff]   ;;  %v5897_v9 = vld [vmem:[%s9116_s11] sm:$0xff]  }
 0x227   :  { %v1733_v41 = vadd.f32 %v1725_v63, %v1669_v19  ;;  %v1716_v36 = vadd.f32 %v1700_v51, %v1692_v28  ;;  %v1668_v57 = vmul.f32 %v1608_v11, %v9607_v42  ;;  %v1698_v1 = vadd.f32 %v7527_v43, %v1648_v61  ;;  %v5889_v7 = vld [vmem:[%s9476_s26 + $0x8] sm:$0xff]   ;;  %5855 = vmatprep.subr.bf16.mxu1 %v5894_v23  ;;  %v5895_v63 = vld [vmem:[%s9116_s11 + $0x10] sm:$0xff]   ;;  %v5372_v38 = vld [vmem:[%s9115_s10] ss:$0 sm:$0xff] }
 0x228   :  { %v1703_v2 = vadd.f32 %v7531_v15, %v9608_v21  ;;  %v1667_v49 = vmul.f32 %v1607_v47, %v9609_v31  ;;  %v1723_v62 = vadd.f32 %v1715_v50, %v1707_v33  ;;  %v1741_v22 = vpack.c.bf16 %v7554_v14, %v7550_v32  ;;  %v9613_v32 = vld [vmem:[#allocation58_spill] sm:$0xff]  ;;  %5856 = vmatpush3.bf16.msra.mxu1 %v5894_v23  ;;  %v5896_v17 = vld [vmem:[%s9116_s11 + $0x8] sm:$0xff]  }
 0x229   :  { %v1746_v52 = vpack.c.bf16 %v1734_v20, %v1733_v41  ;;  %v1724_v35 = vadd.f32 %v1716_v36, %v1708_v13  ;;  %v1706_v10 = vadd.f32 %v7500_v53, %v7506_v18  ;;  %v1714_v27 = vadd.f32 %v1698_v1, %v1690_v45  ;;  %v9615_v18 = vld [vmem:[#allocation26_spill] sm:$0xff]  ;;  %5857 = vmatprep.subr.bf16.mxu1 %v5895_v63  ;;  %v5903_v28 = vld [vmem:[%s9118_s13 + $0x64] ss:$8 sps:$4 sm:$0xff]  }
 0x22a   :  { %v1721_v11 = vadd.f32 %v7508_v6, %v7514_v55  ;;  %v1564_v43 = vadd.f32 %v7535_v44, %v9610_v46  ;;  %v1731_v15 = vadd.f32 %v1723_v62, %v1667_v49  ;;  %v1719_v47 = vadd.f32 %v7560_v12, %v1703_v2  ;;  %v9616_v6 = vld [vmem:[#allocation23_spill] sm:$0xff]  ;;  %v9618_v44 = vld [vmem:[#allocation34_spill] sm:$0xff] }
 0x22b   :  { %5827 = vmatprep.subr.bf16.mxu0 %v1746_v52  ;;  %v1732_v61 = vadd.f32 %v1724_v35, %v1668_v57  ;;  %v1720_v16 = vadd.f32 %v1712_v39, %v9611_v60  ;;  %v1665_v14 = vmul.f32 %v9613_v32, %v9612_v34  ;;  %v1666_v54 = vmul.f32 %v1606_v3, %v9614_v29  ;;  %v9617_v55 = vld [vmem:[#allocation27_spill] sm:$0xff]  ;;  %v9620_v3 = vld [vmem:[#allocation29_spill] sm:$0xff]  ;;  %v5375_v29 = vld [vmem:[%s9117_s12] ss:$0 sm:$0xff] }
 0x22c   :  { %5828 = vmatpush3.bf16.msra.mxu0 %v1746_v52  ;;  %v1722_v53 = vadd.f32 %v1714_v27, %v1706_v10  ;;  %v1740_v5 = vpack.c.bf16 %v1564_v43, %v9615_v18  ;;  %v1663_v40 = vmul.f32 %v9617_v55, %v9616_v6  ;;  %v1664_v26 = vmul.f32 %v9619_v30, %v9618_v44  ;;  %v5898_v25 = vld [vmem:[%s9118_s13 + $0x70] ss:$8 sps:$4 sm:$0xff]   ;;  %v5900_v4 = vld [vmem:[%s9118_s13 + $0x74] ss:$8 sps:$4 sm:$0xff]   ;;  %v5901_v58 = vld [vmem:[%s9118_s13 + $0x60] ss:$8 sps:$4 sm:$0xff]  }
 0x22d   :  { %v1745_v24 = vpack.c.bf16 %v1732_v61, %v1731_v15  ;;  %v1729_v48 = vadd.f32 %v1721_v11, %v1665_v14  ;;  %5858 = vmatpush3.bf16.msra.mxu1 %v5895_v63  ;;  %v5906_v51 = vld [vmem:[%s9118_s13 + $0x54] ss:$8 sps:$4 sm:$0xff]   ;;  %v5904_v41 = vld [vmem:[%s9118_s13 + $0x50] ss:$8 sps:$4 sm:$0xff]   ;;  %v5909_v0 = vld [vmem:[%s9118_s13 + $0x44] ss:$8 sps:$4 sm:$0xff]  }
 0x22e   :  { %v1730_v56 = vadd.f32 %v1722_v53, %v1666_v54  ;;  %v1727_v12 = vadd.f32 %v1719_v47, %v1663_v40  ;;  %v1728_v19 = vadd.f32 %v1720_v16, %v1664_v26  ;;  %5859 = vmatprep.subr.bf16.mxu1 %v5896_v17  ;;  %v5907_v20 = vld [vmem:[%s9118_s13 + $0x40] ss:$8 sps:$4 sm:$0xff]   ;;  %v5912_v13 = vld [vmem:[%s9118_s13 + $0x34] ss:$8 sps:$4 sm:$0xff]   ;;  %v5910_v39 = vld [vmem:[%s9118_s13 + $0x30] ss:$8 sps:$4 sm:$0xff]  }
 0x22f   :  { %5829 = vmatprep.subr.bf16.mxu0 %v1745_v24  ;;  %v5915_v33 = vld [vmem:[%s9118_s13 + $0x24] ss:$8 sps:$4 sm:$0xff]   ;;  %v5913_v50 = vld [vmem:[%s9118_s13 + $0x20] ss:$8 sps:$4 sm:$0xff]   ;;  %v5916_v15 = vld [vmem:[%s9118_s13 + $0x10] ss:$8 sps:$4 sm:$0xff]  }
 0x230   :  { %5830 = vmatpush3.bf16.msra.mxu0 %v1745_v24  ;;  %v1744_v59 = vpack.c.bf16 %v1730_v56, %v1729_v48  ;;  %v1743_v8 = vpack.c.bf16 %v1728_v19, %v1727_v12  ;;  %v5918_v61 = vld [vmem:[%s9118_s13 + $0x14] ss:$8 sps:$4 sm:$0xff]   ;;  %v5919_v47 = vld [vmem:[%s9118_s13] ss:$8 sps:$4 sm:$0xff]   ;;  %v5921_v60 = vld [vmem:[%s9118_s13 + $0x4] ss:$8 sps:$4 sm:$0xff]  }
 0x231   :  { %5860 = vmatpush3.bf16.msra.mxu1 %v5896_v17  ;;  %v9266_v16 = vmov 0   ;;  %v5922_v40 = vld [vmem:[%s9122_s17 + $0x78] sm:$0xff]   ;;  %v5924_v30 = vld [vmem:[%s9122_s17 + $0x70] sm:$0xff]   ;;  %v5926_v48 = vld [vmem:[%s9122_s17 + $0x68] sm:$0xff]  }
 0x232   :  { %5831 = vmatprep.subr.bf16.mxu0 %v1744_v59  ;;  %5861 = vmatprep.subr.bf16.mxu1 %v5897_v9  ;;  %v5923_v44 = vld [vmem:[%s9122_s17 + $0x38] sm:$0xff]   ;;  %v5925_v26 = vld [vmem:[%s9122_s17 + $0x30] sm:$0xff]   ;;  %v5927_v56 = vld [vmem:[%s9122_s17 + $0x28] sm:$0xff]  }
 0x233   :  { %v5928_v12 = vld [vmem:[%s9122_s17 + $0x60] sm:$0xff]   ;;  %v5935_v23 = vld [vmem:[%s9122_s17 + $0x8] sm:$0xff]  }
 0x234   :  { %5832 = vmatpush3.bf16.msra.mxu0 %v1744_v59  ;;  %v5929_v19 = vld [vmem:[%s9122_s17 + $0x20] sm:$0xff]   ;;  %v5930_v59 = vld [vmem:[%s9122_s17 + $0x58] sm:$0xff]  }
 0x235   :  { %5833 = vmatprep.subr.bf16.mxu0 %v1743_v8  ;;  %5862 = vmatpush3.bf16.msra.mxu1 %v5897_v9  ;;  %v5936_v63 = vld [vmem:[%s9122_s17 + $0x40] sm:$0xff]   ;;  %v9626_v9 = vld [vmem:[#allocation8_spill] sm:$0xff] }
 0x236   :  { %5637 = vmatprep.subr.bf16.mxu1 %v5922_v40  ;;  %v5937_v17 = vld [vmem:[%s9122_s17] sm:$0xff]  }
 0x237   :  { %v2269_v40 = vld [vmem:[#allocation3] sm:$0xf0] }
 0x238   :  { %5834 = vmatpush3.bf16.msra.mxu0 %v1743_v8  ;;  %v5931_v8 = vld [vmem:[%s9122_s17 + $0x18] sm:$0xff]  }
 0x239   :  { %5835 = vmatprep.subr.bf16.mxu0 %v9620_v3 }
 0x23c   :  { %5836 = vmatpush3.bf16.msra.mxu0 %v9620_v3  ;;  %v5932_v3 = vld [vmem:[%s9122_s17 + $0x50] sm:$0xff]  }
 0x23d   :  { %5837 = vmatprep.subr.bf16.mxu0 %v1741_v22 }
 0x240   :  { %5838 = vmatpush3.bf16.msra.mxu0 %v1741_v22 }
 0x241   :  { %5839 = vmatprep.subr.bf16.mxu0 %v1740_v5 }
 0x244   :  { %5840 = vmatpush3.bf16.msra.mxu0 %v1740_v5 }
 0x245   :  { %5841 = vmatprep.subr.bf16.mxu0 %v9621_v37 }
 0x248   :  { %5842 = vmatpush3.bf16.msra.mxu0 %v9621_v37  ;;  %v5933_v37 = vld [vmem:[%s9122_s17 + $0x10] sm:$0xff]  }
 0x249   :  { %2055 = vmatprep.subr.bf16.mxu0 %v5900_v4  ;;  %v9627_v4 = vld [vmem:[#allocation7_spill] sm:$0xff] }
 0x24b   :  { %5844 = vmatmul.mubr.bf16.vlgmr.msra.gmra.mxu0 %v5889_v7  ;;  %v5934_v7 = vld [vmem:[%s9122_s17 + $0x48] sm:$0xff]  }
 0x24c   :  { %2056 = vmatpush1.bf16.msra.mxu0 %v5898_v25  ;;  %2087 = vmatprep.mubr.bf16.mxu0 %v9266_v16  ;;  %v280_v25 = vand.u32 3, %v9626_v9 }
 0x24d   :  { %2057 = vmatprep.subr.bf16.mxu0 %v5903_v28  ;;  %v7750_v28 = vsub.s32 1, %v9627_v4 }
 0x24e   :  { %vm294_vm2 = vcmp.ge.s32.totalorder %v280_v25, 1  ;;  %vm300_vm5 = vcmp.lt.s32.totalorder %v280_v25, 3 }
 0x24f   :  { %9628 = vst [vmem:[#allocation31_spill] sm:$0xff] %v7750_v28 }
 0x250   :  { %2058 = vmatpush1.bf16.msra.mxu0 %v5901_v58  ;;  %v273_v58 = vand.u32 3, %v9627_v4 }
 0x251   :  { %2059 = vmatprep.subr.bf16.mxu0 %v5906_v51  ;;  %v7754_v51 = vsub.s32 0, %v9627_v4 }
 0x252   :  { %vm293_vm3 = vcmp.ge.s32.totalorder %v273_v58, 1  ;;  %vm299_vm4 = vcmp.lt.s32.totalorder %v273_v58, 3 }
 0x253   :  { %9629 = vst [vmem:[#allocation32_spill] sm:$0xff] %v7754_v51 }
 0x254   :  { %2060 = vmatpush1.bf16.msra.mxu0 %v5904_v41  ;;  %v1963_v41 = vld [vmem:[%s9119_s14] sm:$0x3]  ;;  %s6166_s14 = smov [#allocation4]  }
 0x255   :  { %2061 = vmatprep.subr.bf16.mxu0 %v5909_v0  ;;  %v2132_v0 = vld [vmem:[%s9120_s15] sm:$0x3]  ;;  %s5281_s27 = sshll.u32 %s6166_s14, 4  ;;  %s5282_s27 = int_to_ptr.vmem [resolvable:$true] %s5281_s27 }
 0x256   :  { %p6147_p1 = scmp.lt.s32.totalorder %s5282_s27, %s5282_s27 }
 0x258   :  { %2062 = vmatpush1.bf16.msra.mxu0 %v5907_v20  ;;  %v2141_v20 = vrot.slane %v2132_v0, %v7750_v28 }
 0x259   :  { %2063 = vmatprep.subr.bf16.mxu0 %v5912_v13  ;;  %v5401_v13 = vld [vmem:[%s9120_s15 + $0x4] sm:$0x3] }
 0x25c   :  { %2064 = vmatpush1.bf16.msra.mxu0 %v5910_v39  ;;  %v6141_v39 = vld [vmem:[#allocation2] sm:$0xff] }
 0x25d   :  { %2065 = vmatprep.subr.bf16.mxu0 %v5915_v33  ;;  %v7766_v33 = vsel %vm294_vm2, 1.0, %v6141_v39 }
 0x260   :  { %2066 = vmatpush1.bf16.msra.mxu0 %v5913_v50  ;;  %v7769_v50 = vrot.slane %v1963_v41, %v7754_v51 }
 0x261   :  { %2067 = vmatprep.subr.bf16.mxu0 %v5918_v61 }
 0x264   :  { %2068 = vmatpush1.bf16.msra.mxu0 %v5916_v15 }
 0x265   :  { %2069 = vmatprep.subr.bf16.mxu0 %v5921_v60 }
 0x268   :  { %2070 = vmatpush1.bf16.msra.mxu0 %v5919_v47 }
 0x30b   :  { %v5845_v36 = vpop.f32.mrf.mxu0 }
 0x30c   :  { %v1809_v42 = vadd.f32 %v5845_v36, %v5372_v38  ;;  %v7772_v36 = vrot.slane %v1963_v41, %v7750_v28  ;;  %v5938_v41 = vld [vmem:[%s9124_s19 + $0x230] ss:$40 sps:$4 sm:$0xff]  }
 0x30d   :  { %v1800_v45 = vpop.f32.mrf.mxu0 }
 0x30e   :  { %v1801_v52 = vadd.f32 %v5372_v38, %v1800_v45  ;;  %v1817_v62 = vmax.f32 %v1809_v42, 0.0  ;;  %v2160_v45 = vrot.slane %v5401_v13, %v7750_v28  ;;  %v7781_v42 = vsel %vm293_vm3, 1.0, %v6141_v39 }
 0x30f   :  { %v5846_v57 = vpop.f32.mrf.mxu0 }
 0x310   :  { %v1812_v1 = vadd.f32 %v5846_v57, %v5372_v38  ;;  %v1815_v2 = vmax.f32 %v1801_v52, 0.0  ;;  %v1821_v11 = vmin.f32 %v1817_v62, 6.0  ;;  %v5402_v52 = vld [vmem:[%s9120_s15 + $0x6] sm:$0x3]  ;;  %v7784_v57 = vrot.slane %v5401_v13, %v7754_v51 }
 0x311   :  { %v1803_v21 = vpop.f32.mrf.mxu0  ;;  %v2147_v62 = vmul.f32 %v7766_v33, %v2141_v20  ;;  %v7812_v15 = vrot.slane %v5402_v52, %v7754_v51 }
 0x312   :  { %v1818_v31 = vmax.f32 %v1812_v1, 0.0  ;;  %v1804_v49 = vadd.f32 %v5372_v38, %v1803_v21  ;;  %v1819_v10 = vmin.f32 %v1815_v2, 6.0  ;;  %v5400_v38 = vld [vmem:[%s9120_s15 + $0x2] sm:$0x3]  ;;  %v2177_v1 = vrot.slane %v5402_v52, %v7750_v28  ;;  %v5404_v21 = vld [vmem:[%s9120_s15 + $0xa] sm:$0x3] }
 0x313   :  { %v7790_v2 = vsel %vm299_vm4, 1.0, %v6141_v39  ;;  %v7815_v61 = vrot.slane %v5404_v21, %v7754_v51  ;;  %v7818_v47 = vrot.slane %v5400_v38, %v7750_v28  ;;  %v5946_v52 = vld [vmem:[%s9124_s19 + $0x1e4] ss:$40 sps:$4 sm:$0xff]  }
 0x314   :  { %v1816_v35 = vmax.f32 %v1804_v49, 0.0  ;;  %v1822_v22 = vmin.f32 %v1818_v31, 6.0  ;;  %v7792_v31 = vsel %vm300_vm5, 1.0, %v6141_v39  ;;  %v2145_v49 = vmul.f32 %v7781_v42, %v2141_v20 }
 0x315   :  { %v7822_v60 = vmul.f32 %v7790_v2, %v7784_v57  ;;  %v7860_v9 = vmul.f32 %v7818_v47, %v2269_v40  ;;  %v2165_v4 = vmul.f32 %v7792_v31, %v7784_v57 }
 0x316   :  { %v1820_v27 = vmin.f32 %v1816_v35, 6.0  ;;  %v1824_v43 = vpack.c.bf16 %v1822_v22, %v1821_v11  ;;  %v5405_v35 = vld [vmem:[%s9120_s15 + $0xc] sm:$0x3]  ;;  %v5407_v22 = vld [vmem:[%s9120_s15 + $0x10] sm:$0x3] }
 0x317   :  { %v2213_v11 = vrot.slane %v5405_v35, %v7750_v28 }
 0x318   :  { %v1823_v46 = vpack.c.bf16 %v1820_v27, %v1819_v10  ;;  %v7803_v10 = vrot.slane %v2132_v0, %v7754_v51  ;;  %v2196_v27 = vrot.slane %v5404_v21, %v7750_v28  ;;  %v5940_v0 = vld [vmem:[%s9124_s19 + $0x234] ss:$40 sps:$4 sm:$0xff]  }
 0x319   :  { %3775 = vmatprep.subr.bf16.mxu0 %v5940_v0 }
 0x31a   :  { %5863 = vmatprep.mubr.bf16.mxu1 %v1823_v46  ;;  %v7808_v46 = vrot.slane %v5400_v38, %v7754_v51 }
 0x31b   :  { %5864 = vmatmul.mubr.bf16.vlgmr.msra.gmra.mxu1 %v1824_v43  ;;  %v2164_v43 = vmul.f32 %v7790_v2, %v2160_v45 }
 0x31c   :  { %5638 = vmatpush3.bf16.msra.mxu1 %v5923_v44  ;;  %9630 = vst [vmem:[#allocation40_spill] sm:$0xff] %v7808_v46  ;;  %v2200_v44 = vmul.f32 %v7790_v2, %v2196_v27 }
 0x31d   :  { %5639 = vmatprep.subr.bf16.mxu1 %v5924_v30  ;;  %v2202_v30 = vmul.f32 %v7792_v31, %v2196_v27 }
 0x31f   :  { %v7889_v21 = vrot.slane %v2202_v30, 7  ;;  %v5952_v30 = vld [vmem:[%s9124_s19 + $0x194] ss:$40 sps:$4 sm:$0xff]  }
 0x320   :  { %5640 = vmatpush3.bf16.msra.mxu1 %v5925_v26  ;;  %v2217_v26 = vmul.f32 %v7781_v42, %v2213_v11 }
 0x321   :  { %5641 = vmatprep.subr.bf16.mxu1 %v5926_v48  ;;  %v2219_v48 = vmul.f32 %v7766_v33, %v2213_v11  ;;  %v2363_v11 = vld [vmem:[#allocation3 + $0x48] sm:$0x1] }
 0x324   :  { %5642 = vmatpush3.bf16.msra.mxu1 %v5927_v56  ;;  %v5406_v56 = vld [vmem:[%s9120_s15 + $0xe] sm:$0x3] }
 0x325   :  { %5643 = vmatprep.subr.bf16.mxu1 %v5928_v12  ;;  %v2240_v12 = vld [vmem:[#allocation3] sm:$0xf8] }
 0x328   :  { %5644 = vmatpush3.bf16.msra.mxu1 %v5929_v19  ;;  %v2290_v19 = vld [vmem:[#allocation3] sm:$0xe0] }
 0x329   :  { %5645 = vmatprep.subr.bf16.mxu1 %v5930_v59  ;;  %v2180_v59 = vmul.f32 %v7781_v42, %v7812_v15 }
 0x32b   :  { %v7901_v27 = vrot.slane %v2180_v59, 1 }
 0x32c   :  { %5646 = vmatpush3.bf16.msra.mxu1 %v5931_v8  ;;  %v5403_v8 = vld [vmem:[%s9120_s15 + $0x8] sm:$0x3] }
 0x32d   :  { %5647 = vmatprep.subr.bf16.mxu1 %v5932_v3  ;;  %v7848_v3 = vrot.slane %v5405_v35, %v7754_v51  ;;  %v7921_v40 = vrot.slane %v5403_v8, %v7750_v28 }
 0x330   :  { %5648 = vmatpush3.bf16.msra.mxu1 %v5933_v37  ;;  %v7850_v37 = vrot.slane %v2164_v43, 3 }
 0x331   :  { %5649 = vmatprep.subr.bf16.mxu1 %v5934_v7  ;;  %v2317_v7 = vld [vmem:[#allocation3] sm:$0x80] }
 0x334   :  { %5650 = vmatpush3.bf16.msra.mxu1 %v5935_v23  ;;  %v2416_v23 = vld [vmem:[#allocation3 + $0x48] sm:$0xf] }
 0x335   :  { %5651 = vmatprep.subr.bf16.mxu1 %v5936_v63  ;;  %v7853_v63 = vrot.slane %v5406_v56, %v7750_v28 }
 0x337   :  { %9632 = vst [vmem:[#allocation42_spill] sm:$0xff] %v7853_v63  ;;  %v7904_v43 = vmul.f32 %v7853_v63, %v2416_v23  ;;  %v2437_v23 = vld [vmem:[#allocation3 + $0x48] sm:$0x1f] }
 0x338   :  { %5652 = vmatpush3.bf16.msra.mxu1 %v5937_v17 }
 0x339   :  { %9637 = vst [vmem:[#allocation68_spill] sm:$0xff] %v7904_v43 }
 0x3db   :  { %v5865_v34 = vpop.f32.mrf.mxu1 }
 0x3dc   :  { %v7695_v6 = vadd.f32 %v5865_v34, %v5375_v29  ;;  %v2166_v34 = vmul.f32 %v7792_v31, %v2160_v45  ;;  %v5943_v45 = vld [vmem:[%s9124_s19 + $0x23c] ss:$40 sps:$4 sm:$0xff]  }
 0x3dd   :  { %v1930_v32 = vpop.f32.mrf.mxu1  ;;  %3828 = vmatprep.subr.bf16.mxu1 %v5943_v45  ;;  %v2144_v45 = vmul.f32 %v7781_v42, %v7803_v10 }
 0x3de   :  { %v7686_v53 = vadd.f32 %v5375_v29, %v1930_v32  ;;  %9625 = vst [vmem:[#allocation30_spill] sm:$0xff] %v7695_v6  ;;  %v2181_v32 = vmul.f32 %v7781_v42, %v2177_v1  ;;  %v7862_v25 = vrot.slane %v2166_v34, 3  ;;  %v5944_v34 = vld [vmem:[%s9124_s19 + $0x1e0] ss:$40 sps:$4 sm:$0xff]  }
 0x3df   :  { %v5866_v14 = vpop.f32.mrf.mxu1  ;;  %v8001_v57 = vrot.slane %v2144_v45, 5 }
 0x3e0   :  { %9622 = vst [vmem:[#allocation38_spill] sm:$0xff] %v7686_v53  ;;  %v7693_v24 = vadd.f32 %v5866_v14, %v5375_v29  ;;  %v7827_v14 = vrot.slane %v5407_v22, %v7754_v51  ;;  %9633 = vst [vmem:[#allocation57_spill] sm:$0xff] %v7862_v25  ;;  %v7864_v58 = vrot.slane %v2181_v32, 1  ;;  %v7912_v32 = vsel %vm2297_vm7, %v7850_v37, %v7862_v25 }
 0x3e1   :  { %v1933_v54 = vpop.f32.mrf.mxu1 }
 0x3e2   :  { %v7688_v18 = vadd.f32 %v5375_v29, %v1933_v54  ;;  %9624 = vst [vmem:[#allocation39_spill] sm:$0xff] %v7693_v24  ;;  %v1946_v55 = vpack.c.bf16 %v7693_v24, %v7695_v6  ;;  %v2183_v29 = vmul.f32 %v7766_v33, %v2177_v1  ;;  %v2232_v54 = vrot.slane %v5407_v22, %v7750_v28 }
 0x3e3   :  { %v7857_v17 = vmul.f32 %v7790_v2, %v7827_v14  ;;  %v7887_v1 = vrot.slane %v2200_v44, 7  ;;  %v7899_v22 = vmul.f32 %v7850_v37, %v2290_v19  ;;  %v2390_v44 = vld [vmem:[#allocation3 + $0x48] sm:$0x7]  ;;  %v2182_v24 = vmul.f32 %v7766_v33, %v7812_v15  ;;  %v2316_v15 = vld [vmem:[#allocation3 + $0x30] sm:$0x80] }
 0x3e4   :  { %9623 = vst [vmem:[#allocation37_spill] sm:$0xff] %v7688_v18  ;;  %v1945_v5 = vpack.c.bf16 %v7688_v18, %v7686_v53  ;;  %v2236_v20 = vmul.f32 %v7790_v2, %v2232_v54  ;;  %v2238_v13 = vmul.f32 %v7792_v31, %v2232_v54  ;;  %v7879_v38 = vrot.slane %v2183_v29, 1  ;;  %v2268_v18 = vld [vmem:[#allocation3 + $0x30] sm:$0xf0]  ;;  %v2389_v53 = vld [vmem:[#allocation3 + $0x8] sm:$0x7] }
 0x3e5   :  { %9635 = vst [vmem:[#allocation44_spill] sm:$0xff] %v7887_v1  ;;  %v7915_v29 = vmul.f32 %v7864_v58, %v2317_v7  ;;  %v7918_v54 = vrot.slane %v5403_v8, %v7754_v51  ;;  %v7941_v59 = vsel %vm2368_vm9, %v7887_v1, %v7889_v21  ;;  %v7944_v8 = vmul.f32 %v7889_v21, %v2363_v11  ;;  %v5950_v11 = vld [vmem:[%s9124_s19 + $0x190] ss:$40 sps:$4 sm:$0xff]  }
 0x3e6   :  { %2088 = vmatmul.mubr.bf16.vlgmr.msra.gmra.mxu0 %v1945_v5  ;;  %v7831_v5 = vrot.slane %v2145_v49, 5  ;;  %9634 = vst [vmem:[#allocation43_spill] sm:$0xff] %v7879_v38  ;;  %v7891_v49 = vrot.slane %v2217_v26, 5  ;;  %v7929_v26 = vsel %vm2324_vm8, %v7864_v58, %v7879_v38  ;;  %v7936_v19 = vrot.slane %v2238_v13, 3  ;;  %9640 = vst [vmem:[#allocation20_spill] sm:$0xff] %v7941_v59 }
 0x3e7   :  { %2097 = vmatprep.mubr.bf16.mxu0 %v9266_v16  ;;  %3776 = vmatpush1.bf16.msra.mxu0 %v5938_v41  ;;  %9638 = vst [vmem:[#allocation63_spill] sm:$0xff] %v7918_v54  ;;  %9641 = vst [vmem:[#allocation65_spill] sm:$0xff] %v7944_v8  ;;  %v2415_v41 = vld [vmem:[#allocation3 + $0x8] sm:$0xf]  ;;  %v3011_v13 = vld [vmem:[%s9121_s16] sm:$0x3]  ;;  %v2199_v6 = vmul.f32 %v7790_v2, %v7815_v61 }
 0x3e8   :  { %9636 = vst [vmem:[#allocation52_spill] sm:$0xff] %v7891_v49  ;;  %v7896_v35 = vmul.f32 %v7831_v5, %v2240_v12  ;;  %3777 = vmatprep.subr.bf16.mxu0 %v5946_v52  ;;  %v7934_v12 = vrot.slane %v2236_v20, 3  ;;  %v2146_v52 = vmul.f32 %v7766_v33, %v7803_v10  ;;  %v2237_v20 = vmul.f32 %v7792_v31, %v7827_v14  ;;  %v5958_v10 = vld [vmem:[%s9124_s19 + $0x144] ss:$40 sps:$4 sm:$0xff]   ;;  %v2362_v14 = vld [vmem:[#allocation3 + $0x8] sm:$0x1] }
 0x3e9   :  { %v5956_v2 = vld [vmem:[%s9124_s19 + $0x140] ss:$40 sps:$4 sm:$0xff]   ;;  %v2723_v38 = vld [vmem:[#allocation3 + $0x78] sm:$0x1] }
 0x3ea   :  { %9639 = vst [vmem:[#allocation50_spill] sm:$0xff] %v7934_v12  ;;  %v2733_v8 = vld [vmem:[#allocation3 + $0x78] sm:$0x7] }
 0x3eb   :  { %3778 = vmatpush1.bf16.msra.mxu0 %v5944_v34  ;;  %v7977_v34 = vsel %vm2297_vm7, %v7934_v12, %v7936_v19 }
 0x3ec   :  { %3779 = vmatprep.subr.bf16.mxu0 %v5952_v30  ;;  %9643 = vst [vmem:[#allocation54_spill] sm:$0xff] %v7977_v34  ;;  %v7988_v30 = vrot.slane %v3011_v13, %v7754_v51 }
 0x3ee   :  { %2098 = vmatmul.mubr.bf16.gmra.mxu0 %v1946_v55  ;;  %v7833_v55 = vrot.slane %v2147_v62, 5  ;;  %v7893_v62 = vrot.slane %v2219_v48, 5  ;;  %v7932_v48 = vrot.slane %v5406_v56, %v7754_v51  ;;  %v2218_v56 = vmul.f32 %v7766_v33, %v7848_v3  ;;  %9645 = vst [vmem:[#allocation62_spill] sm:$0xff] %v7988_v30  ;;  %v2744_v51 = vld [vmem:[#allocation3 + $0x28] sm:$0xf] }
 0x3ef   :  { %3807 = vmatprep.mubr.bf16.mxu0 %v9266_v16  ;;  %v7980_v16 = vmul.f32 %v7936_v19, %v2437_v23  ;;  %v9647_v23 = vrot.slane %v7904_v43, 1  ;;  %v2216_v33 = vmul.f32 %v7781_v42, %v7848_v3  ;;  %3780 = vmatpush1.bf16.msra.mxu0 %v5950_v11  ;;  %v8015_v42 = vrot.slane %v2237_v20, 3  ;;  %v5964_v3 = vld [vmem:[%s9124_s19 + $0xf4] ss:$40 sps:$4 sm:$0xff]  }
 0x3f0   :  { %9631 = vst [vmem:[#allocation41_spill] sm:$0xff] %v7833_v55  ;;  %v7877_v39 = vsel %vm2249_vm6, %v7831_v5, %v7833_v55  ;;  %v7949_v7 = vsel %vm2249_vm6, %v7891_v49, %v7893_v62  ;;  %v2412_v0 = vmul.f32 %v7893_v62, %v2390_v44  ;;  %v2201_v44 = vmul.f32 %v7792_v31, %v7815_v61 }
 0x3f1   :  { %9642 = vst [vmem:[#allocation67_spill] sm:$0xff] %v7949_v7  ;;  %9644 = vst [vmem:[#allocation53_spill] sm:$0xff] %v7980_v16  ;;  %v7993_v55 = vmul.f32 %v7932_v48, %v2415_v41  ;;  %v8003_v31 = vrot.slane %v2146_v52, 5  ;;  %v8009_v61 = vrot.slane %v3011_v13, %v7750_v28  ;;  %3781 = vmatprep.subr.bf16.mxu0 %v5958_v10  ;;  %v8022_v52 = vrot.slane %v7822_v60, 3  ;;  %v2694_v16 = vld [vmem:[#allocation3 + $0x20] sm:$0xe0] }
 0x3f2   :  { %v7997_v25 = vadd.f32 %v9647_v23, %v2412_v0  ;;  %v8011_v41 = vrot.slane %v2201_v44, 7  ;;  %v8013_v0 = vrot.slane %v2218_v56, 5  ;;  %v8024_v11 = vrot.slane %v2165_v4, 3  ;;  %v2436_v44 = vld [vmem:[#allocation3 + $0x8] sm:$0x1f] }
 0x3f3   :  { %9646 = vst [vmem:[#allocation9_spill] sm:$0xff] %v7993_v55  ;;  %9649 = vst [vmem:[#allocation66_spill] sm:$0xff] %v8003_v31  ;;  %v8026_v13 = vrot.slane %v2182_v24, 1  ;;  %v2239_v23 = vld [vmem:[#allocation3 + $0x30] sm:$0xf8]  ;;  %v8028_v28 = vrot.slane %v2199_v6, 7  ;;  %v8033_v30 = vmul.f32 %v2744_v51, %v7853_v63  ;;  %v8039_v4 = vsel %vm2249_vm6, %v8001_v57, %v8003_v31  ;;  %3782 = vmatpush1.bf16.msra.mxu0 %v5956_v2 }
 0x3f4   :  { %9648 = vst [vmem:[#allocation64_spill] sm:$0xff] %v7997_v25  ;;  %9650 = vst [vmem:[#allocation15_spill] sm:$0xff] %v8009_v61  ;;  %v2289_v56 = vld [vmem:[#allocation3 + $0x30] sm:$0xe0]  ;;  %v2411_v20 = vmul.f32 %v8013_v0, %v2389_v53  ;;  %v8042_v24 = vmul.f32 %v7808_v46, %v2268_v18  ;;  %v8044_v60 = vrot.slane %v2216_v33, 5  ;;  %v8050_v51 = vmul.f32 %v7901_v27, %v2316_v15 }
 0x3f5   :  { %9651 = vst [vmem:[#allocation21_spill] sm:$0xff] %v8024_v11  ;;  %9652 = vst [vmem:[#allocation16_spill] sm:$0xff] %v8026_v13  ;;  %v2734_v6 = vld [vmem:[#allocation3 + $0x28] sm:$0x7]  ;;  %v5962_v53 = vld [vmem:[%s9124_s19 + $0xf0] ss:$40 sps:$4 sm:$0xff]   ;;  %v8053_v45 = vmul.f32 %v8011_v41, %v2362_v14  ;;  %v8059_v18 = vmul.f32 %v8015_v42, %v2436_v44  ;;  %3783 = vmatprep.subr.bf16.mxu0 %v5964_v3  ;;  %v8062_v2 = vmul.f32 %v8001_v57, %v2239_v23 }
 0x3f6   :  { %9653 = vst [vmem:[#allocation18_spill] sm:$0xff] %v8028_v28  ;;  %9654 = vst [vmem:[#allocation10_spill] sm:$0xff] %v8033_v30  ;;  %v8056_v10 = vrot.slane %v7857_v17, 3  ;;  %v2684_v33 = vld [vmem:[#allocation3 + $0x20] sm:$0xf0]  ;;  %v8067_v15 = vsel %vm2297_vm7, %v8022_v52, %v8024_v11  ;;  %v8070_v14 = vmul.f32 %v8022_v52, %v2289_v56  ;;  %v8075_v17 = vsel %vm2324_vm8, %v7901_v27, %v8026_v13 }
 0x3f7   :  { %9655 = vst [vmem:[#allocation69_spill] sm:$0xff] %v8039_v4  ;;  %9656 = vst [vmem:[#allocation61_spill] sm:$0xff] %v8042_v24  ;;  %v2704_v61 = vld [vmem:[#allocation3 + $0x20] sm:$0x80]  ;;  %v8080_v3 = vsel %vm2368_vm9, %v8028_v28, %v8011_v41  ;;  %v9664_v23 = vrot.slane %v7993_v55, 1  ;;  %v2740_v25 = vmul.f32 %v2734_v6, %v7893_v62  ;;  %v8091_v13 = vsel %vm2249_vm6, %v8044_v60, %v8013_v0 }
 0x3f8   :  { %9657 = vst [vmem:[#allocation22_spill] sm:$0xff] %v8044_v60  ;;  %9658 = vst [vmem:[#allocation17_spill] sm:$0xff] %v8059_v18  ;;  %v2672_v44 = vld [vmem:[#allocation3 + $0x20] sm:$0xf8]  ;;  %v8095_v43 = vmul.f32 %v2684_v33, %v7818_v47  ;;  %v8098_v55 = vmul.f32 %v2704_v61, %v7864_v58  ;;  %3784 = vmatpush1.bf16.msra.mxu0 %v5962_v53  ;;  %v8103_v6 = vsel %vm2297_vm7, %v8056_v10, %v8015_v42 }
 0x3f9   :  { %9659 = vst [vmem:[#allocation19_spill] sm:$0xff] %v8062_v2  ;;  %9660 = vst [vmem:[#allocation33_spill] sm:$0xff] %v8067_v15  ;;  %v8084_v2 = vadd.f32 %v9664_v23, %v2411_v20  ;;  %v2724_v20 = vld [vmem:[#allocation3 + $0x28] sm:$0x1]  ;;  %v2683_v33 = vld [vmem:[#allocation3 + $0x40] sm:$0xf0]  ;;  %v8110_v58 = vmul.f32 %v2672_v44, %v7831_v5  ;;  %v8113_v61 = vmul.f32 %v2694_v16, %v7850_v37 }
 0x3fa   :  { %9661 = vst [vmem:[#allocation60_spill] sm:$0xff] %v8070_v14  ;;  %9662 = vst [vmem:[#allocation24_spill] sm:$0xff] %v8075_v17  ;;  %v2743_v14 = vld [vmem:[#allocation3 + $0x78] sm:$0xf]  ;;  %v2754_v23 = vld [vmem:[#allocation3 + $0x28] sm:$0x1f]  ;;  %v8120_v11 = vmul.f32 %v2724_v20, %v7889_v21  ;;  %v8133_v31 = vmul.f32 %v2683_v33, %v7808_v46  ;;  %v8139_v20 = vmul.f32 %v2723_v38, %v8011_v41 }
 0x3fb   :  { %9663 = vst [vmem:[#allocation25_spill] sm:$0xff] %v8080_v3  ;;  %9665 = vst [vmem:[#allocation28_spill] sm:$0xff] %v8091_v13  ;;  %v2703_v53 = vld [vmem:[#allocation3 + $0x40] sm:$0x80]  ;;  %v9674_v5 = vrot.slane %v8033_v30, 1  ;;  %v9684_v30 = vrot.slane %v7860_v9, 1 }
 0x3fc   :  { %9666 = vst [vmem:[#allocation70_spill] sm:$0xff] %v8095_v43  ;;  %9667 = vst [vmem:[#allocation45_spill] sm:$0xff] %v8098_v55  ;;  %v2693_v21 = vld [vmem:[#allocation3 + $0x40] sm:$0xe0] }
 0x3fd   :  { %9668 = vst [vmem:[#allocation56_spill] sm:$0xff] %v8103_v6  ;;  %9669 = vst [vmem:[#allocation46_spill] sm:$0xff] %v8110_v58  ;;  %v8116_v6 = vmul.f32 %v2743_v14, %v7932_v48  ;;  %v8127_v44 = vadd.f32 %v9674_v5, %v2740_v25  ;;  %v2739_v25 = vmul.f32 %v2733_v8, %v8013_v0  ;;  %v2753_v5 = vld [vmem:[#allocation3 + $0x78] sm:$0x1f] }
 0x3fe   :  { %9670 = vst [vmem:[#allocation35_spill] sm:$0xff] %v8113_v61  ;;  %9672 = vst [vmem:[#allocation51_spill] sm:$0xff] %v8120_v11  ;;  %v2671_v61 = vld [vmem:[#allocation3 + $0x40] sm:$0xf8]  ;;  %v8152_v0 = vmul.f32 %v2693_v21, %v8022_v52 }
 0x3ff   :  { %9671 = vst [vmem:[#allocation47_spill] sm:$0xff] %v8116_v6  ;;  %9675 = vst [vmem:[#allocation11_spill] sm:$0xff] %v8127_v44  ;;  %v9302_v58 = vrot.slane %v8116_v6, 1  ;;  %v9686_v44 = vrot.slane %v7915_v29, 2 }
 0x400   :  { %9676 = vst [vmem:[#allocation72_spill] sm:$0xff] %v8133_v31  ;;  %9678 = vst [vmem:[#allocation71_spill] sm:$0xff] %v8139_v20 }
 0x401   :  { %9680 = vst [vmem:[#allocation36_spill] sm:$0xff] %v8152_v0  ;;  %v8165_v52 = vadd.f32 %v9302_v58, %v2739_v25 }
 0x403   :  { %9682 = vst [vmem:[#allocation58_spill] sm:$0xff] %v8165_v52 }
 0x4a6   :  { %v2089_v62 = vpop.f32.mrf.mxu0 }
 0x4a7   :  { %v2090_v24 = vadd.f32 %v2089_v62, %v7769_v50  ;;  %v8123_v62 = vmul.f32 %v2754_v23, %v7936_v19  ;;  %v8136_v19 = vmul.f32 %v2703_v53, %v7901_v27  ;;  %v8148_v53 = vmul.f32 %v2671_v61, %v8001_v57 }
 0x4a8   :  { %v2091_v56 = vpop.f32.mrf.mxu0 }
 0x4a9   :  { %9673 = vst [vmem:[#allocation59_spill] sm:$0xff] %v8123_v62  ;;  %v2108_v16 = vmax.f32 %v2090_v24, 0.0  ;;  %v2092_v37 = vadd.f32 %v2091_v56, %v7772_v36  ;;  %9677 = vst [vmem:[#allocation49_spill] sm:$0xff] %v8136_v19 }
 0x4aa   :  { %v2093_v18 = vpop.f32.mrf.mxu0  ;;  %9679 = vst [vmem:[#allocation12_spill] sm:$0xff] %v8148_v53 }
 0x4ab   :  { %v2116_v24 = vmin.f32 %v2108_v16, 6.0  ;;  %v2109_v56 = vmax.f32 %v2092_v37, 0.0  ;;  %v2094_v23 = vadd.f32 %v2093_v18, %v7769_v50  ;;  %v8155_v16 = vmul.f32 %v2753_v5, %v8015_v42 }
 0x4ac   :  { %v2095_v14 = vpop.f32.mrf.mxu0 }
 0x4ad   :  { %2124 = vst [vmem:[#allocation3 + $0x58] sm:$0xff] %v2116_v24  ;;  %v2117_v38 = vmin.f32 %v2109_v56, 6.0  ;;  %v2110_v8 = vmax.f32 %v2094_v23, 0.0  ;;  %v2096_v41 = vadd.f32 %v2095_v14, %v7772_v36  ;;  %9681 = vst [vmem:[#allocation55_spill] sm:$0xff] %v8155_v16  ;;  %v8174_v23 = vmul.f32 %v8039_v4, %v2116_v24 }
 0x4ae   :  { %v2099_v18 = vpop.f32.mrf.mxu0  ;;  %v8177_v5 = vmul.f32 %v7808_v46, %v2116_v24  ;;  %v8189_v37 = vmul.f32 %v8075_v17, %v2116_v24  ;;  %v8192_v33 = vmul.f32 %v7918_v54, %v2116_v24 }
 0x4af   :  { %2125 = vst [vmem:[#allocation3 + $0x18] sm:$0xff] %v2117_v38  ;;  %v8160_v57 = vmin.f32 %v2110_v8, 6.0  ;;  %v2111_v61 = vmax.f32 %v2096_v41, 0.0  ;;  %v2100_v56 = vadd.f32 %v2099_v18, %v7769_v50  ;;  %v8168_v42 = vmul.f32 %v7818_v47, %v2117_v38 }
 0x4b0   :  { %v2101_v14 = vpop.f32.mrf.mxu0  ;;  %v8171_v21 = vmul.f32 %v7929_v26, %v2117_v38  ;;  %v8182_v18 = vmul.f32 %v8067_v15, %v2116_v24  ;;  %v8185_v58 = vmul.f32 %v7877_v39, %v2117_v38  ;;  %v8196_v16 = vmul.f32 %v7912_v32, %v2117_v38 }
 0x4b1   :  { %2126 = vst [vmem:[#allocation3 + $0x50] sm:$0xff] %v8160_v57  ;;  %v2119_v8 = vmin.f32 %v2111_v61, 6.0  ;;  %v2112_v41 = vmax.f32 %v2100_v56, 0.0  ;;  %v2102_v25 = vadd.f32 %v2101_v14, %v7772_v36  ;;  %v2357_v20 = vmul.f32 %v7921_v40, %v2117_v38 }
 0x4b2   :  { %v2103_v27 = vpop.f32.mrf.mxu0  ;;  %v8203_v0 = vmul.f32 %v7918_v54, %v8160_v57  ;;  %v9683_v15 = vrot.slane %v8168_v42, 1 }
 0x4b3   :  { %2127 = vst [vmem:[#allocation3 + $0x68] sm:$0xff] %v2119_v8  ;;  %v2120_v61 = vmin.f32 %v2112_v41, 6.0  ;;  %v2113_v56 = vmax.f32 %v2102_v25, 0.0  ;;  %v2104_v14 = vadd.f32 %v2103_v27, %v7769_v50  ;;  %v2384_v6 = vmul.f32 %v7941_v59, %v2119_v8 }
 0x4b4   :  { %v2105_v53 = vpop.f32.mrf.mxu0  ;;  %v2431_v27 = vmul.f32 %v7853_v63, %v2119_v8  ;;  %v2360_v25 = vld [vmem:[#allocation3 + $0x58] sm:$0xfe]  ;;  %v2359_v19 = vmul.f32 %v7921_v40, %v2119_v8  ;;  %v2471_v54 = vsel %vm2324_vm8, %v9684_v30, %v9683_v15  ;;  %v2457_v9 = vmul.f32 %v7977_v34, %v2119_v8 }
 0x4b5   :  { %2128 = vst [vmem:[#allocation3 + $0x10] sm:$0xff] %v2120_v61  ;;  %v8205_v24 = vmin.f32 %v2113_v56, 6.0  ;;  %v2114_v41 = vmax.f32 %v2104_v14, 0.0  ;;  %v2106_v50 = vadd.f32 %v2105_v53, %v7772_v36  ;;  %v8217_v61 = vmul.f32 %v8080_v3, %v8160_v57  ;;  %v2387_v56 = vld [vmem:[#allocation3 + $0x58] sm:$0xf8] }
 0x4b6   :  { %v2361_v38 = vld [vmem:[#allocation3 + $0x18] sm:$0xfe]  ;;  %v8221_v36 = vmul.f32 %v8091_v13, %v8160_v57  ;;  %v2410_v30 = vmul.f32 %v7949_v7, %v2119_v8  ;;  %v9685_v3 = vrot.slane %v8171_v21, 2  ;;  %v2527_v52 = vrot.slane %v2384_v6, 1 }
 0x4b7   :  { %v2414_v31 = vld [vmem:[#allocation3 + $0x18] sm:$0xf0]  ;;  %2129 = vst [vmem:[#allocation3 + $0x38] sm:$0xff] %v8205_v24  ;;  %v2122_v53 = vmin.f32 %v2114_v41, 6.0  ;;  %v2115_v14 = vmax.f32 %v2106_v50, 0.0  ;;  %v2382_v17 = vmul.f32 %v7887_v1, %v2361_v38  ;;  %v2483_v50 = vadd.f32 %v2471_v54, %v7896_v35 }
 0x4b8   :  { %v2388_v4 = vld [vmem:[#allocation3 + $0x18] sm:$0xf8]  ;;  %v2429_v15 = vmul.f32 %v7853_v63, %v2414_v31  ;;  %v2500_v13 = vsel %vm2494_vm10, %v9686_v44, %v9685_v3  ;;  %v2551_v11 = vrot.slane %v2431_v27, 1  ;;  %v2243_v43 = vld [vmem:[#allocation3 + $0x50] sm:$0x7]  ;;  %v8239_v29 = vmul.f32 %v8028_v28, %v2360_v25 }
 0x4b9   :  { %v2435_v62 = vld [vmem:[#allocation3 + $0x18] sm:$0xe0]  ;;  %2130 = vst [vmem:[#allocation3 + $0x60] sm:$0xff] %v2122_v53  ;;  %v8233_v41 = vmin.f32 %v2115_v14, 6.0  ;;  %v2526_v38 = vrot.slane %v2382_v17, 1  ;;  %v2408_v8 = vmul.f32 %v7891_v49, %v2388_v4  ;;  %v8242_v3 = vmul.f32 %v8044_v60, %v2387_v56  ;;  %v9688_v44 = vld [vmem:[#allocation65_spill] sm:$0xff] }
 0x4ba   :  { %v2271_v34 = vld [vmem:[#allocation3 + $0x68] sm:$0xf]  ;;  %v2455_v31 = vmul.f32 %v7934_v12, %v2435_v62  ;;  %v2270_v55 = vld [vmem:[#allocation3 + $0x50] sm:$0xf]  ;;  %v2512_v6 = vadd.f32 %v2500_v13, %v7899_v22  ;;  %v9689_v4 = vrot.slane %v9688_v44, 1  ;;  %v2653_v27 = vrot.slane %v2457_v9, 2 }
 0x4bb   :  { %9687 = vst [vmem:[#allocation48_spill] sm:$0xff] %v8233_v41  ;;  %v2291_v63 = vld [vmem:[#allocation3 + $0x50] sm:$0x1f]  ;;  %2131 = vst [vmem:[#allocation3 + $0x70] sm:$0xff] %v8233_v41  ;;  %v2288_v35 = vmul.f32 %v7818_v47, %v2271_v34  ;;  %v2292_v54 = vld [vmem:[#allocation3 + $0x68] sm:$0x1f]  ;;  %v2528_v28 = vsel %vm2324_vm8, %v2526_v38, %v2527_v52  ;;  %v8259_v22 = vmul.f32 %v7808_v46, %v2270_v55 }
 0x4bc   :  { %v2319_v17 = vld [vmem:[#allocation3 + $0x68] sm:$0x7f]  ;;  %v2532_v62 = vsel %vm2324_vm8, %v2527_v52, %v9689_v4  ;;  %v2550_v56 = vrot.slane %v2429_v15, 1  ;;  %v9691_v60 = vld [vmem:[#allocation66_spill] sm:$0xff]  ;;  %v9694_v13 = vld [vmem:[#allocation21_spill] sm:$0xff] }
 0x4bd   :  { %v2244_v53 = vld [vmem:[#allocation3 + $0x68] sm:$0x7]  ;;  %v8253_v12 = vmul.f32 %v9691_v60, %v2243_v43  ;;  %v2474_v7 = vrot.slane %v2288_v35, 1  ;;  %v2314_v44 = vmul.f32 %v9694_v13, %v2291_v63  ;;  %v9695_v9 = vld [vmem:[#allocation57_spill] sm:$0xff]  ;;  %v2538_v43 = vadd.f32 %v2528_v28, %v2357_v20 }
 0x4be   :  { %v9690_v14 = vld [vmem:[#allocation43_spill] sm:$0xff]  ;;  %v9692_v34 = vld [vmem:[#allocation68_spill] sm:$0xff]  ;;  %v2315_v4 = vmul.f32 %v9695_v9, %v2292_v54  ;;  %v9696_v15 = vld [vmem:[#allocation41_spill] sm:$0xff]  ;;  %v2652_v35 = vrot.slane %v2455_v31, 2  ;;  %v2540_v55 = vadd.f32 %v2532_v62, %v2359_v19  ;;  %v9698_v63 = vrot.slane %v8168_v42, 1 }
 0x4bf   :  { %v2342_v25 = vmul.f32 %v9690_v14, %v2319_v17  ;;  %v9693_v49 = vrot.slane %v9692_v34, 1  ;;  %v2552_v17 = vsel %vm2324_vm8, %v2550_v56, %v2551_v11  ;;  %v2267_v38 = vmul.f32 %v9696_v15, %v2244_v53  ;;  %v9699_v20 = vld [vmem:[#allocation64_spill] sm:$0xff]  ;;  %v9701_v31 = vld [vmem:[#allocation53_spill] sm:$0xff] }
 0x4c0   :  { %v2564_v60 = vadd.f32 %v2552_v17, %v2408_v8  ;;  %v9697_v34 = vrot.slane %v8171_v21, 2  ;;  %v2475_v54 = vsel %vm2324_vm8, %v9698_v63, %v2474_v7  ;;  %v9700_v8 = vrot.slane %v9699_v20, 3  ;;  %v2413_v17 = vld [vmem:[#allocation3 + $0x58] sm:$0xf0]  ;;  %v9706_v20 = vld [vmem:[#allocation56_spill] sm:$0xff] }
 0x4c1   :  { %v2556_v59 = vsel %vm2324_vm8, %v2551_v11, %v9693_v49  ;;  %v2503_v1 = vrot.slane %v2342_v25, 2  ;;  %v2578_v11 = vrot.slane %v2512_v6, 2  ;;  %v2487_v53 = vadd.f32 %v2474_v7, %v2267_v38  ;;  %v9703_v7 = vld [vmem:[#allocation16_spill] sm:$0xff] }
 0x4c2   :  { %v2566_v52 = vadd.f32 %v2556_v59, %v2410_v30  ;;  %v2606_v59 = vrot.slane %v2564_v60, 3  ;;  %v2318_v30 = vld [vmem:[#allocation3 + $0x50] sm:$0x7f]  ;;  %v9702_v56 = vrot.slane %v9701_v31, 2  ;;  %v2496_v63 = vrot.slane %v8189_v37, 2 }
 0x4c3   :  { %v2504_v49 = vsel %vm2494_vm10, %v9697_v34, %v2503_v1  ;;  %v2516_v41 = vadd.f32 %v2503_v1, %v2315_v4  ;;  %v2654_v4 = vsel %vm2494_vm10, %v2652_v35, %v2653_v27  ;;  %v9704_v37 = vrot.slane %v8050_v51, 2 }
 0x4c4   :  { %v2607_v46 = vrot.slane %v2566_v52, 3  ;;  %v2514_v25 = vadd.f32 %v2504_v49, %v8196_v16  ;;  %v2658_v1 = vsel %vm2494_vm10, %v2653_v27, %v9702_v56  ;;  %v2485_v16 = vadd.f32 %v2475_v54, %v8185_v58  ;;  %v2434_v52 = vld [vmem:[#allocation3 + $0x58] sm:$0xe0] }
 0x4c5   :  { %v2583_v28 = vrot.slane %v2516_v41, 2  ;;  %v2341_v41 = vmul.f32 %v9703_v7, %v2318_v30  ;;  %v2467_v27 = vrot.slane %v8177_v5, 1  ;;  %v2428_v58 = vmul.f32 %v7932_v48, %v2413_v17 }
 0x4c6   :  { %v2612_v21 = vsel %vm2297_vm7, %v2607_v46, %v9700_v8  ;;  %v2579_v19 = vrot.slane %v2514_v25, 2  ;;  %v2608_v42 = vsel %vm2297_vm7, %v2606_v59, %v2607_v46  ;;  %v8290_v54 = vmul.f32 %v8056_v10, %v2434_v52 }
 0x4c7   :  { %v2620_v62 = vadd.f32 %v2612_v21, %v2540_v55  ;;  %v2596_v60 = vadd.f32 %v2583_v28, %v2487_v53  ;;  %v2618_v6 = vadd.f32 %v2608_v42, %v2538_v43  ;;  %v2430_v43 = vmul.f32 %v7932_v48, %v8160_v57 }
 0x4c8   :  { %v2580_v38 = vsel %vm2494_vm10, %v2578_v11, %v2579_v19  ;;  %v2584_v34 = vsel %vm2494_vm10, %v2579_v19, %v2583_v28  ;;  %v2472_v30 = vrot.slane %v8259_v22, 1  ;;  %v9705_v5 = vmov %v9702_v56  ;;  %v9707_v19 = vld [vmem:[#allocation61_spill] sm:$0xff] }
 0x4c9   :  { %v2629_v49 = vrot.slane %v2620_v62, 5  ;;  %v2592_v25 = vadd.f32 %v2580_v38, %v2483_v50  ;;  %v2594_v46 = vadd.f32 %v2584_v34, %v2485_v16  ;;  %v2626_v55 = vrot.slane %v2618_v6, 5  ;;  %v9709_v16 = vld [vmem:[#allocation60_spill] sm:$0xff] }
 0x4ca   :  { %v2497_v50 = vsel %vm2494_vm10, %v9704_v37, %v2496_v63  ;;  %v2456_v8 = vmul.f32 %v9706_v20, %v8160_v57  ;;  %v2501_v21 = vrot.slane %v2341_v41, 2  ;;  %v9708_v42 = vrot.slane %v9707_v19, 1 }
 0x4cb   :  { %v2642_v35 = vadd.f32 %v2629_v49, %v2596_v60  ;;  %v2630_v11 = vsel %vm2249_vm6, %v2626_v55, %v2629_v49  ;;  %v2638_v59 = vadd.f32 %v2626_v55, %v2592_v25  ;;  %v2511_v60 = vadd.f32 %v2497_v50, %v9709_v16  ;;  %v9710_v49 = vld [vmem:[#allocation19_spill] sm:$0xff] }
 0x4cc   :  { %v2640_v53 = vadd.f32 %v2630_v11, %v2594_v46  ;;  %v2468_v62 = vsel %vm2324_vm8, %v9708_v42, %v2467_v27  ;;  %v2523_v22 = vrot.slane %v8239_v29, 1  ;;  %v2502_v6 = vsel %vm2494_vm10, %v2496_v63, %v2501_v21  ;;  %v9713_v11 = vld [vmem:[#allocation15_spill] sm:$0xff] }
 0x4cd   :  { %v2670_v28 = vadd.f32 %v9705_v5, %v2642_v35  ;;  %v2666_v56 = vadd.f32 %v2654_v4, %v2638_v59  ;;  %v2515_v17 = vadd.f32 %v2501_v21, %v2314_v44  ;;  %v2547_v52 = vrot.slane %v2428_v58, 1  ;;  %v9711_v58 = vld [vmem:[#allocation9_spill] sm:$0xff] }
 0x4ce   :  { %v2668_v51 = vadd.f32 %v2658_v1, %v2640_v53  ;;  %v2473_v38 = vsel %vm2324_vm8, %v2467_v27, %v2472_v30  ;;  %v2513_v57 = vadd.f32 %v2502_v6, %v8182_v18  ;;  %v2524_v4 = vrot.slane %v8217_v61, 1 }
 0x4cf   :  { %v2980_v31 = vrot.slane %v2666_v56, 3  ;;  %v2985_v34 = vrot.slane %v2670_v28, 3  ;;  %v2482_v25 = vadd.f32 %v2468_v62, %v9710_v49  ;;  %v2548_v46 = vrot.slane %v2430_v43, 1  ;;  %v9716_v49 = vld [vmem:[#allocation17_spill] sm:$0xff] }
 0x4d0   :  { %v2981_v41 = vrot.slane %v2668_v51, 3  ;;  %v2525_v55 = vsel %vm2324_vm8, %v2523_v22, %v2524_v4  ;;  %v2575_v29 = vrot.slane %v2511_v60, 2  ;;  %v2576_v1 = vrot.slane %v2513_v57, 2 }
 0x4d1   :  { %v2581_v35 = vrot.slane %v2515_v17, 2  ;;  %v2549_v27 = vsel %vm2324_vm8, %v2547_v52, %v2548_v46  ;;  %v9712_v18 = vrot.slane %v9711_v58, 1  ;;  %v2484_v53 = vadd.f32 %v2473_v38, %v8174_v23  ;;  %v2686_v38 = vld [vmem:[#allocation3 + $0x70] sm:$0xf] }
 0x4d2   :  { %v2982_v44 = vsel %vm2297_vm7, %v2980_v31, %v2981_v41  ;;  %v2986_v63 = vsel %vm2297_vm7, %v2981_v41, %v2985_v34  ;;  %v2563_v43 = vadd.f32 %v2549_v27, %v8242_v3  ;;  %v2486_v5 = vadd.f32 %v2472_v30, %v8253_v12  ;;  %v2676_v30 = vld [vmem:[#allocation3 + $0x70] sm:$0x7]  ;;  %v2732_v27 = vld [vmem:[#allocation3 + $0x38] sm:$0xf8] }
 0x4d3   :  { %v2554_v61 = vsel %vm2324_vm8, %v2548_v46, %v9712_v18  ;;  %v3024_v59 = vadd.f32 %v9713_v11, %v2982_v44  ;;  %v3026_v37 = vadd.f32 %v9713_v11, %v2986_v63  ;;  %v9714_v28 = vrot.slane %v8053_v45, 1  ;;  %v2696_v41 = vld [vmem:[#allocation3 + $0x70] sm:$0x1f]  ;;  %v2720_v63 = vld [vmem:[#allocation3 + $0x38] sm:$0xfe] }
 0x4d4   :  { %v2565_v50 = vadd.f32 %v2554_v61, %v8221_v36  ;;  %v2649_v56 = vrot.slane %v8290_v54, 2  ;;  %v2577_v62 = vsel %vm2494_vm10, %v2575_v29, %v2576_v1  ;;  %v2582_v16 = vsel %vm2494_vm10, %v2576_v1, %v2581_v35  ;;  %v2706_v34 = vld [vmem:[#allocation3 + $0x70] sm:$0x7f] }
 0x4d5   :  { %v2530_v21 = vsel %vm2324_vm8, %v2524_v4, %v9714_v28  ;;  %v3032_v19 = vmax.f32 %v3024_v59, 0.0  ;;  %v3034_v42 = vmax.f32 %v3026_v37, 0.0  ;;  %v2537_v3 = vadd.f32 %v2525_v55, %v8192_v33  ;;  %v9718_v37 = vld [vmem:[#allocation48_spill] sm:$0xff] }
 0x4d6   :  { %v2603_v60 = vrot.slane %v2563_v43, 3  ;;  %v2604_v36 = vrot.slane %v2565_v50, 3  ;;  %v2650_v22 = vrot.slane %v2456_v8, 2  ;;  %v2539_v12 = vadd.f32 %v2530_v21, %v8203_v0  ;;  %v2742_v43 = vld [vmem:[#allocation3 + $0x38] sm:$0xf0] }
 0x4d7   :  { %v3040_v23 = vmin.f32 %v3032_v19, 6.0  ;;  %v3042_v51 = vmin.f32 %v3034_v42, 6.0  ;;  %v2595_v45 = vadd.f32 %v2581_v35, %v2486_v5  ;;  %v2591_v6 = vadd.f32 %v2577_v62, %v2482_v25  ;;  %v2752_v21 = vld [vmem:[#allocation3 + $0x38] sm:$0xe0]  ;;  %v9723_v42 = vld [vmem:[#allocation67_spill] sm:$0xff] }
 0x4d8   :  { %v2593_v17 = vadd.f32 %v2582_v16, %v2484_v53  ;;  %v2605_v54 = vsel %vm2297_vm7, %v2603_v60, %v2604_v36  ;;  %v9715_v52 = vrot.slane %v8084_v2, 3  ;;  %v2651_v8 = vsel %vm2494_vm10, %v2649_v56, %v2650_v22  ;;  %v9719_v53 = vld [vmem:[#allocation44_spill] sm:$0xff] }
 0x4d9   :  { %v3048_v57 = vpack.c.bf16 %v3042_v51, %v3040_v23  ;;  %v2617_v33 = vadd.f32 %v2605_v54, %v2537_v3  ;;  %v9717_v0 = vrot.slane %v9716_v49, 2  ;;  %v8342_v25 = vmul.f32 %v7877_v39, %v8205_v24  ;;  %v9724_v3 = vld [vmem:[#allocation42_spill] sm:$0xff]  ;;  %v9726_v54 = vld [vmem:[#allocation45_spill] sm:$0xff] }
 0x4da   :  { %v2610_v31 = vsel %vm2297_vm7, %v2604_v36, %v9715_v52  ;;  %v8345_v2 = vmul.f32 %v2676_v30, %v9696_v15  ;;  %v2690_v55 = vmul.f32 %v7818_v47, %v8205_v24  ;;  %v8350_v35 = vmul.f32 %v2686_v38, %v7818_v47  ;;  %v9725_v51 = vld [vmem:[#allocation50_spill] sm:$0xff] }
 0x4db   :  { %v2619_v4 = vadd.f32 %v2610_v31, %v2539_v12  ;;  %v2656_v46 = vsel %vm2494_vm10, %v2650_v22, %v9717_v0  ;;  %3218 = vmatprep.mubr.bf16.mxu1 %v3048_v57  ;;  %v2625_v29 = vrot.slane %v2617_v33, 5  ;;  %v2710_v44 = vmul.f32 %v7929_v26, %v8205_v24  ;;  %v9728_v33 = vld [vmem:[#allocation35_spill] sm:$0xff] }
 0x4dc   :  { %v2700_v39 = vmul.f32 %v7912_v32, %v8205_v24  ;;  %v2702_v15 = vmul.f32 %v2696_v41, %v9695_v9  ;;  %v2712_v58 = vmul.f32 %v2706_v34, %v9690_v14  ;;  %v8360_v18 = vmul.f32 %v7921_v40, %v8205_v24  ;;  %v9720_v9 = vld [vmem:[#allocation20_spill] sm:$0xff] }
 0x4dd   :  { %v2627_v1 = vrot.slane %v2619_v4, 5  ;;  %v2637_v47 = vadd.f32 %v2625_v29, %v2591_v6  ;;  %v8365_v26 = vmul.f32 %v7921_v40, %v9718_v37  ;;  %v2726_v32 = vmul.f32 %v2720_v63, %v9719_v53  ;;  %v9721_v14 = vld [vmem:[#allocation52_spill] sm:$0xff]  ;;  %v9731_v63 = vld [vmem:[#allocation70_spill] sm:$0xff] }
 0x4de   :  { %v2728_v5 = vmul.f32 %v9720_v9, %v9718_v37  ;;  %v2736_v28 = vmul.f32 %v2732_v27, %v9721_v14  ;;  %v9722_v56 = vmov %v9717_v0  ;;  %v2738_v62 = vmul.f32 %v9723_v42, %v9718_v37 }
 0x4df   :  { %v2628_v61 = vsel %vm2249_vm6, %v2625_v29, %v2627_v1  ;;  %v2641_v59 = vadd.f32 %v2627_v1, %v2595_v45  ;;  %v2665_v24 = vadd.f32 %v2651_v8, %v2637_v47  ;;  %v2799_v16 = vrot.slane %v2710_v44, 2  ;;  %v9733_v47 = vld [vmem:[#allocation51_spill] sm:$0xff] }
 0x4e0   :  { %v2639_v50 = vadd.f32 %v2628_v61, %v2593_v17  ;;  %v2746_v60 = vmul.f32 %v2742_v43, %v9724_v3  ;;  %v2748_v36 = vmul.f32 %v9724_v3, %v9718_v37  ;;  %v2803_v22 = vrot.slane %v2712_v58, 2  ;;  %v9737_v3 = vld [vmem:[#allocation46_spill] sm:$0xff] }
 0x4e1   :  { %v2669_v19 = vadd.f32 %v9722_v56, %v2641_v59  ;;  %v2977_v23 = vrot.slane %v2665_v24, 3  ;;  %v2756_v12 = vmul.f32 %v2752_v21, %v9725_v51  ;;  %v2771_v45 = vrot.slane %v2690_v55, 1  ;;  %v9729_v55 = vld [vmem:[#allocation62_spill] sm:$0xff] }
 0x4e2   :  { %v2667_v40 = vadd.f32 %v2656_v46, %v2639_v50  ;;  %v2775_v30 = vrot.slane %v8350_v35, 1  ;;  %v9727_v52 = vrot.slane %v9726_v54, 2  ;;  %v2826_v38 = vrot.slane %v2726_v32, 1  ;;  %v9730_v35 = vld [vmem:[#allocation54_spill] sm:$0xff]  ;;  %v2673_v54 = vld [vmem:[#allocation3 + $0x10] sm:$0xff] }
 0x4e3   :  { %v2983_v17 = vrot.slane %v2669_v19, 3  ;;  %v2804_v57 = vsel %vm2494_vm10, %v2799_v16, %v2803_v22  ;;  %v2816_v8 = vadd.f32 %v2803_v22, %v2702_v15  ;;  %v2827_v41 = vrot.slane %v2728_v5, 1  ;;  %v5941_v51 = vld [vmem:[%s9124_s19 + $0x238] ss:$40 sps:$4 sm:$0xff]  }
 0x4e4   :  { %v2978_v6 = vrot.slane %v2667_v40, 3  ;;  %v2800_v31 = vsel %vm2494_vm10, %v9727_v52, %v2799_v16  ;;  %v2814_v0 = vadd.f32 %v2804_v57, %v2700_v39  ;;  %v2850_v46 = vrot.slane %v2746_v60, 1 }
 0x4e5   :  { %v2812_v4 = vadd.f32 %v2800_v31, %v9728_v33  ;;  %v2758_v44 = vmul.f32 %v9730_v35, %v9718_v37  ;;  %v9732_v27 = vrot.slane %v9731_v63, 1  ;;  %v2776_v15 = vsel %vm2324_vm8, %v2771_v45, %v2775_v30  ;;  %v9735_v37 = vld [vmem:[#allocation10_spill] sm:$0xff]  ;;  %v5947_v63 = vld [vmem:[%s9124_s19 + $0x1e8] ss:$40 sps:$4 sm:$0xff]  }
 0x4e6   :  { %v2979_v34 = vsel %vm2297_vm7, %v2977_v23, %v2978_v6  ;;  %v2984_v49 = vsel %vm2297_vm7, %v2978_v6, %v2983_v17  ;;  %v2828_v61 = vsel %vm2324_vm8, %v2826_v38, %v2827_v41  ;;  %v9734_v59 = vrot.slane %v9733_v47, 1  ;;  %v9738_v38 = vld [vmem:[#allocation58_spill] sm:$0xff]  ;;  %v9745_v47 = vld [vmem:[#allocation24_spill] sm:$0xff] }
 0x4e7   :  { %v3023_v29 = vadd.f32 %v9729_v55, %v2979_v34  ;;  %v3025_v1 = vadd.f32 %v9729_v55, %v2984_v49  ;;  %v2772_v58 = vsel %vm2324_vm8, %v9732_v27, %v2771_v45  ;;  %v2851_v43 = vrot.slane %v2748_v36, 1  ;;  %v9739_v49 = vld [vmem:[#allocation11_spill] sm:$0xff] }
 0x4e8   :  { %v2832_v39 = vsel %vm2324_vm8, %v2827_v41, %v9734_v59  ;;  %v2879_v32 = vrot.slane %v2814_v0, 2  ;;  %v2883_v9 = vrot.slane %v2816_v8, 2  ;;  %v9736_v14 = vrot.slane %v9735_v37, 1  ;;  %v2695_v41 = vld [vmem:[#allocation3 + $0x60] sm:$0x1f] }
 0x4e9   :  { %v3031_v50 = vmax.f32 %v3023_v29, 0.0  ;;  %v3033_v53 = vmax.f32 %v3025_v1, 0.0  ;;  %v2852_v5 = vsel %vm2324_vm8, %v2850_v46, %v2851_v43  ;;  %v2878_v24 = vrot.slane %v2812_v4, 2  ;;  %v9741_v46 = vld [vmem:[#allocation59_spill] sm:$0xff]  ;;  %v9743_v1 = vld [vmem:[#allocation40_spill] sm:$0xff] }
 0x4ea   :  { %v2856_v21 = vsel %vm2324_vm8, %v2851_v43, %v9736_v14  ;;  %v2952_v56 = vrot.slane %v2756_v12, 2  ;;  %v2864_v16 = vadd.f32 %v2852_v5, %v2736_v28  ;;  %v2784_v60 = vadd.f32 %v2772_v58, %v9737_v3  ;;  %v5949_v28 = vld [vmem:[%s9124_s19 + $0x1ec] ss:$40 sps:$4 sm:$0xff]  }
 0x4eb   :  { %v3039_v19 = vmin.f32 %v3031_v50, 6.0  ;;  %v3041_v42 = vmin.f32 %v3033_v53, 6.0  ;;  %v2866_v40 = vadd.f32 %v2856_v21, %v2738_v62  ;;  %v2880_v36 = vsel %vm2494_vm10, %v2878_v24, %v2879_v32  ;;  %v2719_v43 = vld [vmem:[#allocation3 + $0x10] sm:$0xfe]  ;;  %v5955_v50 = vld [vmem:[%s9124_s19 + $0x19c] ss:$40 sps:$4 sm:$0xff]  }
 0x4ec   :  { %v2884_v22 = vsel %vm2494_vm10, %v2879_v32, %v2883_v9  ;;  %v2953_v23 = vrot.slane %v2758_v44, 2  ;;  %v2786_v6 = vadd.f32 %v2776_v15, %v8342_v25  ;;  %v2788_v12 = vadd.f32 %v2775_v30, %v8345_v2  ;;  %v2675_v2 = vld [vmem:[#allocation3 + $0x60] sm:$0x7]  ;;  %v9744_v15 = vld [vmem:[#allocation69_spill] sm:$0xff] }
 0x4ed   :  { %v3047_v45 = vpack.c.bf16 %v3041_v42, %v3039_v19  ;;  %v2906_v17 = vrot.slane %v2864_v16, 3  ;;  %v2838_v62 = vadd.f32 %v2828_v61, %v8360_v18  ;;  %v2840_v52 = vadd.f32 %v2832_v39, %v8365_v26  ;;  %v2685_v30 = vld [vmem:[#allocation3 + $0x60] sm:$0xf]  ;;  %v9747_v5 = vld [vmem:[#allocation33_spill] sm:$0xff] }
 0x4ee   :  { %v2907_v31 = vrot.slane %v2866_v40, 3  ;;  %v2909_v57 = vrot.slane %v9738_v38, 3  ;;  %v2892_v33 = vadd.f32 %v2880_v36, %v2784_v60  ;;  %v2894_v4 = vadd.f32 %v2884_v22, %v2786_v6  ;;  %v2705_v44 = vld [vmem:[#allocation3 + $0x60] sm:$0x7f]  ;;  %v2731_v16 = vld [vmem:[#allocation3 + $0x10] sm:$0xf8] }
 0x4ef   :  { %3219 = vmatmul.mubr.bf16.vlgmr.msra.gmra.mxu1 %v3047_v45  ;;  %v2896_v8 = vadd.f32 %v2883_v9, %v2788_v12  ;;  %v2954_v25 = vsel %vm2494_vm10, %v2952_v56, %v2953_v23  ;;  %v9740_v0 = vrot.slane %v9739_v49, 3  ;;  %v9742_v26 = vrot.slane %v9741_v46, 2  ;;  %v2713_v39 = vld [vmem:[#allocation3 + $0x60] sm:$0xff]  ;;  %v2741_v40 = vld [vmem:[#allocation3 + $0x10] sm:$0xf0]  ;;  %v9754_v46 = vld [vmem:[#allocation72_spill] sm:$0xff] }
 0x4f0   :  { %v2908_v34 = vsel %vm2297_vm7, %v2906_v17, %v2907_v31  ;;  %v8426_v35 = vmul.f32 %v2673_v54, %v9743_v1  ;;  %3829 = vmatpush1.bf16.msra.mxu1 %v5941_v51  ;;  %v8432_v61 = vmul.f32 %v2673_v54, %v9744_v15  ;;  %v2709_v59 = vmul.f32 %v2673_v54, %v9745_v47  ;;  %v9746_v53 = vld [vmem:[#allocation66_spill] sm:$0xff]  ;;  %v9748_v19 = vld [vmem:[#allocation63_spill] sm:$0xff]  ;;  %v9750_v22 = vld [vmem:[#allocation25_spill] sm:$0xff] }
 0x4f1   :  { %v2912_v18 = vsel %vm2297_vm7, %v2907_v31, %v9740_v0  ;;  %v2958_v29 = vsel %vm2494_vm10, %v2953_v23, %v9742_v26  ;;  %v2918_v27 = vadd.f32 %v2908_v34, %v2838_v62  ;;  %3830 = vmatprep.subr.bf16.mxu1 %v5949_v28  ;;  %v8439_v32 = vmul.f32 %v2675_v2, %v9746_v53  ;;  %v9749_v60 = vld [vmem:[#allocation18_spill] sm:$0xff]  ;;  %v2751_v51 = vld [vmem:[#allocation3 + $0x10] sm:$0xe0]  ;;  %v9752_v31 = vld [vmem:[#allocation28_spill] sm:$0xff] }
 0x4f2   :  { %v2920_v58 = vadd.f32 %v2912_v18, %v2840_v52  ;;  %v8442_v9 = vmul.f32 %v2685_v30, %v9743_v1  ;;  %v2699_v37 = vmul.f32 %v2673_v54, %v9747_v5  ;;  %v2701_v14 = vmul.f32 %v2695_v41, %v9694_v13  ;;  %v5953_v13 = vld [vmem:[%s9124_s19 + $0x198] ss:$40 sps:$4 sm:$0xff]   ;;  %v9758_v5 = vld [vmem:[#allocation36_spill] sm:$0xff] }
 0x4f3   :  { %v2926_v21 = vrot.slane %v2918_v27, 5  ;;  %v2711_v56 = vmul.f32 %v2705_v44, %v9703_v7  ;;  %v8448_v42 = vmul.f32 %v2673_v54, %v9748_v19  ;;  %v8451_v3 = vmul.f32 %v2713_v39, %v9748_v19  ;;  %v5961_v54 = vld [vmem:[%s9124_s19 + $0x14c] ss:$40 sps:$4 sm:$0xff]   ;;  %v9751_v62 = vld [vmem:[#allocation22_spill] sm:$0xff] }
 0x4f4   :  { %v2929_v24 = vrot.slane %v2920_v58, 5  ;;  %v2725_v36 = vmul.f32 %v2719_v43, %v9749_v60  ;;  %v2727_v23 = vmul.f32 %v2713_v39, %v9750_v22  ;;  %v2768_v45 = vrot.slane %v8426_v35, 1  ;;  %3831 = vmatpush1.bf16.msra.mxu1 %v5947_v63  ;;  %v9756_v44 = vld [vmem:[#allocation49_spill] sm:$0xff] }
 0x4f5   :  { %v2938_v6 = vadd.f32 %v2926_v21, %v2892_v33  ;;  %v2796_v17 = vrot.slane %v2709_v59, 2  ;;  %3832 = vmatprep.subr.bf16.mxu1 %v5955_v50  ;;  %v2735_v52 = vmul.f32 %v2731_v16, %v9751_v62  ;;  %v2737_v2 = vmul.f32 %v2713_v39, %v9752_v31  ;;  %v9759_v16 = vld [vmem:[#allocation47_spill] sm:$0xff] }
 0x4f6   :  { %v2930_v7 = vsel %vm2249_vm6, %v2926_v21, %v2929_v24  ;;  %v2942_v12 = vadd.f32 %v2929_v24, %v2896_v8  ;;  %v2745_v30 = vmul.f32 %v2741_v40, %v7932_v48  ;;  %v9753_v34 = vmov %v9742_v26 }
 0x4f7   :  { %v2940_v28 = vadd.f32 %v2930_v7, %v2894_v4  ;;  %v2966_v41 = vadd.f32 %v2954_v25, %v2938_v6  ;;  %v2747_v33 = vmul.f32 %v2713_v39, %v7932_v48  ;;  %v8470_v8 = vmul.f32 %v2751_v51, %v8056_v10  ;;  %v5959_v25 = vld [vmem:[%s9124_s19 + $0x148] ss:$40 sps:$4 sm:$0xff]  }
 0x4f8   :  { %v2970_v49 = vadd.f32 %v9753_v34, %v2942_v12  ;;  %v8473_v18 = vmul.f32 %v2713_v39, %v9706_v20  ;;  %v2773_v4 = vrot.slane %v8442_v9, 1  ;;  %v2801_v26 = vrot.slane %v2711_v56, 2  ;;  %3833 = vmatpush1.bf16.msra.mxu1 %v5953_v13  ;;  %v5967_v20 = vld [vmem:[%s9124_s19 + $0xfc] ss:$40 sps:$4 sm:$0xff]   ;;  %v5965_v56 = vld [vmem:[%s9124_s19 + $0xf8] ss:$40 sps:$4 sm:$0xff]  }
 0x4f9   :  { %v2968_v0 = vadd.f32 %v2958_v29, %v2940_v28  ;;  %v3000_v1 = vrot.slane %v2966_v41, 3  ;;  %v9755_v35 = vrot.slane %v9754_v46, 1  ;;  %v9757_v10 = vrot.slane %v9756_v44, 2  ;;  %3834 = vmatprep.subr.bf16.mxu1 %v5961_v54 }
 0x4fa   :  { %v2824_v63 = vrot.slane %v2727_v23, 1  ;;  %v3005_v58 = vrot.slane %v2970_v49, 3  ;;  %v2802_v15 = vsel %vm2494_vm10, %v2796_v17, %v2801_v26  ;;  %v2823_v47 = vrot.slane %v2725_v36, 1  ;;  %v9761_v36 = vld [vmem:[#allocation71_spill] sm:$0xff] }
 0x4fb   :  { %v2769_v48 = vsel %vm2324_vm8, %v9755_v35, %v2768_v45  ;;  %v2797_v29 = vsel %vm2494_vm10, %v9757_v10, %v2796_v17  ;;  %v3001_v27 = vrot.slane %v2968_v0, 3  ;;  %v2813_v59 = vadd.f32 %v2802_v15, %v2699_v37 }
 0x4fc   :  { %v2815_v39 = vadd.f32 %v2801_v26, %v2701_v14  ;;  %v2847_v43 = vrot.slane %v2745_v30, 1  ;;  %v2848_v50 = vrot.slane %v2747_v33, 1  ;;  %v2811_v21 = vadd.f32 %v2797_v29, %v9758_v5  ;;  %3835 = vmatpush1.bf16.msra.mxu1 %v5959_v25 }
 0x4fd   :  { %v3002_v53 = vsel %vm2297_vm7, %v3000_v1, %v3001_v27  ;;  %v3006_v9 = vsel %vm2297_vm7, %v3001_v27, %v3005_v58  ;;  %v2825_v24 = vsel %vm2324_vm8, %v2823_v47, %v2824_v63  ;;  %v9760_v40 = vrot.slane %v9759_v16, 1  ;;  %3836 = vmatprep.subr.bf16.mxu1 %v5967_v20  ;;  %v5970_v16 = vld [vmem:[%s9124_s19 + $0xa4] ss:$40 sps:$4 sm:$0xff]  }
 0x4fe   :  { %v3028_v19 = vadd.f32 %v9713_v11, %v3002_v53  ;;  %v3030_v37 = vadd.f32 %v9713_v11, %v3006_v9  ;;  %v2849_v14 = vsel %vm2324_vm8, %v2847_v43, %v2848_v50  ;;  %v9762_v22 = vrot.slane %v9761_v36, 1  ;;  %3785 = vmatprep.subr.bf16.mxu0 %v5970_v16  ;;  %v5976_v36 = vld [vmem:[%s9124_s19 + $0x54] ss:$40 sps:$4 sm:$0xff]  }
 0x4ff   :  { %v2854_v60 = vsel %vm2324_vm8, %v2848_v50, %v9760_v40  ;;  %v2863_v51 = vadd.f32 %v2849_v14, %v2735_v52  ;;  %v2876_v7 = vrot.slane %v2813_v59, 2  ;;  %v2774_v17 = vsel %vm2324_vm8, %v2768_v45, %v2773_v4  ;;  %v9763_v52 = vld [vmem:[#allocation12_spill] sm:$0xff] }
 0x500   :  { %v2830_v23 = vsel %vm2324_vm8, %v2824_v63, %v9762_v22  ;;  %v2865_v13 = vadd.f32 %v2854_v60, %v2737_v2  ;;  %v3036_v6 = vmax.f32 %v3028_v19, 0.0  ;;  %v3038_v12 = vmax.f32 %v3030_v37, 0.0  ;;  %3837 = vmatpush1.bf16.msra.mxu1 %v5965_v56  ;;  %v5968_v14 = vld [vmem:[%s9124_s19 + $0xa0] ss:$40 sps:$4 sm:$0xff]   ;;  %v5973_v40 = vld [vmem:[%s9124_s19 + $0xac] ss:$40 sps:$4 sm:$0xff]  }
 0x501   :  { %v2881_v54 = vrot.slane %v2815_v39, 2  ;;  %v2787_v11 = vadd.f32 %v2773_v4, %v8439_v32  ;;  %v2875_v28 = vrot.slane %v2811_v21, 2  ;;  %v2903_v62 = vrot.slane %v2863_v51, 3  ;;  %3838 = vmatprep.subr.bf16.mxu1 %v5973_v40  ;;  %3786 = vmatpush1.bf16.msra.mxu0 %v5968_v14  ;;  %v5974_v60 = vld [vmem:[%s9124_s19 + $0x50] ss:$40 sps:$4 sm:$0xff]  }
 0x502   :  { %v2904_v31 = vrot.slane %v2865_v13, 3  ;;  %v3044_v30 = vmin.f32 %v3036_v6, 6.0  ;;  %v3046_v41 = vmin.f32 %v3038_v12, 6.0  ;;  %v2837_v34 = vadd.f32 %v2825_v24, %v8448_v42  ;;  %v5977_v22 = vld [vmem:[%s9124_s19 + $0x58] ss:$40 sps:$4 sm:$0xff]   ;;  %3787 = vmatprep.subr.bf16.mxu0 %v5976_v36 }
 0x503   :  { %v2839_v49 = vadd.f32 %v2830_v23, %v8451_v3  ;;  %v2783_v2 = vadd.f32 %v2769_v48, %v9763_v52  ;;  %v2877_v33 = vsel %vm2494_vm10, %v2875_v28, %v2876_v7  ;;  %v2882_v4 = vsel %vm2494_vm10, %v2876_v7, %v2881_v54  ;;  %v9764_v3 = vld [vmem:[#allocation55_spill] sm:$0xff]  ;;  %v5985_v6 = vld [vmem:[%s9124_s19 + $0xc] ss:$40 sps:$4 sm:$0xff]   ;;  %v9766_v52 = vld [vmem:[#allocation38_spill] sm:$0xff] }
 0x504   :  { %v2905_v0 = vsel %vm2297_vm7, %v2903_v62, %v2904_v31  ;;  %v2910_v32 = vsel %vm2297_vm7, %v2904_v31, %v2909_v57  ;;  %v3050_v45 = vpack.c.bf16 %v3046_v41, %v3044_v30  ;;  %v2785_v1 = vadd.f32 %v2774_v17, %v8432_v61  ;;  %v5979_v23 = vld [vmem:[%s9124_s19 + $0x5c] ss:$40 sps:$4 sm:$0xff]   ;;  %v5980_v51 = vld [vmem:[%s9124_s19] ss:$40 sps:$4 sm:$0xff]   ;;  %v5991_v17 = vld [vmem:[%s9124_s19 + $0x24c] ss:$40 sps:$4 sm:$0xff]  }
 0x505   :  { %v2917_v26 = vadd.f32 %v2905_v0, %v2837_v34  ;;  %v2919_v25 = vadd.f32 %v2910_v32, %v2839_v49  ;;  %v2950_v42 = vrot.slane %v8473_v18, 2  ;;  %v2955_v46 = vrot.slane %v9764_v3, 2  ;;  %3788 = vmatpush1.bf16.msra.mxu0 %v5974_v60  ;;  %v5982_v13 = vld [vmem:[%s9124_s19 + $0x4] ss:$40 sps:$4 sm:$0xff]   ;;  %v5983_v7 = vld [vmem:[%s9124_s19 + $0x8] ss:$40 sps:$4 sm:$0xff]  }
 0x506   :  { %3226 = vmatprep.mubr.bf16.mxu1 %v3050_v45  ;;  %v2891_v35 = vadd.f32 %v2877_v33, %v2783_v2  ;;  %v2895_v48 = vadd.f32 %v2881_v54, %v2787_v11  ;;  %v2893_v29 = vadd.f32 %v2882_v4, %v2785_v1  ;;  %v2949_v38 = vrot.slane %v8470_v8, 2  ;;  %3789 = vmatprep.subr.bf16.mxu0 %v5982_v13  ;;  %v5988_v12 = vld [vmem:[%s9124_s19 + $0x244] ss:$40 sps:$4 sm:$0xff]   ;;  %v8573_v62 = vld [vmem:[%s9123_s18] ss:$0 sm:$0xff]  ;;  %v9767_v33 = vld [vmem:[#allocation37_spill] sm:$0xff] }
 0x507   :  { %v2925_v44 = vrot.slane %v2917_v26, 5  ;;  %v2927_v10 = vrot.slane %v2919_v25, 5  ;;  %v2956_v61 = vsel %vm2494_vm10, %v2950_v42, %v2955_v46  ;;  %v9765_v37 = vmov 0   ;;  %v5986_v32 = vld [vmem:[%s9124_s19 + $0x240] ss:$40 sps:$4 sm:$0xff]  }
 0x508   :  { %v2951_v58 = vsel %vm2494_vm10, %v2949_v38, %v2950_v42  ;;  %v5989_v45 = vld [vmem:[%s9124_s19 + $0x248] ss:$40 sps:$4 sm:$0xff]   ;;  %v5994_v26 = vld [vmem:[%s9124_s19 + $0x1f4] ss:$40 sps:$4 sm:$0xff]   ;;  %v5995_v42 = vld [vmem:[%s9124_s19 + $0x1f8] ss:$40 sps:$4 sm:$0xff]  }
 0x509   :  { %v2928_v57 = vsel %vm2249_vm6, %v2925_v44, %v2927_v10  ;;  %v2937_v63 = vadd.f32 %v2925_v44, %v2891_v35  ;;  %v2941_v20 = vadd.f32 %v2927_v10, %v2895_v48  ;;  %3790 = vmatpush1.bf16.msra.mxu0 %v5980_v51  ;;  %v5997_v25 = vld [vmem:[%s9124_s19 + $0x1fc] ss:$40 sps:$4 sm:$0xff]   ;;  %v5992_v1 = vld [vmem:[%s9124_s19 + $0x1f0] ss:$40 sps:$4 sm:$0xff]   ;;  %v5998_v35 = vld [vmem:[%s9124_s19 + $0x1a0] ss:$40 sps:$4 sm:$0xff]  }
 0x50a   :  { %v2939_v27 = vadd.f32 %v2928_v57, %v2893_v29  ;;  %3881 = vmatprep.subr.bf16.mxu0 %v5988_v12  ;;  %v6000_v3 = vld [vmem:[%s9124_s19 + $0x1a4] ss:$40 sps:$4 sm:$0xff]   ;;  %v6001_v48 = vld [vmem:[%s9124_s19 + $0x1a8] ss:$40 sps:$4 sm:$0xff]   ;;  %v6006_v44 = vld [vmem:[%s9124_s19 + $0x154] ss:$40 sps:$4 sm:$0xff]  }
 0x50b   :  { %v2965_v18 = vadd.f32 %v2951_v58, %v2937_v63  ;;  %v2969_v15 = vadd.f32 %v2955_v46, %v2941_v20  ;;  %v6003_v46 = vld [vmem:[%s9124_s19 + $0x1ac] ss:$40 sps:$4 sm:$0xff]   ;;  %v6009_v10 = vld [vmem:[%s9124_s19 + $0x15c] ss:$40 sps:$4 sm:$0xff]   ;;  %v6004_v29 = vld [vmem:[%s9124_s19 + $0x150] ss:$40 sps:$4 sm:$0xff]  }
 0x50c   :  { %v2967_v47 = vadd.f32 %v2956_v61, %v2939_v27  ;;  %v6007_v38 = vld [vmem:[%s9124_s19 + $0x158] ss:$40 sps:$4 sm:$0xff]   ;;  %v6012_v57 = vld [vmem:[%s9124_s19 + $0x104] ss:$40 sps:$4 sm:$0xff]   ;;  %v6013_v27 = vld [vmem:[%s9124_s19 + $0x108] ss:$40 sps:$4 sm:$0xff]  }
 0x50d   :  { %v2997_v59 = vrot.slane %v2965_v18, 3  ;;  %v3003_v39 = vrot.slane %v2969_v15, 3  ;;  %v6015_v63 = vld [vmem:[%s9124_s19 + $0x10c] ss:$40 sps:$4 sm:$0xff]   ;;  %v6010_v20 = vld [vmem:[%s9124_s19 + $0x100] ss:$40 sps:$4 sm:$0xff]  }
 0x50e   :  { %v2998_v43 = vrot.slane %v2967_v47, 3  ;;  %v6018_v58 = vld [vmem:[%s9124_s19 + $0xb4] ss:$40 sps:$4 sm:$0xff]   ;;  %v6016_v18 = vld [vmem:[%s9124_s19 + $0xb0] ss:$40 sps:$4 sm:$0xff]  }
 0x50f   :  { %v6021_v61 = vld [vmem:[%s9124_s19 + $0xbc] ss:$40 sps:$4 sm:$0xff]   ;;  %v6019_v15 = vld [vmem:[%s9124_s19 + $0xb8] ss:$40 sps:$4 sm:$0xff]  }
 0x510   :  { %v2999_v50 = vsel %vm2297_vm7, %v2997_v59, %v2998_v43  ;;  %v3004_v53 = vsel %vm2297_vm7, %v2998_v43, %v3003_v39  ;;  %v6024_v47 = vld [vmem:[%s9124_s19 + $0x64] ss:$40 sps:$4 sm:$0xff]   ;;  %v6022_v39 = vld [vmem:[%s9124_s19 + $0x60] ss:$40 sps:$4 sm:$0xff]   ;;  %v6034_v13 = vld [vmem:[%s9124_s19 + $0x250] ss:$40 sps:$4 sm:$0xff]  }
 0x511   :  { %v3027_v8 = vadd.f32 %v9729_v55, %v2999_v50  ;;  %v3029_v9 = vadd.f32 %v9729_v55, %v3004_v53  ;;  %v5971_v55 = vld [vmem:[%s9124_s19 + $0xa8] ss:$40 sps:$4 sm:$0xff]   ;;  %v6027_v59 = vld [vmem:[%s9124_s19 + $0x6c] ss:$40 sps:$4 sm:$0xff]   ;;  %v6033_v53 = vld [vmem:[%s9124_s19 + $0x1c] ss:$40 sps:$4 sm:$0xff]  }
 0x512   :  { %3839 = vmatpush1.bf16.msra.mxu1 %v5971_v55  ;;  %v6025_v43 = vld [vmem:[%s9124_s19 + $0x68] ss:$40 sps:$4 sm:$0xff]   ;;  %v6030_v50 = vld [vmem:[%s9124_s19 + $0x14] ss:$40 sps:$4 sm:$0xff]  }
 0x513   :  { %v3035_v5 = vmax.f32 %v3027_v8, 0.0  ;;  %v3037_v21 = vmax.f32 %v3029_v9, 0.0  ;;  %3840 = vmatprep.subr.bf16.mxu1 %v5979_v23  ;;  %v6028_v9 = vld [vmem:[%s9124_s19 + $0x10] ss:$40 sps:$4 sm:$0xff]   ;;  %v6042_v12 = vld [vmem:[%s9124_s19 + $0x1b4] ss:$40 sps:$4 sm:$0xff]  }
 0x514   :  { %v9768_v60 = vld [vmem:[#allocation30_spill] sm:$0xff] }
 0x515   :  { %v3043_v24 = vmin.f32 %v3035_v5, 6.0  ;;  %v3045_v56 = vmin.f32 %v3037_v21, 6.0  ;;  %v6031_v5 = vld [vmem:[%s9124_s19 + $0x18] ss:$40 sps:$4 sm:$0xff]   ;;  %v6036_v21 = vld [vmem:[%s9124_s19 + $0x254] ss:$40 sps:$4 sm:$0xff]  }
 0x516   :  { %3841 = vmatpush1.bf16.msra.mxu1 %v5977_v22  ;;  %v9769_v22 = vld [vmem:[#allocation39_spill] sm:$0xff] }
 0x517   :  { %v3049_v19 = vpack.c.bf16 %v3045_v56, %v3043_v24  ;;  %3842 = vmatprep.subr.bf16.mxu1 %v5985_v6  ;;  %v6037_v6 = vld [vmem:[%s9124_s19 + $0x200] ss:$40 sps:$4 sm:$0xff]  }
 0x519   :  { %3227 = vmatmul.mubr.bf16.gmra.mxu1 %v3049_v19 }
 0x51a   :  { %3860 = vmatprep.mubr.bf16.mxu1 %v9765_v37  ;;  %3843 = vmatpush1.bf16.msra.mxu1 %v5983_v7  ;;  %v6039_v7 = vld [vmem:[%s9124_s19 + $0x204] ss:$40 sps:$4 sm:$0xff]  }
 0x51b   :  { %3934 = vmatprep.subr.bf16.mxu1 %v5991_v17  ;;  %v6040_v17 = vld [vmem:[%s9124_s19 + $0x1b0] ss:$40 sps:$4 sm:$0xff]  }
 0x5af   :  { %v5653_v54 = vpop.f32.mrf.mxu1 }
 0x5b1   :  { %v5654_v11 = vpop.f32.mrf.mxu1 }
 0x5b2   :  { %v5655_v28 = vadd.f32 %v5654_v11, %v5653_v54  ;;  %v6045_v54 = vld [vmem:[%s9124_s19 + $0x164] ss:$40 sps:$4 sm:$0xff]   ;;  %v6043_v11 = vld [vmem:[%s9124_s19 + $0x160] ss:$40 sps:$4 sm:$0xff]  }
 0x5b3   :  { %v5656_v31 = vpop.f32.mrf.mxu1 }
 0x5b4   :  { %v3221_v41 = vadd.f32 %v5655_v28, %v8573_v62  ;;  %v6048_v28 = vld [vmem:[%s9124_s19 + $0x114] ss:$40 sps:$4 sm:$0xff]  }
 0x5b5   :  { %v5657_v30 = vpop.f32.mrf.mxu1 }
 0x5b6   :  { %v5658_v34 = vadd.f32 %v5657_v30, %v5656_v31  ;;  %v3235_v2 = vadd.f32 %v3221_v41, %v9766_v52  ;;  %v6051_v31 = vld [vmem:[%s9124_s19 + $0xc4] ss:$40 sps:$4 sm:$0xff]   ;;  %v6049_v30 = vld [vmem:[%s9124_s19 + $0xc0] ss:$40 sps:$4 sm:$0xff]   ;;  %v6054_v41 = vld [vmem:[%s9124_s19 + $0x74] ss:$40 sps:$4 sm:$0xff]  }
 0x5b7   :  { %v6055_v52 = vld [vmem:[%s9124_s19 + $0x20] ss:$40 sps:$4 sm:$0xff]  }
 0x5b8   :  { %v3224_v49 = vadd.f32 %v5658_v34, %v8573_v62  ;;  %v6052_v34 = vld [vmem:[%s9124_s19 + $0x70] ss:$40 sps:$4 sm:$0xff]  }
 0x5ba   :  { %v3236_v0 = vadd.f32 %v3224_v49, %v9767_v33  ;;  %v6057_v49 = vld [vmem:[%s9124_s19 + $0x24] ss:$40 sps:$4 sm:$0xff]  }
 0x5bc   :  { %v8585_v4 = vpack.c.bf16 %v3236_v0, %v3235_v2 }
 0x5be   :  { %3808 = vmatmul.mubr.bf16.vlgmr.msra.gmra.mxu0 %v8585_v4  ;;  %3861 = vmatmul.mubr.bf16.vlgmr.msra.gmra.mxu1 %v8585_v4 }
 0x5bf   :  { %3882 = vmatpush1.bf16.msra.mxu0 %v5986_v32  ;;  %3935 = vmatpush1.bf16.msra.mxu1 %v5989_v45 }
 0x5c0   :  { %3883 = vmatprep.subr.bf16.mxu0 %v5994_v26  ;;  %3936 = vmatprep.subr.bf16.mxu1 %v5997_v25  ;;  %v8741_v25 = vld [vmem:[%s9125_s20] sm:$0xff] }
 0x5c1   :  { %3817 = vmatprep.mubr.bf16.mxu0 %v9765_v37  ;;  %3870 = vmatprep.mubr.bf16.mxu1 %v9765_v37 }
 0x5c3   :  { %3884 = vmatpush1.bf16.msra.mxu0 %v5992_v1  ;;  %3937 = vmatpush1.bf16.msra.mxu1 %v5995_v42 }
 0x5c4   :  { %3885 = vmatprep.subr.bf16.mxu0 %v6000_v3  ;;  %3938 = vmatprep.subr.bf16.mxu1 %v6003_v46  ;;  %v9770_v3 = vld [vmem:[#allocation32_spill] sm:$0xff]  ;;  %v9771_v46 = vld [vmem:[#allocation7_spill] sm:$0xff] }
 0x5c7   :  { %3886 = vmatpush1.bf16.msra.mxu0 %v5998_v35  ;;  %3939 = vmatpush1.bf16.msra.mxu1 %v6001_v48  ;;  %v3335_v35 = vsub.s32 2, %v9771_v46  ;;  %v3339_v48 = vsub.s32 3, %v9771_v46 }
 0x5c8   :  { %3887 = vmatprep.subr.bf16.mxu0 %v6006_v44  ;;  %3940 = vmatprep.subr.bf16.mxu1 %v6009_v10  ;;  %v3343_v44 = vsub.s32 4, %v9771_v46  ;;  %v9772_v10 = vld [vmem:[#allocation31_spill] sm:$0xff] }
 0x5cb   :  { %3888 = vmatpush1.bf16.msra.mxu0 %v6004_v29  ;;  %3941 = vmatpush1.bf16.msra.mxu1 %v6007_v38  ;;  %v3332_v29 = vrot.slane %v8741_v25, %v9772_v10 }
 0x5cc   :  { %3889 = vmatprep.subr.bf16.mxu0 %v6012_v57  ;;  %3942 = vmatprep.subr.bf16.mxu1 %v6015_v63  ;;  %v3351_v63 = vsub.s32 6, %v9771_v46 }
 0x5cf   :  { %3890 = vmatpush1.bf16.msra.mxu0 %v6010_v20  ;;  %3943 = vmatpush1.bf16.msra.mxu1 %v6013_v27  ;;  %v3336_v27 = vrot.slane %v8741_v25, %v3335_v35 }
 0x5d0   :  { %3891 = vmatprep.subr.bf16.mxu0 %v6018_v58  ;;  %3944 = vmatprep.subr.bf16.mxu1 %v6021_v61  ;;  %v3347_v58 = vsub.s32 5, %v9771_v46 }
 0x5d3   :  { %3892 = vmatpush1.bf16.msra.mxu0 %v6016_v18  ;;  %3945 = vmatpush1.bf16.msra.mxu1 %v6019_v15 }
 0x5d4   :  { %3893 = vmatprep.subr.bf16.mxu0 %v6024_v47  ;;  %3946 = vmatprep.subr.bf16.mxu1 %v6027_v59  ;;  %v3340_v47 = vrot.slane %v8741_v25, %v3339_v48 }
 0x5d7   :  { %3894 = vmatpush1.bf16.msra.mxu0 %v6022_v39  ;;  %3947 = vmatpush1.bf16.msra.mxu1 %v6025_v43  ;;  %v8763_v39 = vrot.slane %v8741_v25, %v3343_v44 }
 0x5d8   :  { %3895 = vmatprep.subr.bf16.mxu0 %v6030_v50  ;;  %3948 = vmatprep.subr.bf16.mxu1 %v6033_v53 }
 0x5d9   :  { %v5659_v8 = vpop.f32.mrf.mxu1 }
 0x5db   :  { %v5660_v24 = vpop.f32.mrf.mxu1  ;;  %3896 = vmatpush1.bf16.msra.mxu0 %v6028_v9  ;;  %3949 = vmatpush1.bf16.msra.mxu1 %v6031_v5  ;;  %v8768_v9 = vrot.slane %v8741_v25, %v3351_v63  ;;  %v3355_v5 = vsub.s32 7, %v9771_v46  ;;  %v6119_v46 = vld [vmem:[%s9126_s21 + $0x278] sm:$0xff]  }
 0x5dc   :  { %v5661_v56 = vadd.f32 %v5660_v24, %v5659_v8  ;;  %3987 = vmatprep.subr.bf16.mxu0 %v6036_v21 }
 0x5dd   :  { %v5662_v19 = vpop.f32.mrf.mxu1 }
 0x5de   :  { %v3229_v16 = vadd.f32 %v5661_v56, %v8573_v62 }
 0x5df   :  { %v5663_v14 = vpop.f32.mrf.mxu1 }
 0x5e0   :  { %v5664_v55 = vadd.f32 %v5663_v14, %v5662_v19  ;;  %v3237_v36 = vadd.f32 %v3229_v16, %v9768_v60  ;;  %v8775_v19 = vrot.slane %v8741_v25, %v3347_v58 }
 0x5e2   :  { %v3232_v40 = vadd.f32 %v5664_v55, %v8573_v62  ;;  %v6046_v62 = vld [vmem:[%s9124_s19 + $0x110] ss:$40 sps:$4 sm:$0xff]   ;;  %s6142_s19 = scalar_lea.vmem %s5282_s27, 32 }
 0x5e3   :  { %p6143_p0 = scmp.ne.s32.totalorder %s5282_s27, %s6142_s19  ;;  %p6148_p2 = scmp.lt.s32.totalorder %s6142_s19, %s6142_s19 }
 0x5e4   :  { %v3238_v23 = vadd.f32 %v3232_v40, %v9769_v22 }
 0x5e5   :  { %p6149_p3 = por %p6148_p2, %p6147_p1 }
 0x5e6   :  { %v3240_v51 = vpack.c.bf16 %v3238_v23, %v3237_v36 }
 0x5e7   :  { %p6150_p4 = pnand %p6149_p3, %p6143_p0 }
 0x5e8   :  { %3818 = vmatmul.mubr.bf16.gmra.mxu0 %v3240_v51  ;;  %3871 = vmatmul.mubr.bf16.gmra.mxu1 %v3240_v51 }
 0x5e9   :  { %3913 = vmatprep.mubr.bf16.mxu0 %v9765_v37  ;;  %3966 = vmatprep.mubr.bf16.mxu1 %v9765_v37 }
 0x5f0   :  { %3914 = vmatmul.mubr.bf16.vlgmr.msra.gmra.mxu0 %v8585_v4  ;;  %3967 = vmatmul.mubr.bf16.vlgmr.msra.gmra.mxu1 %v8585_v4 }
 0x5f1   :  { %3988 = vmatpush1.bf16.msra.mxu0 %v6034_v13  ;;  %3923 = vmatprep.mubr.bf16.mxu0 %v9765_v37 }
 0x5f2   :  { %3989 = vmatprep.subr.bf16.mxu0 %v6039_v7  ;;  %3976 = vmatprep.mubr.bf16.mxu1 %v9765_v37 }
 0x5f5   :  { %3990 = vmatpush1.bf16.msra.mxu0 %v6037_v6 }
 0x5f6   :  { %3991 = vmatprep.subr.bf16.mxu0 %v6042_v12 }
 0x5f8   :  { %3924 = vmatmul.mubr.bf16.gmra.mxu0 %v3240_v51  ;;  %3977 = vmatmul.mubr.bf16.gmra.mxu1 %v3240_v51 }
 0x5f9   :  { %3992 = vmatpush1.bf16.msra.mxu0 %v6040_v17  ;;  %4019 = vmatprep.mubr.bf16.mxu0 %v9765_v37 }
 0x5fa   :  { %3993 = vmatprep.subr.bf16.mxu0 %v6045_v54  ;;  %4234 = vmatprep.mubr.bf16.mxu1 %v9765_v37 }
 0x5fd   :  { %3994 = vmatpush1.bf16.msra.mxu0 %v6043_v11 }
 0x5fe   :  { %3995 = vmatprep.subr.bf16.mxu0 %v6048_v28 }
 0x601   :  { %3996 = vmatpush1.bf16.msra.mxu0 %v6046_v62 }
 0x602   :  { %3997 = vmatprep.subr.bf16.mxu0 %v6051_v31 }
 0x605   :  { %3998 = vmatpush1.bf16.msra.mxu0 %v6049_v30 }
 0x606   :  { %3999 = vmatprep.subr.bf16.mxu0 %v6054_v41 }
 0x609   :  { %4000 = vmatpush1.bf16.msra.mxu0 %v6052_v34 }
 0x60a   :  { %4001 = vmatprep.subr.bf16.mxu0 %v6057_v49 }
 0x60d   :  { %4002 = vmatpush1.bf16.msra.mxu0 %v6055_v52 }
 0x610   :  { %4020 = vmatmul.mubr.bf16.vlgmr.msra.gmra.mxu0 %v8585_v4  ;;  %v3328_v4 = vrot.slane %v8741_v25, %v9770_v3 }
 0x611   :  { %4029 = vmatprep.mubr.bf16.mxu0 %v9765_v37 }
 0x618   :  { %4030 = vmatmul.mubr.bf16.gmra.mxu0 %v3240_v51 }
 0x619   :  { %4357 = vmatprep.mubr.bf16.mxu0 %v9765_v37 }
 0x67e   :  { %v3809_v2 = vpop.f32.mrf.mxu0  ;;  %v3862_v33 = vpop.f32.mrf.mxu1 }
 0x67f   :  { %v8751_v20 = vadd.f32 %v3809_v2, %v3328_v4  ;;  %v3863_v24 = vadd.f32 %v3862_v33, %v3336_v27 }
 0x680   :  { %v3811_v0 = vpop.f32.mrf.mxu0  ;;  %v3864_v32 = vpop.f32.mrf.mxu1 }
 0x681   :  { %v3812_v43 = vadd.f32 %v3811_v0, %v3332_v29  ;;  %v4040_v21 = vmax.f32 %v8751_v20, 0.0  ;;  %v3865_v6 = vadd.f32 %v3864_v32, %v3340_v47 }
 0x682   :  { %v3813_v45 = vpop.f32.mrf.mxu0  ;;  %v3866_v26 = vpop.f32.mrf.mxu1 }
 0x683   :  { %v3814_v56 = vadd.f32 %v3813_v45, %v3328_v4  ;;  %v3867_v14 = vadd.f32 %v3866_v26, %v3336_v27  ;;  %v4041_v7 = vmax.f32 %v3812_v43, 0.0  ;;  %v3356_v43 = vrot.slane %v8741_v25, %v3355_v5 }
 0x684   :  { %v3815_v1 = vpop.f32.mrf.mxu0  ;;  %v3868_v42 = vpop.f32.mrf.mxu1 }
 0x685   :  { %v3816_v61 = vadd.f32 %v3815_v1, %v3332_v29  ;;  %v3869_v55 = vadd.f32 %v3868_v42, %v3340_v47  ;;  %v4050_v28 = vmax.f32 %v3814_v56, 0.0  ;;  %v4052_v41 = vmax.f32 %v3867_v14, 0.0 }
 0x686   :  { %v4042_v42 = vmax.f32 %v3863_v24, 0.0  ;;  %v4081_v32 = vmin.f32 %v4041_v7, 6.0 }
 0x687   :  { %v4051_v16 = vmax.f32 %v3816_v61, 0.0  ;;  %v4053_v49 = vmax.f32 %v3869_v55, 0.0  ;;  %v4090_v61 = vmin.f32 %v4050_v28, 6.0 }
 0x689   :  { %v4091_v34 = vmin.f32 %v4051_v16, 6.0  ;;  %v8782_v16 = vmin.f32 %v4042_v42, 6.0 }
 0x68b   :  { %v4126_v24 = vpack.c.bf16 %v4091_v34, %v4081_v32 }
 0x6a8   :  { %v3819_v38 = vpop.f32.mrf.mxu0  ;;  %v3872_v57 = vpop.f32.mrf.mxu1 }
 0x6a9   :  { %v3820_v50 = vadd.f32 %v3819_v38, %v3328_v4  ;;  %v3873_v62 = vadd.f32 %v3872_v57, %v3336_v27 }
 0x6aa   :  { %v3821_v18 = vpop.f32.mrf.mxu0  ;;  %v3874_v15 = vpop.f32.mrf.mxu1 }
 0x6ab   :  { %v3822_v59 = vadd.f32 %v3821_v18, %v3332_v29  ;;  %v4060_v12 = vmax.f32 %v3820_v50, 0.0  ;;  %v3875_v31 = vadd.f32 %v3874_v15, %v3340_v47  ;;  %v4062_v57 = vmax.f32 %v3873_v62, 0.0 }
 0x6ac   :  { %v3823_v53 = vpop.f32.mrf.mxu0  ;;  %v3876_v8 = vpop.f32.mrf.mxu1  ;;  %v8777_v15 = vmin.f32 %v4052_v41, 6.0  ;;  %v8797_v41 = vld [vmem:[%s9773_s28] sm:$0x1] }
 0x6ad   :  { %v3824_v40 = vadd.f32 %v3823_v53, %v3328_v4  ;;  %v4061_v22 = vmax.f32 %v3822_v59, 0.0  ;;  %v3877_v23 = vadd.f32 %v3876_v8, %v3336_v27  ;;  %v4043_v4 = vmax.f32 %v3865_v6, 0.0 }
 0x6ae   :  { %v3825_v60 = vpop.f32.mrf.mxu0  ;;  %v3878_v36 = vpop.f32.mrf.mxu1  ;;  %v4063_v27 = vmax.f32 %v3875_v31, 0.0  ;;  %v4080_v8 = vmin.f32 %v4040_v21, 6.0 }
 0x6af   :  { %v3826_v51 = vadd.f32 %v3825_v60, %v3332_v29  ;;  %v3879_v13 = vadd.f32 %v3878_v36, %v3340_v47  ;;  %v4070_v17 = vmax.f32 %v3824_v40, 0.0  ;;  %v4101_v0 = vmin.f32 %v4061_v22, 6.0 }
 0x6b0   :  { %v3915_v54 = vpop.f32.mrf.mxu0  ;;  %v3968_v11 = vpop.f32.mrf.mxu1  ;;  %v4072_v45 = vmax.f32 %v3877_v23, 0.0  ;;  %v4100_v29 = vmin.f32 %v4060_v12, 6.0  ;;  %v4093_v47 = vmin.f32 %v4053_v49, 6.0  ;;  %v4083_v55 = vmin.f32 %v4043_v4, 6.0 }
 0x6b1   :  { %v4071_v30 = vmax.f32 %v3826_v51, 0.0  ;;  %v4110_v52 = vmin.f32 %v4070_v17, 6.0  ;;  %v4073_v1 = vmax.f32 %v3879_v13, 0.0  ;;  %v4125_v36 = vpack.c.bf16 %v4090_v61, %v4080_v8 }
 0x6b2   :  { %v3917_v2 = vpop.f32.mrf.mxu0  ;;  %v3970_v33 = vpop.f32.mrf.mxu1  ;;  %v4112_v56 = vmin.f32 %v4072_v45, 6.0  ;;  %v4102_v22 = vmin.f32 %v4062_v57, 6.0  ;;  %v4103_v23 = vmin.f32 %v4063_v27, 6.0  ;;  %v4127_v13 = vpack.c.bf16 %v8777_v15, %v8782_v16 }
 0x6b3   :  { %v4111_v26 = vmin.f32 %v4071_v30, 6.0  ;;  %v4135_v59 = vpack.c.bf16 %v4110_v52, %v4100_v29  ;;  %v4113_v14 = vmin.f32 %v4073_v1, 6.0  ;;  %v3918_v51 = vadd.f32 %v3917_v2, %v8775_v19 }
 0x6b4   :  { %v3919_v38 = vpop.f32.mrf.mxu0  ;;  %v3972_v20 = vpop.f32.mrf.mxu1  ;;  %v4128_v21 = vpack.c.bf16 %v4093_v47, %v4083_v55  ;;  %v8788_v7 = vadd.f32 %v3915_v54, %v8763_v39  ;;  %v4137_v28 = vpack.c.bf16 %v4112_v56, %v4102_v22  ;;  %v8792_v31 = vadd.f32 %v3968_v11, %v8768_v9 }
 0x6b5   :  { %v4136_v18 = vpack.c.bf16 %v4111_v26, %v4101_v0  ;;  %v4138_v62 = vpack.c.bf16 %v4113_v14, %v4103_v23  ;;  %v3971_v30 = vadd.f32 %v3970_v33, %v3356_v43  ;;  %v4045_v45 = vmax.f32 %v3918_v51, 0.0 }
 0x6b6   :  { %v3921_v50 = vpop.f32.mrf.mxu0  ;;  %v3974_v53 = vpop.f32.mrf.mxu1  ;;  %v3920_v11 = vadd.f32 %v3919_v38, %v8763_v39  ;;  %v3973_v33 = vadd.f32 %v3972_v20, %v8768_v9 }
 0x6b7   :  { %4214 = vmatprep.subr.bf16.mxu1 %v4136_v18  ;;  %v3922_v6 = vadd.f32 %v3921_v50, %v8775_v19  ;;  %v3975_v34 = vadd.f32 %v3974_v53, %v3356_v43  ;;  %v4047_v57 = vmax.f32 %v3971_v30, 0.0  ;;  %v4085_v23 = vmin.f32 %v4045_v45, 6.0 }
 0x6b8   :  { %4215 = vmatpush1.bf16.msra.mxu1 %v4135_v59  ;;  %v3925_v40 = vpop.f32.mrf.mxu0  ;;  %v3978_v60 = vpop.f32.mrf.mxu1  ;;  %v4056_v8 = vmax.f32 %v3973_v33, 0.0 }
 0x6b9   :  { %4216 = vmatprep.subr.bf16.mxu1 %v4126_v24  ;;  %v3926_v54 = vadd.f32 %v3925_v40, %v8763_v39  ;;  %v3979_v26 = vadd.f32 %v3978_v60, %v8768_v9  ;;  %v4055_v1 = vmax.f32 %v3922_v6, 0.0  ;;  %v4057_v20 = vmax.f32 %v3975_v34, 0.0 }
 0x6ba   :  { %v3927_v12 = vpop.f32.mrf.mxu0  ;;  %v3980_v17 = vpop.f32.mrf.mxu1  ;;  %v4044_v40 = vmax.f32 %v8788_v7, 0.0  ;;  %v4046_v60 = vmax.f32 %v8792_v31, 0.0 }
 0x6bb   :  { %v3928_v49 = vadd.f32 %v3927_v12, %v8775_v19  ;;  %v3981_v52 = vadd.f32 %v3980_v17, %v3356_v43  ;;  %v4064_v15 = vmax.f32 %v3926_v54, 0.0  ;;  %v4095_v24 = vmin.f32 %v4055_v1, 6.0 }
 0x6bc   :  { %4217 = vmatpush1.bf16.msra.mxu1 %v4125_v36  ;;  %v3929_v2 = vpop.f32.mrf.mxu0  ;;  %v3982_v0 = vpop.f32.mrf.mxu1  ;;  %v4097_v36 = vmin.f32 %v4057_v20, 6.0  ;;  %v4087_v12 = vmin.f32 %v4047_v57, 6.0  ;;  %v4084_v7 = vmin.f32 %v4044_v40, 6.0  ;;  %v6068_v57 = vld [vmem:[%s9126_s21 + $0x20] sm:$0xff]  }
 0x6bd   :  { %4255 = vmatprep.subr.bf16.mxu1 %v4138_v62  ;;  %v4065_v42 = vmax.f32 %v3928_v49, 0.0  ;;  %v3930_v32 = vadd.f32 %v3929_v2, %v8763_v39  ;;  %v3983_v4 = vadd.f32 %v3982_v0, %v8768_v9  ;;  %v4067_v27 = vmax.f32 %v3981_v52, 0.0  ;;  %v6058_v49 = vld [vmem:[%s9126_s21 + $0x78] sm:$0xff]   ;;  %v6060_v0 = vld [vmem:[%s9126_s21 + $0x70] sm:$0xff]  }
 0x6be   :  { %v3931_v29 = vpop.f32.mrf.mxu0  ;;  %v3984_v61 = vpop.f32.mrf.mxu1  ;;  %v4054_v39 = vmax.f32 %v3920_v11, 0.0  ;;  %v4066_v9 = vmax.f32 %v3979_v26, 0.0  ;;  %v4104_v22 = vmin.f32 %v4064_v15, 6.0  ;;  %v4096_v62 = vmin.f32 %v4056_v8, 6.0  ;;  %v6059_v2 = vld [vmem:[%s9126_s21 + $0x38] sm:$0xff]   ;;  %v6061_v11 = vld [vmem:[%s9126_s21 + $0x30] sm:$0xff]  }
 0x6bf   :  { %5505 = vmatmul.mubr.msk.bf16.vlgmr.msra.gmra.mxu1 %vm384_vm0, %v8797_v41  ;;  %v3932_v18 = vadd.f32 %v3931_v29, %v8775_v19  ;;  %v3985_v38 = vadd.f32 %v3984_v61, %v3356_v43  ;;  %v4074_v47 = vmax.f32 %v3930_v32, 0.0  ;;  %v4076_v59 = vmax.f32 %v3983_v4, 0.0  ;;  %v6062_v26 = vld [vmem:[%s9126_s21 + $0x68] sm:$0xff]  }
 0x6c0   :  { %4256 = vmatpush1.bf16.msra.mxu1 %v4137_v28  ;;  %4275 = vmatprep.mubr.bf16.mxu1 %v9765_v37  ;;  %v4105_v56 = vmin.f32 %v4065_v42, 6.0  ;;  %v4107_v16 = vmin.f32 %v4067_v27, 6.0  ;;  %v4106_v51 = vmin.f32 %v4066_v9, 6.0  ;;  %v4094_v17 = vmin.f32 %v4054_v39, 6.0  ;;  %v6064_v42 = vld [vmem:[%s9126_s21 + $0x28] sm:$0xff]  }
 0x6c1   :  { %4257 = vmatprep.subr.bf16.mxu1 %v4128_v21  ;;  %v4075_v50 = vmax.f32 %v3932_v18, 0.0  ;;  %v4077_v53 = vmax.f32 %v3985_v38, 0.0  ;;  %v4114_v14 = vmin.f32 %v4074_v47, 6.0  ;;  %v4116_v55 = vmin.f32 %v4076_v59, 6.0  ;;  %v8844_v4 = vld [vmem:[%s9125_s20 + $0x8] sm:$0x3] }
 0x6c2   :  { %v4130_v30 = vpack.c.bf16 %v4095_v24, %v4085_v23  ;;  %v4132_v54 = vpack.c.bf16 %v4097_v36, %v4087_v12  ;;  %v4129_v31 = vpack.c.bf16 %v4094_v17, %v4084_v7  ;;  %v3364_v61 = vrot.slane %v8844_v4, %v9772_v10  ;;  %v6070_v38 = vld [vmem:[%s9126_s21 + $0x58] sm:$0xff]   ;;  %v6074_v24 = vld [vmem:[%s9126_s21 + $0x50] sm:$0xff]  }
 0x6c3   :  { %v4115_v19 = vmin.f32 %v4075_v50, 6.0  ;;  %v4117_v43 = vmin.f32 %v4077_v53, 6.0  ;;  %v4139_v28 = vpack.c.bf16 %v4114_v14, %v4104_v22  ;;  %v4141_v34 = vpack.c.bf16 %v4116_v55, %v4106_v51  ;;  %v6072_v50 = vld [vmem:[%s9126_s21 + $0x18] sm:$0xff]   ;;  %v6076_v36 = vld [vmem:[%s9126_s21 + $0x10] sm:$0xff]  }
 0x6c4   :  { %4258 = vmatpush1.bf16.msra.mxu1 %v4127_v13  ;;  %v4086_v13 = vmin.f32 %v4046_v60, 6.0  ;;  %v3360_v27 = vrot.slane %v8844_v4, %v9770_v3 }
 0x6c5   :  { %v4140_v21 = vpack.c.bf16 %v4115_v19, %v4105_v56  ;;  %v4142_v6 = vpack.c.bf16 %v4117_v43, %v4107_v16 }
 0x6c6   :  { %v4131_v52 = vpack.c.bf16 %v4096_v62, %v4086_v13  ;;  %v6063_v13 = vld [vmem:[%s9126_s21 + $0xf8] sm:$0xff]  }
 0x6c7   :  { %5506 = vmatmul.mubr.msk.bf16.vlgmr.msra.gmra.mxu1 %vm384_vm0, %v8797_v41  ;;  %4296 = vmatprep.subr.bf16.mxu1 %v4140_v21 }
 0x6c8   :  { %4337 = vmatprep.subr.bf16.mxu0 %v4142_v6  ;;  %4297 = vmatpush1.bf16.msra.mxu1 %v4139_v28 }
 0x6c9   :  { %4338 = vmatpush1.bf16.msra.mxu0 %v4141_v34  ;;  %4298 = vmatprep.subr.bf16.mxu1 %v4130_v30 }
 0x6ca   :  { %4339 = vmatprep.subr.bf16.mxu0 %v4132_v54  ;;  %4316 = vmatprep.mubr.bf16.mxu1 %v9765_v37 }
 0x6cc   :  { %4299 = vmatpush1.bf16.msra.mxu1 %v4129_v31 }
 0x6cd   :  { %4340 = vmatpush1.bf16.msra.mxu0 %v4131_v52  ;;  %v6067_v52 = vld [vmem:[%s9126_s21 + $0xf0] sm:$0xff]  }
 0x6ce   :  { %5665 = vmatprep.subr.bf16.mxu0 %v6058_v49  ;;  %v6065_v49 = vld [vmem:[%s9126_s21 + $0xb8] sm:$0xff]  }
 0x6cf   :  { %5507 = vmatmul.mubr.msk.bf16.vlgmr.msra.gmra.mxu1 %vm384_vm0, %v8797_v41 }
 0x6d0   :  { %v4021_v45 = vpop.f32.mrf.mxu0  ;;  %5508 = vmatmul.mubr.msk.bf16.vlgmr.msra.gmra.mxu0 %vm384_vm0, %v8797_v41  ;;  %4398 = vmatprep.mubr.bf16.mxu1 %v9765_v37  ;;  %v6066_v37 = vld [vmem:[%s9126_s21 + $0x60] sm:$0xff]  }
 0x6d1   :  { %5666 = vmatpush3.bf16.msra.mxu0 %v6059_v2  ;;  %v4022_v19 = vadd.f32 %v4021_v45, %v3360_v27  ;;  %v6069_v2 = vld [vmem:[%s9126_s21 + $0xb0] sm:$0xff]   ;;  %v6073_v45 = vld [vmem:[%s9126_s21 + $0xa8] sm:$0xff]  }
 0x6d2   :  { %v4023_v33 = vpop.f32.mrf.mxu0  ;;  %5667 = vmatprep.subr.bf16.mxu0 %v6060_v0  ;;  %v6071_v0 = vld [vmem:[%s9126_s21 + $0xe8] sm:$0xff]  }
 0x6d3   :  { %v4024_v39 = vadd.f32 %v4023_v33, %v3364_v61  ;;  %v4048_v12 = vmax.f32 %v4022_v19, 0.0  ;;  %v6078_v33 = vld [vmem:[%s9126_s21 + $0x48] sm:$0xff]  }
 0x6d4   :  { %v4025_v1 = vpop.f32.mrf.mxu0 }
 0x6d5   :  { %5668 = vmatpush3.bf16.msra.mxu0 %v6061_v11  ;;  %v4026_v53 = vadd.f32 %v4025_v1, %v3360_v27  ;;  %v4049_v40 = vmax.f32 %v4024_v39, 0.0  ;;  %v4088_v54 = vmin.f32 %v4048_v12, 6.0  ;;  %v6077_v11 = vld [vmem:[%s9126_s21 + $0xa0] sm:$0xff]   ;;  %v6080_v1 = vld [vmem:[%s9126_s21 + $0x8] sm:$0xff]  }
 0x6d6   :  { %v4027_v32 = vpop.f32.mrf.mxu0  ;;  %5669 = vmatprep.subr.bf16.mxu0 %v6062_v26  ;;  %v6079_v26 = vld [vmem:[%s9126_s21 + $0xd8] sm:$0xff]   ;;  %v6094_v12 = vld [vmem:[%s9126_s21 + $0x168] sm:$0xff]  }
 0x6d7   :  { %v4028_v20 = vadd.f32 %v4027_v32, %v3364_v61  ;;  %v4058_v22 = vmax.f32 %v4026_v53, 0.0  ;;  %v4089_v28 = vmin.f32 %v4049_v40, 6.0  ;;  %v6082_v32 = vld [vmem:[%s9126_s21 + $0x40] sm:$0xff]  }
 0x6d8   :  { %v4031_v29 = vpop.f32.mrf.mxu0 }
 0x6d9   :  { %5670 = vmatpush3.bf16.msra.mxu0 %v6064_v42  ;;  %v4032_v47 = vadd.f32 %v4031_v29, %v3360_v27  ;;  %v4059_v56 = vmax.f32 %v4028_v20, 0.0  ;;  %v4098_v30 = vmin.f32 %v4058_v22, 6.0  ;;  %v6081_v42 = vld [vmem:[%s9126_s21 + $0x98] sm:$0xff]   ;;  %v6084_v29 = vld [vmem:[%s9126_s21] sm:$0xff]  }
 0x6da   :  { %v4033_v18 = vpop.f32.mrf.mxu0  ;;  %5671 = vmatprep.subr.bf16.mxu0 %v6066_v37  ;;  %v6083_v37 = vld [vmem:[%s9126_s21 + $0xd0] sm:$0xff]   ;;  %v6092_v20 = vld [vmem:[%s9126_s21 + $0x80] sm:$0xff]  }
 0x6db   :  { %v4034_v15 = vadd.f32 %v4033_v18, %v3364_v61  ;;  %v4068_v43 = vmax.f32 %v4032_v47, 0.0  ;;  %v4099_v51 = vmin.f32 %v4059_v56, 6.0  ;;  %v4133_v31 = vpack.c.bf16 %v4098_v30, %v4088_v54  ;;  %v6088_v18 = vld [vmem:[%s9126_s21 + $0x88] sm:$0xff]   ;;  %v6097_v54 = vld [vmem:[%s9126_s21 + $0x1b8] sm:$0xff]  }
 0x6dc   :  { %v4035_v59 = vpop.f32.mrf.mxu0  ;;  %v4120_v47 = vmax.f32 %v8741_v25, 0.0 }
 0x6dd   :  { %v4036_v9 = vadd.f32 %v4035_v59, %v3360_v27  ;;  %5672 = vmatpush3.bf16.msra.mxu0 %v6068_v57  ;;  %v4069_v14 = vmax.f32 %v4034_v15, 0.0  ;;  %v4108_v17 = vmin.f32 %v4068_v43, 6.0  ;;  %v4134_v7 = vpack.c.bf16 %v4099_v51, %v4089_v28  ;;  %v6086_v57 = vld [vmem:[%s9126_s21 + $0xc8] sm:$0xff]   ;;  %v6087_v27 = vld [vmem:[%s9126_s21 + $0x178] sm:$0xff]  }
 0x6de   :  { %v4037_v8 = vpop.f32.mrf.mxu0  ;;  %5673 = vmatprep.subr.bf16.mxu0 %v6070_v38  ;;  %v6090_v38 = vld [vmem:[%s9126_s21 + $0xc0] sm:$0xff]   ;;  %v6095_v15 = vld [vmem:[%s9126_s21 + $0x1f8] sm:$0xff]   ;;  %v4122_v59 = vmin.f32 %v4120_v47, 6.0 }
 0x6df   :  { %v4078_v16 = vmax.f32 %v4036_v9, 0.0  ;;  %v4038_v55 = vadd.f32 %v4037_v8, %v3364_v61  ;;  %v4109_v21 = vmin.f32 %v4069_v14, 6.0  ;;  %v6085_v61 = vld [vmem:[%s9126_s21 + $0x90] sm:$0xff]  }
 0x6e0   :  { %v8934_v39 = vmul.f32 20.0, %v4122_v59  ;;  %v6108_v59 = vld [vmem:[%s9126_s21 + $0x110] sm:$0xff]  }
 0x6e1   :  { %v4079_v60 = vmax.f32 %v4038_v55, 0.0  ;;  %5674 = vmatpush3.bf16.msra.mxu0 %v6072_v50  ;;  %v4118_v23 = vmin.f32 %v4078_v16, 6.0 }
 0x6e2   :  { %5675 = vmatprep.subr.bf16.mxu0 %v6074_v24  ;;  %v4152_v9 = vrot.slane %v8934_v39, %v9770_v3  ;;  %v4156_v50 = vrot.slane %v8934_v39, %v9772_v10  ;;  %v4160_v25 = vrot.slane %v8934_v39, %v3335_v35  ;;  %v4164_v40 = vrot.slane %v8934_v39, %v3339_v48  ;;  %v6093_v48 = vld [vmem:[%s9126_s21 + $0x130] sm:$0xff]  }
 0x6e3   :  { %v4119_v6 = vmin.f32 %v4079_v60, 6.0  ;;  %v4143_v34 = vpack.c.bf16 %v4118_v23, %v4108_v17  ;;  %v6089_v60 = vld [vmem:[%s9126_s21 + $0x138] sm:$0xff]   ;;  %v6091_v23 = vld [vmem:[%s9126_s21 + $0x170] sm:$0xff]  }
 0x6e5   :  { %v4144_v62 = vpack.c.bf16 %v4119_v6, %v4109_v21  ;;  %5676 = vmatpush3.bf16.msra.mxu0 %v6076_v36 }
 0x6e6   :  { %5677 = vmatprep.subr.bf16.mxu0 %v6078_v33 }
 0x6e7   :  { %4378 = vmatprep.subr.bf16.mxu1 %v4144_v62 }
 0x6e8   :  { %4379 = vmatpush1.bf16.msra.mxu1 %v4143_v34 }
 0x6e9   :  { %4380 = vmatprep.subr.bf16.mxu1 %v4134_v7  ;;  %5678 = vmatpush3.bf16.msra.mxu0 %v6080_v1  ;;  %v6096_v7 = vld [vmem:[%s9126_s21 + $0x128] sm:$0xff]  }
 0x6ea   :  { %5679 = vmatprep.subr.bf16.mxu0 %v6082_v32 }
 0x6ec   :  { %4381 = vmatpush1.bf16.msra.mxu1 %v4133_v31  ;;  %v6098_v31 = vld [vmem:[%s9126_s21 + $0x160] sm:$0xff]  }
 0x6ed   :  { %5687 = vmatprep.subr.bf16.mxu1 %v6063_v13  ;;  %5680 = vmatpush3.bf16.msra.mxu0 %v6084_v29  ;;  %v4172_v13 = vrot.slane %v8934_v39, %v3347_v58  ;;  %v6100_v58 = vld [vmem:[%s9126_s21 + $0x120] sm:$0xff]  }
 0x6ee   :  { %5709 = vmatprep.subr.bf16.mxu0 %v6087_v27  ;;  %v6105_v27 = vld [vmem:[%s9126_s21 + $0x1a8] sm:$0xff]  }
 0x6ef   :  { %5509 = vmatmul.mubr.msk.bf16.vlgmr.msra.gmra.mxu1 %vm384_vm0, %v8797_v41  ;;  %v6075_v41 = vld [vmem:[%s9126_s21 + $0xe0] sm:$0xff]  }
 0x6f0   :  { %5688 = vmatpush3.bf16.msra.mxu1 %v6065_v49  ;;  %v6099_v49 = vld [vmem:[%s9126_s21 + $0x1f0] sm:$0xff]  }
 0x6f1   :  { %5689 = vmatprep.subr.bf16.mxu1 %v6067_v52 }
 0x6f4   :  { %5690 = vmatpush3.bf16.msra.mxu1 %v6069_v2  ;;  %v4180_v2 = vrot.slane %v8934_v39, %v3355_v5  ;;  %v6102_v5 = vld [vmem:[%s9126_s21 + $0x158] sm:$0xff]  }
 0x6f5   :  { %5691 = vmatprep.subr.bf16.mxu1 %v6071_v0 }
 0x6f8   :  { %5692 = vmatpush3.bf16.msra.mxu1 %v6073_v45 }
 0x6f9   :  { %5693 = vmatprep.subr.bf16.mxu1 %v6075_v41  ;;  %v6101_v41 = vld [vmem:[%s9126_s21 + $0x1b0] sm:$0xff]  }
 0x6fc   :  { %5694 = vmatpush3.bf16.msra.mxu1 %v6077_v11 }
 0x6fd   :  { %5695 = vmatprep.subr.bf16.mxu1 %v6079_v26  ;;  %v6103_v26 = vld [vmem:[%s9126_s21 + $0x1e8] sm:$0xff]  }
 0x700   :  { %5696 = vmatpush3.bf16.msra.mxu1 %v6081_v42 }
 0x701   :  { %5697 = vmatprep.subr.bf16.mxu1 %v6083_v37 }
 0x704   :  { %5698 = vmatpush3.bf16.msra.mxu1 %v6085_v61 }
 0x705   :  { %5699 = vmatprep.subr.bf16.mxu1 %v6086_v57  ;;  %v6104_v57 = vld [vmem:[%s9126_s21 + $0x118] sm:$0xff]  }
 0x708   :  { %5700 = vmatpush3.bf16.msra.mxu1 %v6088_v18 }
 0x709   :  { %5701 = vmatprep.subr.bf16.mxu1 %v6090_v38 }
 0x70c   :  { %5702 = vmatpush3.bf16.msra.mxu1 %v6092_v20  ;;  %v6106_v20 = vld [vmem:[%s9126_s21 + $0x150] sm:$0xff]  }
 0x70d   :  { %5731 = vmatprep.subr.bf16.mxu1 %v6095_v15  ;;  %v6107_v15 = vld [vmem:[%s9126_s21 + $0x1e0] sm:$0xff]  }
 0x77f   :  { %v4236_v53 = vpop.f32.mrf.mxu1 }
 0x780   :  { %v4237_v8 = vadd.f32 %v4236_v53, %v4152_v9  ;;  %v6109_v9 = vld [vmem:[%s9126_s21 + $0x1a0] sm:$0xff]   ;;  %v6110_v53 = vld [vmem:[%s9126_s21 + $0x148] sm:$0xff]  }
 0x781   :  { %v4238_v24 = vpop.f32.mrf.mxu1 }
 0x782   :  { %v4239_v56 = vadd.f32 %v4238_v24, %v4156_v50  ;;  %v4407_v14 = vmul.f32 0.027777778, %v4237_v8  ;;  %v4168_v50 = vrot.slane %v8934_v39, %v3343_v44  ;;  %v6111_v8 = vld [vmem:[%s9126_s21 + $0x1d8] sm:$0xff]   ;;  %v6112_v24 = vld [vmem:[%s9126_s21 + $0x108] sm:$0xff]   ;;  %v6114_v44 = vld [vmem:[%s9126_s21 + $0x140] sm:$0xff]  }
 0x783   :  { %v4240_v16 = vpop.f32.mrf.mxu1 }
 0x784   :  { %v4408_v55 = vmul.f32 0.027777778, %v4239_v56  ;;  %v4417_v36 = vpack.c.bf16 %v4407_v14, %v4407_v14  ;;  %v6113_v56 = vld [vmem:[%s9126_s21 + $0x198] sm:$0xff]   ;;  %v6115_v16 = vld [vmem:[%s9126_s21 + $0x1d0] sm:$0xff]  }
 0x785   :  { %v4241_v19 = vpop.f32.mrf.mxu1 }
 0x786   :  { %v4418_v43 = vpack.c.bf16 %v4408_v55, %v4408_v55  ;;  %v4176_v55 = vrot.slane %v8934_v39, %v3351_v63  ;;  %v6117_v19 = vld [vmem:[%s9126_s21 + $0x190] sm:$0xff]   ;;  %v4121_v63 = vmax.f32 %v8844_v4, 0.0 }
 0x787   :  { %v4277_v22 = vpop.f32.mrf.mxu1  ;;  %v6123_v4 = vld [vmem:[%s9126_s21 + $0x270] sm:$0xff]  }
 0x788   :  { %v4278_v51 = vadd.f32 %v4277_v22, %v4160_v25  ;;  %5106 = vmatprep.mubr.bf16.mxu0 %v4418_v43  ;;  %v6116_v25 = vld [vmem:[%s9126_s21 + $0x100] sm:$0xff]  }
 0x789   :  { %v4279_v21 = vpop.f32.mrf.mxu1  ;;  %5107 = vmatmul.mubr.bf16.vlgmr.msra.gmra.mxu0 %v4417_v36  ;;  %v6121_v36 = vld [vmem:[%s9126_s21 + $0x238] sm:$0xff]  }
 0x78a   :  { %v4409_v35 = vmul.f32 0.027777778, %v4278_v51  ;;  %v4280_v6 = vadd.f32 %v4279_v21, %v4164_v40  ;;  %5710 = vmatpush3.bf16.msra.mxu0 %v6089_v60  ;;  %v6118_v40 = vld [vmem:[%s9126_s21 + $0x1c8] sm:$0xff]   ;;  %v4123_v51 = vmin.f32 %v4121_v63, 6.0 }
 0x78b   :  { %5711 = vmatprep.subr.bf16.mxu0 %v6091_v23  ;;  %v4281_v17 = vpop.f32.mrf.mxu1  ;;  %v6120_v60 = vld [vmem:[%s9126_s21 + $0x188] sm:$0xff]   ;;  %v6122_v23 = vld [vmem:[%s9126_s21 + $0x1c0] sm:$0xff]  }
 0x78c   :  { %v4410_v28 = vmul.f32 0.027777778, %v4280_v6  ;;  %v4419_v62 = vpack.c.bf16 %v4409_v35, %v4409_v35  ;;  %v6124_v35 = vld [vmem:[%s9126_s21 + $0x180] sm:$0xff]   ;;  %v6125_v6 = vld [vmem:[%s9126_s21 + $0x230] sm:$0xff]  }
 0x78d   :  { %v4282_v30 = vpop.f32.mrf.mxu1 }
 0x78e   :  { %v4420_v34 = vpack.c.bf16 %v4410_v28, %v4410_v28  ;;  %5712 = vmatpush3.bf16.msra.mxu0 %v6093_v48  ;;  %v6126_v48 = vld [vmem:[%s9126_s21 + $0x268] sm:$0xff]   ;;  %v6128_v30 = vld [vmem:[%s9126_s21 + $0x260] sm:$0xff]  }
 0x78f   :  { %5713 = vmatprep.subr.bf16.mxu0 %v6094_v12  ;;  %v4318_v52 = vpop.f32.mrf.mxu1  ;;  %v4146_v12 = vmul.f32 20.0, %v4123_v51  ;;  %v6127_v28 = vld [vmem:[%s9126_s21 + $0x228] sm:$0xff]  }
 0x790   :  { %5146 = vmatprep.mubr.bf16.mxu1 %v4420_v34  ;;  %v4359_v0 = vpop.f32.mrf.mxu0  ;;  %v4319_v14 = vadd.f32 %v4318_v52, %v4168_v50 }
 0x791   :  { %5147 = vmatmul.mubr.bf16.vlgmr.msra.gmra.mxu1 %v4419_v62  ;;  %v4320_v45 = vpop.f32.mrf.mxu1  ;;  %v4360_v39 = vadd.f32 %v4359_v0, %v4176_v55  ;;  %v4188_v62 = vrot.slane %v4146_v12, %v9772_v10 }
 0x792   :  { %5714 = vmatpush3.bf16.msra.mxu0 %v6096_v7  ;;  %5732 = vmatpush3.bf16.msra.mxu1 %v6097_v54  ;;  %v4321_v11 = vadd.f32 %v4320_v45, %v4172_v13  ;;  %v4361_v33 = vpop.f32.mrf.mxu0  ;;  %v4411_v43 = vmul.f32 0.027777778, %v4319_v14  ;;  %v6129_v54 = vld [vmem:[%s9126_s21 + $0x220] sm:$0xff]   ;;  %v6132_v45 = vld [vmem:[%s9126_s21 + $0x250] sm:$0xff]  }
 0x793   :  { %5715 = vmatprep.subr.bf16.mxu0 %v6098_v31  ;;  %5733 = vmatprep.subr.bf16.mxu1 %v6099_v49  ;;  %v4322_v1 = vpop.f32.mrf.mxu1  ;;  %v4362_v42 = vadd.f32 %v4361_v33, %v4180_v2  ;;  %v4413_v21 = vmul.f32 0.027777778, %v4360_v39  ;;  %v6130_v31 = vld [vmem:[%s9126_s21 + $0x258] sm:$0xff]   ;;  %v6135_v33 = vld [vmem:[%s9126_s21 + $0x208] sm:$0xff]  }
 0x794   :  { %v4412_v32 = vmul.f32 0.027777778, %v4321_v11  ;;  %v4363_v37 = vpop.f32.mrf.mxu0  ;;  %v4421_v22 = vpack.c.bf16 %v4411_v43, %v4411_v43  ;;  %v6131_v2 = vld [vmem:[%s9126_s21 + $0x218] sm:$0xff]   ;;  %v6134_v11 = vld [vmem:[%s9126_s21 + $0x248] sm:$0xff]  }
 0x795   :  { %v4323_v29 = vpop.f32.mrf.mxu1  ;;  %v4414_v61 = vmul.f32 0.027777778, %v4362_v42  ;;  %v4423_v17 = vpack.c.bf16 %v4413_v21, %v4413_v21 }
 0x796   :  { %5716 = vmatpush3.bf16.msra.mxu0 %v6100_v58  ;;  %5734 = vmatpush3.bf16.msra.mxu1 %v6101_v41  ;;  %v4422_v18 = vpack.c.bf16 %v4412_v32, %v4412_v32  ;;  %v4364_v38 = vpop.f32.mrf.mxu0  ;;  %v6133_v58 = vld [vmem:[%s9126_s21 + $0x210] sm:$0xff]   ;;  %v4184_v41 = vrot.slane %v4146_v12, %v9770_v3  ;;  %v6137_v3 = vld [vmem:[%s9126_s21 + $0x200] sm:$0xff]  }
 0x797   :  { %5717 = vmatprep.subr.bf16.mxu0 %v6102_v5  ;;  %5735 = vmatprep.subr.bf16.mxu1 %v6103_v26  ;;  %v4424_v47 = vpack.c.bf16 %v4414_v61, %v4414_v61  ;;  %v6136_v26 = vld [vmem:[%s9126_s21 + $0x240] sm:$0xff]  }
 0x798   :  { %5186 = vmatprep.mubr.bf16.mxu0 %v4422_v18 }
 0x799   :  { %5226 = vmatprep.mubr.bf16.mxu1 %v4424_v47 }
 0x79a   :  { %5718 = vmatpush3.bf16.msra.mxu0 %v6104_v57  ;;  %5736 = vmatpush3.bf16.msra.mxu1 %v6105_v27 }
 0x79b   :  { %5719 = vmatprep.subr.bf16.mxu0 %v6106_v20  ;;  %5737 = vmatprep.subr.bf16.mxu1 %v6107_v15 }
 0x79e   :  { %5720 = vmatpush3.bf16.msra.mxu0 %v6108_v59  ;;  %5738 = vmatpush3.bf16.msra.mxu1 %v6109_v9 }
 0x79f   :  { %5721 = vmatprep.subr.bf16.mxu0 %v6110_v53  ;;  %5739 = vmatprep.subr.bf16.mxu1 %v6111_v8 }
 0x7a2   :  { %5722 = vmatpush3.bf16.msra.mxu0 %v6112_v24  ;;  %5740 = vmatpush3.bf16.msra.mxu1 %v6113_v56  ;;  %v5510_v56 = vld [vmem:[%s9127_s22] ss:$0 sm:$0xff] }
 0x7a3   :  { %5723 = vmatprep.subr.bf16.mxu0 %v6114_v44  ;;  %5741 = vmatprep.subr.bf16.mxu1 %v6115_v16 }
 0x7a6   :  { %5724 = vmatpush3.bf16.msra.mxu0 %v6116_v25  ;;  %5742 = vmatpush3.bf16.msra.mxu1 %v6117_v19 }
 0x7a7   :  { %5743 = vmatprep.subr.bf16.mxu1 %v6118_v40  ;;  %5753 = vmatprep.subr.bf16.mxu0 %v6119_v46 }
 0x7a9   :  { %5187 = vmatmul.mubr.bf16.vlgmr.msra.gmra.mxu0 %v4421_v22 }
 0x7aa   :  { %5744 = vmatpush3.bf16.msra.mxu1 %v6120_v60  ;;  %5754 = vmatpush3.bf16.msra.mxu0 %v6121_v36 }
 0x7ab   :  { %5745 = vmatprep.subr.bf16.mxu1 %v6122_v23  ;;  %5755 = vmatprep.subr.bf16.mxu0 %v6123_v4 }
 0x7ae   :  { %5746 = vmatpush3.bf16.msra.mxu1 %v6124_v35  ;;  %5756 = vmatpush3.bf16.msra.mxu0 %v6125_v6 }
 0x7af   :  { %5757 = vmatprep.subr.bf16.mxu0 %v6126_v48  ;;  %v4400_v34 = vpop.f32.mrf.mxu1 }
 0x7b0   :  { %v4401_v5 = vadd.f32 %v4400_v34, %v4184_v41 }
 0x7b1   :  { %5227 = vmatmul.mubr.bf16.vlgmr.msra.gmra.mxu1 %v4423_v17  ;;  %v4402_v7 = vpop.f32.mrf.mxu1 }
 0x7b2   :  { %5758 = vmatpush3.bf16.msra.mxu0 %v6127_v28  ;;  %v4403_v13 = vadd.f32 %v4402_v7, %v4188_v62  ;;  %v4415_v1 = vmul.f32 0.027777778, %v4401_v5 }
 0x7b3   :  { %5759 = vmatprep.subr.bf16.mxu0 %v6128_v30  ;;  %v4404_v10 = vpop.f32.mrf.mxu1 }
 0x7b4   :  { %v4416_v49 = vmul.f32 0.027777778, %v4403_v13  ;;  %v4425_v42 = vpack.c.bf16 %v4415_v1, %v4415_v1 }
 0x7b5   :  { %v4405_v52 = vpop.f32.mrf.mxu1 }
 0x7b6   :  { %5760 = vmatpush3.bf16.msra.mxu0 %v6129_v54  ;;  %v4426_v0 = vpack.c.bf16 %v4416_v49, %v4416_v49 }
 0x7b7   :  { %5761 = vmatprep.subr.bf16.mxu0 %v6130_v31 }
 0x7b8   :  { %5266 = vmatprep.mubr.bf16.mxu0 %v4426_v0 }
 0x7ba   :  { %5762 = vmatpush3.bf16.msra.mxu0 %v6131_v2 }
 0x7bb   :  { %5763 = vmatprep.subr.bf16.mxu0 %v6132_v45 }
 0x7be   :  { %5764 = vmatpush3.bf16.msra.mxu0 %v6133_v58 }
 0x7bf   :  { %5765 = vmatprep.subr.bf16.mxu0 %v6134_v11 }
 0x7c2   :  { %5766 = vmatpush3.bf16.msra.mxu0 %v6135_v33 }
 0x7c3   :  { %5767 = vmatprep.subr.bf16.mxu0 %v6136_v26 }
 0x7c6   :  { %5768 = vmatpush3.bf16.msra.mxu0 %v6137_v3 }
 0x7c9   :  { %5267 = vmatmul.mubr.bf16.vlgmr.msra.gmra.mxu0 %v4425_v42 }
 0x849   :  { %v5681_v32 = vpop.f32.mrf.mxu0 }
 0x84b   :  { %v5682_v37 = vpop.f32.mrf.mxu0 }
 0x84c   :  { %v5683_v24 = vadd.f32 %v5682_v37, %v5681_v32 }
 0x84d   :  { %v5684_v29 = vpop.f32.mrf.mxu0 }
 0x84e   :  { %v5109_v44 = vadd.f32 %v5683_v24, %v5510_v56 }
 0x84f   :  { %v5685_v61 = vpop.f32.mrf.mxu0 }
 0x851   :  { %v5703_v57 = vpop.f32.mrf.mxu1 }
 0x853   :  { %v5704_v27 = vpop.f32.mrf.mxu1 }
 0x854   :  { %v5705_v14 = vadd.f32 %v5704_v27, %v5703_v57 }
 0x855   :  { %v5706_v18 = vpop.f32.mrf.mxu1 }
 0x856   :  { %v5149_v55 = vadd.f32 %v5705_v14, %v5109_v44 }
 0x857   :  { %v5707_v38 = vpop.f32.mrf.mxu1 }
 0x869   :  { %v5725_v20 = vpop.f32.mrf.mxu0 }
 0x86b   :  { %v5726_v15 = vpop.f32.mrf.mxu0 }
 0x86c   :  { %v5727_v16 = vadd.f32 %v5726_v15, %v5725_v20 }
 0x86d   :  { %v5728_v47 = vpop.f32.mrf.mxu0 }
 0x86e   :  { %v5189_v43 = vadd.f32 %v5727_v16, %v5149_v55 }
 0x86f   :  { %v5729_v59 = vpop.f32.mrf.mxu0 }
 0x871   :  { %v5747_v9 = vpop.f32.mrf.mxu1 }
 0x873   :  { %v5748_v50 = vpop.f32.mrf.mxu1 }
 0x874   :  { %v5749_v25 = vadd.f32 %v5748_v50, %v5747_v9 }
 0x875   :  { %v5750_v53 = vpop.f32.mrf.mxu1 }
 0x876   :  { %v5229_v46 = vadd.f32 %v5749_v25, %v5189_v43 }
 0x877   :  { %v5751_v8 = vpop.f32.mrf.mxu1 }
 0x889   :  { %v5769_v19 = vpop.f32.mrf.mxu0 }
 0x88b   :  { %v5770_v40 = vpop.f32.mrf.mxu0 }
 0x88c   :  { %v5771_v63 = vadd.f32 %v5770_v40, %v5769_v19 }
 0x88d   :  { %v5772_v39 = vpop.f32.mrf.mxu0 }
 0x88e   :  { %v5269_v60 = vadd.f32 %v5771_v63, %v5229_v46 }
 0x88f   :  { %v5773_v36 = vpop.f32.mrf.mxu0 }
 0x890   :  { %5274 = vst [vmem:[#allocation4] sm:$0x3] %v5269_v60 }
 0x891   :  { %6153 = shalt.err (!%p6150_p4)
}
 0x892   :  { %5284 = dma.vmem_to_hbm [thread:$0]  %s5282_s27, 32, %s9128_s23, [#allocation5]  }
 0x893   :  { %6162 = dma.done.wait [#allocation5], 32  }
 0x894   :  { %6163 = vsyncadd [#allocation5], 4294967264 }
 0x895   :  { %5288 = vsyncpa [#allocation5], 1 }

</bundles_post_ra>
